<compile_context>
chip_gen: v6e
topology: v6e:2x2x1
jax: 0.10.0
libtpu: 0.0.40
codegen_flags: <defaults>
</compile_context>

<pallas_src>
import functools
import math

import jax
import jax.numpy as jnp
from jax import lax
from jax.experimental import pallas as pl
from jax.experimental.pallas import tpu as pltpu


def _time_attention_kernel(x_ref, params_ref, o_ref, *, n_heads, exp_dtype):
    """x_ref: (1, 1, M) lane-dense slab (whole sequence, resident across q blocks).
    params_ref: (6, H) SMEM scalar table: rows = a, b, c, d, e, bias(total, col 0).
    o_ref: (1, 1, tq) lane-dense output block for this (batch, q-block)."""
    f32 = jnp.float32
    tq = o_ref.shape[-1]
    qi = pl.program_id(1)

    x_row = x_ref[0].astype(f32)                                   # (1, M) keys/values
    start = pl.multiple_of(qi * tq, tq)
    # Only the small per-block query slice is transposed (tq elements, not M).
    xq_col = x_ref[0, :, pl.ds(start, tq)].reshape(tq, 1).astype(f32)   # (tq, 1)

    def head_body(h, y_col):
        a = params_ref[0, h]
        b = params_ref[1, h]
        c = params_ref[2, h]
        d = params_ref[3, h]
        e = params_ref[4, h]
        # Rank-2 scores: s[i, j] = (a*x_i + c) * x_j + (b*x_i + d).  VPU only,
        # no MXU matmul, no K/V buffers.
        s = (a * xq_col + c) * x_row + (b * xq_col + d)            # (tq, M)
        s = s - jnp.max(s, axis=-1, keepdims=True)
        p = jnp.exp(s.astype(exp_dtype))                           # EUP — the true floor
        pf = p.astype(f32)
        den = jnp.sum(pf, axis=-1, keepdims=True)                  # (tq, 1)
        px = jnp.sum(pf * x_row, axis=-1, keepdims=True)           # (tq, 1)
        # Exact softmax normalization (review: keep denominator exact).
        return y_col + (e * px) / den

    y = lax.fori_loop(0, n_heads, head_body, jnp.zeros((tq, 1), f32), unroll=True)
    y = y + params_ref[5, 0]                                       # fused output bias
    # Lane-dense unmasked store of this query block.
    o_ref[...] = y.reshape(1, 1, tq).astype(o_ref.dtype)


def time_attention(x, proj_w, proj_b, in_proj_w, in_proj_b,
                   out_w, out_b, proj1_w, proj1_b, *,
                   n_heads=4, q_block=256, exp_dtype=jnp.float32):
    """x: (B, N, D).  Parameters use PyTorch shapes:
       proj_w (E,1), proj_b (E,), in_proj_w (3E,E), in_proj_b (3E,),
       out_w (E,E), out_b (E,), proj1_w (1,E), proj1_b (1,)."""
    B, N, D = x.shape
    E = proj_w.shape[0]
    H = n_heads
    assert E % H == 0
    hd = E // H
    M = N * D
    scale = 1.0 / math.sqrt(hd)
    f32 = jnp.float32

    # Query-block size: must divide M; multiple of 128 for unmasked stores (or = M).
    q_block = int(min(q_block, M))
    if (M % q_block != 0) or (q_block % 128 != 0 and q_block != M):
        q_block = M
    n_q = M // q_block

    # ---- Fold the rank-1 input projection into per-head Q/K/V affine forms ----
    pw = proj_w.reshape(E).astype(f32)              # Linear(1, E) weight column
    pb = proj_b.reshape(E).astype(f32)
    Wq, Wk, Wv = (in_proj_w[:E].astype(f32), in_proj_w[E:2 * E].astype(f32),
                  in_proj_w[2 * E:].astype(f32))
    bq, bk, bv = (in_proj_b[:E].astype(f32), in_proj_b[E:2 * E].astype(f32),
                  in_proj_b[2 * E:].astype(f32))

    vq = (Wq @ pw) * scale                          # 1/sqrt(hd) folded into q terms
    cq = (Wq @ pb + bq) * scale
    vk = Wk @ pw
    ck = Wk @ pb + bk
    vv = Wv @ pw
    cv = Wv @ pb + bv

    # ---- Fold out_proj into proj1 ----
    p1w = proj1_w.reshape(E).astype(f32)
    w_final = p1w @ out_w.astype(f32)                                       # (E,)
    b_final = jnp.dot(p1w, out_b.astype(f32)) + proj1_b.reshape(()).astype(f32)

    per_head = lambda v: v.reshape(H, hd)
    vq_h, cq_h = per_head(vq), per_head(cq)
    vk_h, ck_h = per_head(vk), per_head(ck)
    vv_h, cv_h = per_head(vv), per_head(cv)
    wf_h = per_head(w_final)

    # ---- Rank-2 score / value folding: 6 scalars per head + 1 global bias ----
    coef_a = jnp.sum(vq_h * vk_h, axis=1)           # x_i * x_j coefficient
    coef_b = jnp.sum(vq_h * ck_h, axis=1)           # x_i coefficient (row constant)
    coef_c = jnp.sum(cq_h * vk_h, axis=1)           # x_j coefficient
    coef_d = jnp.sum(cq_h * ck_h, axis=1)           # constant (row constant)
    coef_e = jnp.sum(vv_h * wf_h, axis=1)           # weight of softmax @ x
    coef_f = jnp.sum(cv_h * wf_h, axis=1)           # constant per head -> bias
    bias_total = b_final + jnp.sum(coef_f)

    params = jnp.stack([coef_a, coef_b, coef_c, coef_d, coef_e,
                        jnp.full((H,), bias_total, dtype=f32)], axis=0)     # (6, H)

    x_slab = x.reshape(B, 1, M).astype(f32)         # lane-dense input slab

    # ---- VMEM budget derived from tile sizes, clamped v7x-safe (<= 40 MiB) ----
    slab_bytes = 4 * (2 * M + 2 * q_block)                       # double-buffered I/O
    work_bytes = 4 * 6 * q_block * M                             # (tq, M) temporaries
    vmem_limit = int(min(40 * 1024 * 1024,
                         max(16 * 1024 * 1024, slab_bytes + work_bytes + (4 << 20))))

    kernel = functools.partial(_time_attention_kernel, n_heads=H, exp_dtype=exp_dtype)

    grid_spec = pltpu.PrefetchScalarGridSpec(
        num_scalar_prefetch=0,
        grid=(B, n_q),
        in_specs=[
            # Full sequence slab: block index constant across q blocks -> fetched
            # once per batch element, kept resident while qi iterates.
            pl.BlockSpec((1, 1, M), lambda b, qi: (b, 0, 0)),
            # Single packed scalar table in SMEM (one DMA, no padded VMEM tiles).
            pl.BlockSpec(memory_space=pltpu.MemorySpace.SMEM),
        ],
        out_specs=pl.BlockSpec((1, 1, q_block), lambda b, qi: (b, 0, qi)),
    )

    out = pl.pallas_call(
        kernel,
        out_shape=jax.ShapeDtypeStruct((B, 1, M), x.dtype),
        grid_spec=grid_spec,
        compiler_params=pltpu.CompilerParams(
            dimension_semantics=("parallel", "parallel"),   # all output blocks independent
            vmem_limit_bytes=vmem_limit,
        ),
    )(x_slab, params)
    return out.reshape(B, N, D)


def _reference(x, proj_w, proj_b, in_proj_w, in_proj_b, out_w, out_b,
               proj1_w, proj1_b, n_heads):
    """Pure-JAX reference mirroring the PyTorch module (eval mode)."""
    B, N, D = x.shape
    E = proj_w.shape[0]
    H = n_heads
    hd = E // H
    M = N * D
    f32 = jnp.float32
    xf = x.reshape(B, M, 1).astype(f32)
    h = xf @ proj_w.T.astype(f32) + proj_b.astype(f32)                      # (B, M, E)
    q = h @ in_proj_w[:E].T.astype(f32) + in_proj_b[:E].astype(f32)
    k = h @ in_proj_w[E:2 * E].T.astype(f32) + in_proj_b[E:2 * E].astype(f32)
    v = h @ in_proj_w[2 * E:].T.astype(f32) + in_proj_b[2 * E:].astype(f32)
    split = lambda t: t.reshape(B, M, H, hd).transpose(0, 2, 1, 3)          # (B,H,M,hd)
    qh, kh, vh = split(q), split(k), split(v)
    s = jnp.einsum("bhqd,bhkd->bhqk", qh * (1.0 / math.sqrt(hd)), kh)
    attn = jax.nn.softmax(s, axis=-1)
    ctx = jnp.einsum("bhqk,bhkd->bhqd", attn, vh)
    ctx = ctx.transpose(0, 2, 1, 3).reshape(B, M, E)
    o = ctx @ out_w.T.astype(f32) + out_b.astype(f32)
    y = o @ proj1_w.T.astype(f32) + proj1_b.astype(f32)
    return y.reshape(B, N, D)


if __name__ == "__main__":
    # Small shapes consistent with the module: embed_size = D = 32, n_heads = 4.
    B, N, D = 2, 8, 32
    E, H = 32, 4

    key = jax.random.PRNGKey(0)
    ks = jax.random.split(key, 9)
    x = jax.random.normal(ks[0], (B, N, D), jnp.float32)

    proj_w = jax.random.normal(ks[1], (E, 1), jnp.float32) * 0.5
    proj_b = jax.random.normal(ks[2], (E,), jnp.float32) * 0.1
    in_proj_w = jax.random.normal(ks[3], (3 * E, E), jnp.float32) * (1.0 / math.sqrt(E))
    in_proj_b = jax.random.normal(ks[4], (3 * E,), jnp.float32) * 0.02
    out_w = jax.random.normal(ks[5], (E, E), jnp.float32) * (1.0 / math.sqrt(E))
    out_b = jax.random.normal(ks[6], (E,), jnp.float32) * 0.02
    proj1_w = jax.random.normal(ks[7], (1, E), jnp.float32) * (1.0 / math.sqrt(E))
    proj1_b = jax.random.normal(ks[8], (1,), jnp.float32) * 0.02

    # q_block=128 < M=256 so the (B, n_qblocks) grid-tiled path is exercised.
    out = time_attention(x, proj_w, proj_b, in_proj_w, in_proj_b,
                         out_w, out_b, proj1_w, proj1_b,
                         n_heads=H, q_block=128)
    jax.block_until_ready(out)
    assert out.shape == (B, N, D) and out.dtype == jnp.float32

    ref = _reference(x, proj_w, proj_b, in_proj_w, in_proj_b,
                     out_w, out_b, proj1_w, proj1_b, H)
    err = float(jnp.max(jnp.abs(out - ref)))
    assert err < 1e-3, f"max abs error vs reference: {err}"
    print("KERNEL_OK")
</pallas_src>

<mosaic_0001>
module attributes {stable_mosaic.version = 11 : i64} {
  func.func @_time_attention_kernel(%arg0: i32, %arg1: i32, %arg2: memref<1x1x256xf32, #tpu.memory_space<vmem>>, %arg3: memref<6x4xf32, #tpu.memory_space<smem>>, %arg4: memref<1x1x128xf32, #tpu.memory_space<vmem>>) attributes {dimension_semantics = [#tpu.dimension_semantics<parallel>, #tpu.dimension_semantics<parallel>], iteration_bounds = array<i64: 2, 2>, scalar_prefetch = 0 : i64, scratch_operands = 0 : i64, tpu.core_type = #tpu.core_type<tc>, window_params = [{transform_indices = @transform_0, window_bounds = array<i64: 1, 1, 256>}, {transform_indices = @transform_1, window_bounds = array<i64: 6, 4>}, {transform_indices = @transform_2, window_bounds = array<i64: 1, 1, 128>}]} {
    %c0 = arith.constant 0 : index
    %c0_0 = arith.constant 0 : index
    %c0_1 = arith.constant 0 : index
    %0 = vector.load %arg2[%c0, %c0_0, %c0_1] : memref<1x1x256xf32, #tpu.memory_space<vmem>>, vector<1x1x256xf32>
    %1 = vector.shape_cast %0 : vector<1x1x256xf32> to vector<1x256xf32>
    %c128_i32 = arith.constant 128 : i32
    %2 = arith.muli %arg1, %c128_i32 : i32
    %3 = tpu.assume_multiple %2, 128 : i32
    %c0_2 = arith.constant 0 : index
    %c0_3 = arith.constant 0 : index
    %4 = arith.index_cast %3 : i32 to index
    %5 = vector.load %arg2[%c0_2, %c0_3, %4] : memref<1x1x256xf32, #tpu.memory_space<vmem>>, vector<1x1x128xf32>
    %6 = vector.shape_cast %5 : vector<1x1x128xf32> to vector<1x128xf32>
    %7 = vector.shape_cast %6 : vector<1x128xf32> to vector<128x1xf32>
    %cst = arith.constant 0.000000e+00 : f32
    %8 = vector.broadcast %cst : f32 to vector<128x1xf32>
    %c0_i32 = arith.constant 0 : i32
    %c0_4 = arith.constant 0 : index
    %9 = arith.index_cast %c0_i32 : i32 to index
    %10 = memref.load %arg3[%c0_4, %9] : memref<6x4xf32, #tpu.memory_space<smem>>
    %c1 = arith.constant 1 : index
    %11 = arith.index_cast %c0_i32 : i32 to index
    %12 = memref.load %arg3[%c1, %11] : memref<6x4xf32, #tpu.memory_space<smem>>
    %c2 = arith.constant 2 : index
    %13 = arith.index_cast %c0_i32 : i32 to index
    %14 = memref.load %arg3[%c2, %13] : memref<6x4xf32, #tpu.memory_space<smem>>
    %c3 = arith.constant 3 : index
    %15 = arith.index_cast %c0_i32 : i32 to index
    %16 = memref.load %arg3[%c3, %15] : memref<6x4xf32, #tpu.memory_space<smem>>
    %c4 = arith.constant 4 : index
    %17 = arith.index_cast %c0_i32 : i32 to index
    %18 = memref.load %arg3[%c4, %17] : memref<6x4xf32, #tpu.memory_space<smem>>
    %19 = vector.broadcast %10 : f32 to vector<128x1xf32>
    %20 = arith.mulf %19, %7 : vector<128x1xf32>
    %21 = vector.broadcast %14 : f32 to vector<128x1xf32>
    %22 = arith.addf %20, %21 : vector<128x1xf32>
    %23 = vector.broadcast %22 : vector<128x1xf32> to vector<128x256xf32>
    %24 = vector.broadcast %1 : vector<1x256xf32> to vector<128x256xf32>
    %25 = arith.mulf %23, %24 : vector<128x256xf32>
    %26 = vector.broadcast %12 : f32 to vector<128x1xf32>
    %27 = arith.mulf %26, %7 : vector<128x1xf32>
    %28 = vector.broadcast %16 : f32 to vector<128x1xf32>
    %29 = arith.addf %27, %28 : vector<128x1xf32>
    %30 = vector.broadcast %29 : vector<128x1xf32> to vector<128x256xf32>
    %31 = arith.addf %25, %30 : vector<128x256xf32>
    %cst_5 = arith.constant dense<0xFF800000> : vector<128xf32>
    %32 = vector.multi_reduction <maximumf>, %31, %cst_5 [1] : vector<128x256xf32> to vector<128xf32>
    %33 = vector.shape_cast %32 : vector<128xf32> to vector<128x1xf32>
    %34 = vector.broadcast %33 : vector<128x1xf32> to vector<128x256xf32>
    %35 = arith.subf %31, %34 : vector<128x256xf32>
    %36 = math.exp %35 : vector<128x256xf32>
    %cst_6 = arith.constant dense<0.000000e+00> : vector<128xf32>
    %37 = vector.multi_reduction <add>, %36, %cst_6 [1] : vector<128x256xf32> to vector<128xf32>
    %38 = vector.shape_cast %37 : vector<128xf32> to vector<128x1xf32>
    %39 = vector.broadcast %1 : vector<1x256xf32> to vector<128x256xf32>
    %40 = arith.mulf %36, %39 : vector<128x256xf32>
    %cst_7 = arith.constant dense<0.000000e+00> : vector<128xf32>
    %41 = vector.multi_reduction <add>, %40, %cst_7 [1] : vector<128x256xf32> to vector<128xf32>
    %42 = vector.shape_cast %41 : vector<128xf32> to vector<128x1xf32>
    %43 = vector.broadcast %18 : f32 to vector<128x1xf32>
    %44 = arith.mulf %43, %42 : vector<128x1xf32>
    %45 = arith.divf %44, %38 : vector<128x1xf32>
    %46 = arith.addf %8, %45 : vector<128x1xf32>
    %c1_i32 = arith.constant 1 : i32
    %c0_8 = arith.constant 0 : index
    %47 = arith.index_cast %c1_i32 : i32 to index
    %48 = memref.load %arg3[%c0_8, %47] : memref<6x4xf32, #tpu.memory_space<smem>>
    %c1_9 = arith.constant 1 : index
    %49 = arith.index_cast %c1_i32 : i32 to index
    %50 = memref.load %arg3[%c1_9, %49] : memref<6x4xf32, #tpu.memory_space<smem>>
    %c2_10 = arith.constant 2 : index
    %51 = arith.index_cast %c1_i32 : i32 to index
    %52 = memref.load %arg3[%c2_10, %51] : memref<6x4xf32, #tpu.memory_space<smem>>
    %c3_11 = arith.constant 3 : index
    %53 = arith.index_cast %c1_i32 : i32 to index
    %54 = memref.load %arg3[%c3_11, %53] : memref<6x4xf32, #tpu.memory_space<smem>>
    %c4_12 = arith.constant 4 : index
    %55 = arith.index_cast %c1_i32 : i32 to index
    %56 = memref.load %arg3[%c4_12, %55] : memref<6x4xf32, #tpu.memory_space<smem>>
    %57 = vector.broadcast %48 : f32 to vector<128x1xf32>
    %58 = arith.mulf %57, %7 : vector<128x1xf32>
    %59 = vector.broadcast %52 : f32 to vector<128x1xf32>
    %60 = arith.addf %58, %59 : vector<128x1xf32>
    %61 = vector.broadcast %60 : vector<128x1xf32> to vector<128x256xf32>
    %62 = vector.broadcast %1 : vector<1x256xf32> to vector<128x256xf32>
    %63 = arith.mulf %61, %62 : vector<128x256xf32>
    %64 = vector.broadcast %50 : f32 to vector<128x1xf32>
    %65 = arith.mulf %64, %7 : vector<128x1xf32>
    %66 = vector.broadcast %54 : f32 to vector<128x1xf32>
    %67 = arith.addf %65, %66 : vector<128x1xf32>
    %68 = vector.broadcast %67 : vector<128x1xf32> to vector<128x256xf32>
    %69 = arith.addf %63, %68 : vector<128x256xf32>
    %cst_13 = arith.constant dense<0xFF800000> : vector<128xf32>
    %70 = vector.multi_reduction <maximumf>, %69, %cst_13 [1] : vector<128x256xf32> to vector<128xf32>
    %71 = vector.shape_cast %70 : vector<128xf32> to vector<128x1xf32>
    %72 = vector.broadcast %71 : vector<128x1xf32> to vector<128x256xf32>
    %73 = arith.subf %69, %72 : vector<128x256xf32>
    %74 = math.exp %73 : vector<128x256xf32>
    %cst_14 = arith.constant dense<0.000000e+00> : vector<128xf32>
    %75 = vector.multi_reduction <add>, %74, %cst_14 [1] : vector<128x256xf32> to vector<128xf32>
    %76 = vector.shape_cast %75 : vector<128xf32> to vector<128x1xf32>
    %77 = vector.broadcast %1 : vector<1x256xf32> to vector<128x256xf32>
    %78 = arith.mulf %74, %77 : vector<128x256xf32>
    %cst_15 = arith.constant dense<0.000000e+00> : vector<128xf32>
    %79 = vector.multi_reduction <add>, %78, %cst_15 [1] : vector<128x256xf32> to vector<128xf32>
    %80 = vector.shape_cast %79 : vector<128xf32> to vector<128x1xf32>
    %81 = vector.broadcast %56 : f32 to vector<128x1xf32>
    %82 = arith.mulf %81, %80 : vector<128x1xf32>
    %83 = arith.divf %82, %76 : vector<128x1xf32>
    %84 = arith.addf %46, %83 : vector<128x1xf32>
    %c2_i32 = arith.constant 2 : i32
    %c0_16 = arith.constant 0 : index
    %85 = arith.index_cast %c2_i32 : i32 to index
    %86 = memref.load %arg3[%c0_16, %85] : memref<6x4xf32, #tpu.memory_space<smem>>
    %c1_17 = arith.constant 1 : index
    %87 = arith.index_cast %c2_i32 : i32 to index
    %88 = memref.load %arg3[%c1_17, %87] : memref<6x4xf32, #tpu.memory_space<smem>>
    %c2_18 = arith.constant 2 : index
    %89 = arith.index_cast %c2_i32 : i32 to index
    %90 = memref.load %arg3[%c2_18, %89] : memref<6x4xf32, #tpu.memory_space<smem>>
    %c3_19 = arith.constant 3 : index
    %91 = arith.index_cast %c2_i32 : i32 to index
    %92 = memref.load %arg3[%c3_19, %91] : memref<6x4xf32, #tpu.memory_space<smem>>
    %c4_20 = arith.constant 4 : index
    %93 = arith.index_cast %c2_i32 : i32 to index
    %94 = memref.load %arg3[%c4_20, %93] : memref<6x4xf32, #tpu.memory_space<smem>>
    %95 = vector.broadcast %86 : f32 to vector<128x1xf32>
    %96 = arith.mulf %95, %7 : vector<128x1xf32>
    %97 = vector.broadcast %90 : f32 to vector<128x1xf32>
    %98 = arith.addf %96, %97 : vector<128x1xf32>
    %99 = vector.broadcast %98 : vector<128x1xf32> to vector<128x256xf32>
    %100 = vector.broadcast %1 : vector<1x256xf32> to vector<128x256xf32>
    %101 = arith.mulf %99, %100 : vector<128x256xf32>
    %102 = vector.broadcast %88 : f32 to vector<128x1xf32>
    %103 = arith.mulf %102, %7 : vector<128x1xf32>
    %104 = vector.broadcast %92 : f32 to vector<128x1xf32>
    %105 = arith.addf %103, %104 : vector<128x1xf32>
    %106 = vector.broadcast %105 : vector<128x1xf32> to vector<128x256xf32>
    %107 = arith.addf %101, %106 : vector<128x256xf32>
    %cst_21 = arith.constant dense<0xFF800000> : vector<128xf32>
    %108 = vector.multi_reduction <maximumf>, %107, %cst_21 [1] : vector<128x256xf32> to vector<128xf32>
    %109 = vector.shape_cast %108 : vector<128xf32> to vector<128x1xf32>
    %110 = vector.broadcast %109 : vector<128x1xf32> to vector<128x256xf32>
    %111 = arith.subf %107, %110 : vector<128x256xf32>
    %112 = math.exp %111 : vector<128x256xf32>
    %cst_22 = arith.constant dense<0.000000e+00> : vector<128xf32>
    %113 = vector.multi_reduction <add>, %112, %cst_22 [1] : vector<128x256xf32> to vector<128xf32>
    %114 = vector.shape_cast %113 : vector<128xf32> to vector<128x1xf32>
    %115 = vector.broadcast %1 : vector<1x256xf32> to vector<128x256xf32>
    %116 = arith.mulf %112, %115 : vector<128x256xf32>
    %cst_23 = arith.constant dense<0.000000e+00> : vector<128xf32>
    %117 = vector.multi_reduction <add>, %116, %cst_23 [1] : vector<128x256xf32> to vector<128xf32>
    %118 = vector.shape_cast %117 : vector<128xf32> to vector<128x1xf32>
    %119 = vector.broadcast %94 : f32 to vector<128x1xf32>
    %120 = arith.mulf %119, %118 : vector<128x1xf32>
    %121 = arith.divf %120, %114 : vector<128x1xf32>
    %122 = arith.addf %84, %121 : vector<128x1xf32>
    %c3_i32 = arith.constant 3 : i32
    %c0_24 = arith.constant 0 : index
    %123 = arith.index_cast %c3_i32 : i32 to index
    %124 = memref.load %arg3[%c0_24, %123] : memref<6x4xf32, #tpu.memory_space<smem>>
    %c1_25 = arith.constant 1 : index
    %125 = arith.index_cast %c3_i32 : i32 to index
    %126 = memref.load %arg3[%c1_25, %125] : memref<6x4xf32, #tpu.memory_space<smem>>
    %c2_26 = arith.constant 2 : index
    %127 = arith.index_cast %c3_i32 : i32 to index
    %128 = memref.load %arg3[%c2_26, %127] : memref<6x4xf32, #tpu.memory_space<smem>>
    %c3_27 = arith.constant 3 : index
    %129 = arith.index_cast %c3_i32 : i32 to index
    %130 = memref.load %arg3[%c3_27, %129] : memref<6x4xf32, #tpu.memory_space<smem>>
    %c4_28 = arith.constant 4 : index
    %131 = arith.index_cast %c3_i32 : i32 to index
    %132 = memref.load %arg3[%c4_28, %131] : memref<6x4xf32, #tpu.memory_space<smem>>
    %133 = vector.broadcast %124 : f32 to vector<128x1xf32>
    %134 = arith.mulf %133, %7 : vector<128x1xf32>
    %135 = vector.broadcast %128 : f32 to vector<128x1xf32>
    %136 = arith.addf %134, %135 : vector<128x1xf32>
    %137 = vector.broadcast %136 : vector<128x1xf32> to vector<128x256xf32>
    %138 = vector.broadcast %1 : vector<1x256xf32> to vector<128x256xf32>
    %139 = arith.mulf %137, %138 : vector<128x256xf32>
    %140 = vector.broadcast %126 : f32 to vector<128x1xf32>
    %141 = arith.mulf %140, %7 : vector<128x1xf32>
    %142 = vector.broadcast %130 : f32 to vector<128x1xf32>
    %143 = arith.addf %141, %142 : vector<128x1xf32>
    %144 = vector.broadcast %143 : vector<128x1xf32> to vector<128x256xf32>
    %145 = arith.addf %139, %144 : vector<128x256xf32>
    %cst_29 = arith.constant dense<0xFF800000> : vector<128xf32>
    %146 = vector.multi_reduction <maximumf>, %145, %cst_29 [1] : vector<128x256xf32> to vector<128xf32>
    %147 = vector.shape_cast %146 : vector<128xf32> to vector<128x1xf32>
    %148 = vector.broadcast %147 : vector<128x1xf32> to vector<128x256xf32>
    %149 = arith.subf %145, %148 : vector<128x256xf32>
    %150 = math.exp %149 : vector<128x256xf32>
    %cst_30 = arith.constant dense<0.000000e+00> : vector<128xf32>
    %151 = vector.multi_reduction <add>, %150, %cst_30 [1] : vector<128x256xf32> to vector<128xf32>
    %152 = vector.shape_cast %151 : vector<128xf32> to vector<128x1xf32>
    %153 = vector.broadcast %1 : vector<1x256xf32> to vector<128x256xf32>
    %154 = arith.mulf %150, %153 : vector<128x256xf32>
    %cst_31 = arith.constant dense<0.000000e+00> : vector<128xf32>
    %155 = vector.multi_reduction <add>, %154, %cst_31 [1] : vector<128x256xf32> to vector<128xf32>
    %156 = vector.shape_cast %155 : vector<128xf32> to vector<128x1xf32>
    %157 = vector.broadcast %132 : f32 to vector<128x1xf32>
    %158 = arith.mulf %157, %156 : vector<128x1xf32>
    %159 = arith.divf %158, %152 : vector<128x1xf32>
    %160 = arith.addf %122, %159 : vector<128x1xf32>
    %c4_i32 = arith.constant 4 : i32
    %c5 = arith.constant 5 : index
    %c0_32 = arith.constant 0 : index
    %161 = memref.load %arg3[%c5, %c0_32] : memref<6x4xf32, #tpu.memory_space<smem>>
    %162 = vector.broadcast %161 : f32 to vector<128x1xf32>
    %163 = arith.addf %160, %162 : vector<128x1xf32>
    %164 = vector.shape_cast %163 : vector<128x1xf32> to vector<1x1x128xf32>
    %c0_33 = arith.constant 0 : index
    %c0_34 = arith.constant 0 : index
    %c0_35 = arith.constant 0 : index
    %165 = vector.load %arg4[%c0_33, %c0_34, %c0_35] : memref<1x1x128xf32, #tpu.memory_space<vmem>>, vector<1x1x128xf32>
    tpu.vector_store %arg4[%c0_33, %c0_34, %c0_35], %164 {strides = array<i32>} : memref<1x1x128xf32, #tpu.memory_space<vmem>>, vector<1x1x128xf32>,
    return
  }
  func.func @transform_0(%arg0: i32, %arg1: i32) -> (i32, i32, i32) {
    %c0_i32 = arith.constant 0 : i32
    %c0_i32_0 = arith.constant 0 : i32
    %c0_i32_1 = arith.constant 0 : i32
    return %arg0, %c0_i32, %c0_i32_0 : i32, i32, i32
  }
  func.func @transform_1(%arg0: i32, %arg1: i32) -> (i32, i32) {
    %c0_i32 = arith.constant 0 : i32
    %c0_i32_0 = arith.constant 0 : i32
    %c0_i32_1 = arith.constant 0 : i32
    return %c0_i32, %c0_i32_0 : i32, i32
  }
  func.func @transform_2(%arg0: i32, %arg1: i32) -> (i32, i32, i32) {
    %c0_i32 = arith.constant 0 : i32
    %c0_i32_0 = arith.constant 0 : i32
    return %arg0, %c0_i32, %arg1 : i32, i32, i32
  }
}

</mosaic_0001>

<bundles_post_ra>
// kernel: tpu_custom_call.1
= control target key start
LH: loop header
LB: loop body
LE: loop exit
PB: predicated region body
PF: predicated region fallthrough
CT: control target
= control target key end

     0   :  { %7 = vsyncpa [#allocation4], 0  ;;  %s5412_s0 = inlined_call_operand.vmem [shape: f32[2,1,256], index: 0, kind: input, shape index: {}]   ;;  %s5413_s1 = inlined_call_operand.vmem [shape: f32[6,4], index: 1, kind: input, shape index: {}]   ;;  %s5414_s2 = inlined_call_operand.hbm [shape: f32[2,1,256], index: 2, kind: output, shape index: {}]  }
   0x1   :  { %8 = vsyncpa [#allocation3], 0 }
   0x2   :  { %10 = vsyncpa [#allocation3 + $0x1], 0  ;;  %s3019_s9 = smov 0   ;;  %s3021_s10 = smov 0  }
   0x3   :  { %s3023_s11 = smov 0   ;;  %s3025_s12 = smov 0  }
   0x4   :  { %s3027_s13 = smov 0   ;;  %s3029_s14 = smov 0  }
   0x5   :  { %s3031_s15 = smov 0   ;;  %s3033_s16 = smov 0  }
   0x6 LB: > { %s2389_s17 = sadd.s32 4294967295, %s3000_s16   ;;  %s2390_s18 = sadd.s32 4294967294, %s3000_s16   ;;  %s3000_s16 = sphi %s3033_s16, %s16_s16   ;;  %s2996_s15 = sphi %s3031_s15, %s5863_s15   ;;  %s2992_s14 = sphi %s3029_s14, %s5862_s14   ;;  %s2988_s13 = sphi %s3027_s13, %s5861_s13   ;;  %s2984_s12 = sphi %s3025_s12, %s5860_s12   ;;  %s2980_s11 = sphi %s3023_s11, %s5859_s11   ;;  %s2976_s10 = sphi %s3021_s10, %s5858_s10   ;;  %s2972_s9 = sphi %s3019_s9, %s5857_s9  }
   0x7   : > { %s25_s19 = sadd.s32 1, %s2992_s14  ;;  %s28_s20 = sadd.s32 1, %s2996_s15 }
   0x8   : > { %p26_p0 = scmp.ge.s32.totalorder %s25_s19, 2  ;;  %s84_s21 = sadd.s32 1, %s2980_s11 }
   0x9   : > { %p94_p1 = scmp.ne.s32.totalorder %s2980_s11, %s2976_s10  ;;  %p95_p2 = scmp.eq.s32.totalorder %s2389_s17, 3 }
   0xa   : > { %s5865_s19 = smov (%p26_p0, %s25_s19), 0  ;;  %s5867_s20 = smov (!%p26_p0, %s28_s20), %s2996_s15 }
   0xb   : > { %s80_s22 = ssub.s32 %s2992_s14, %s5865_s19  ;;  %p3071_p3 = por %p95_p2, %p94_p1 }
   0xc   : > { %p30_p4 = scmp.ge.s32.totalorder %s5867_s20, 2  ;;  %p100_p5 = scmp.ne.s32.totalorder %s2976_s10, %s2972_s9 }
   0xd   : > { %p101_p6 = scmp.eq.s32.totalorder %s2390_s18, 3  ;;  %p2391_p7 = scmp.ge.s32.totalorder %s3000_s16, 1 }
   0xe   : > { %s5869_s20 = smov (%p30_p4, %s5867_s20), 0  ;;  %p108_p9 = scmp.lt.s32.totalorder %s3000_s16, 5 }
   0xf   : > { %p3080_p8 = por %p101_p6, %p100_p5  ;;  %s79_s25 = ssub.s32 %s2996_s15, %s5869_s20 }
  0x10   : > { %s81_s26 = sor.u32 %s80_s22, %s79_s25  ;;  %p3087_p10 = pnand %p2391_p7, %p108_p9 }
  0x11   : > { %s5529_s24 = scalar_select %p3080_p8, 1, 0 }
  0x12   : > { %p82_p11 = scmp.eq.s32.totalorder %s81_s26, 0  ;;  %p3091_p12 = scmp.eq.s32.totalorder %s2389_s17, 0 }
  0x13   : > { %p2429_p13 = pneg %p3087_p10  ;;  %s121_s3 = sshll.u32 %s5413_s1, 4  ;;  %s122_s3 = int_to_ptr.vmem [resolvable:$true] %s121_s3 }
  0x14   : > { %s3101_s4 = scalar_select %p82_p11, %s2980_s11, %s84_s21  }
  0x15   : > { %p2430_p0 = pnand %p3091_p12, %p2429_p13  ;;  %s2889_s5 = scalar_lea.vmem %s122_s3, 128 }
  0x16   : > { %p2890_p1 = scmp.ne.s32.totalorder %s122_s3, %s2889_s5  ;;  %p2897_p6 = scmp.lt.s32.totalorder %s122_s3, %s122_s3 }
  0x17   : > { %p2891_p2 = pneg %p2430_p0  ;;  %p2898_p7 = scmp.lt.s32.totalorder %s2889_s5, %s2889_s5 }
  0x19   : > { %p2892_p4 = pnand %p2891_p2, %p2890_p1  ;;  %p2899_p9 = por %p2898_p7, %p2897_p6 }
  0x1b   : > { %p2893_p5 = pneg %p2892_p4 }
  0x1d   : > { %p2900_p8 = pnand %p2899_p9, %p2893_p5 }
  0x1f   : > { %2903 = shalt.err (!%p2900_p8)
}
  0x20   : > { %s3002_s6 = smov [#allocation2]   ;;  %141 = sbr.rel (%p3087_p10) target bundleno = 862 (0x35e), region = 28 }
  0x21   : > { %2432 = dma.vmem_to_smem (!%p2430_p0), %s122_s3, 128, %s3002_s6, [#allocation4]  }
  0x25   : > { %2963 = dma.done.wait (%p3091_p12), [#allocation4], 128  }
  0x26   : > { %2965 = vsyncadd (%p3091_p12), [#allocation4], 4294967168 }
  0x27   : > { %147 = sfence }
  0x28   : > { %p162_p11 = scmp.lt.s32.totalorder %s2988_s13, 1  ;;  %s2397_s7 = sshll.u32 %s2984_s12, 7  ;;  %v5415_v1 = vlaneseq  ;;  %vm2191_vm0 = vcmask 130112   ;;  %vm2198_vm1 = vcmask 195712   ;;  %vm2205_vm2 = vcmask 261312  }
  0x29   : > { %s168_s17 = sshra.s32 %s2397_s7, 7  ;;  %s239_s27 = sld [smem:[#allocation2]]  ;;  %vm2212_vm3 = vcmask 326912   ;;  %vm2219_vm4 = vcmask 392512   ;;  %vm2226_vm5 = vcmask 458112   ;;  %vm2233_vm6 = vcmask 523712  }
  0x2a   : > { %s163_s8 = scalar_select %p162_p11, %s2988_s13, 1  ;;  %v3121_v2 = vshrl.u32 %v5415_v1, 7  ;;  %vm2240_vm7 = vcmask 589312   ;;  %vm2247_vm8 = vcmask 654912   ;;  %vm2254_vm9 = vcmask 720512  }
  0x2b   : > { %s2399_s28 = sld [smem:[#allocation2 + $0x80]]  ;;  %vm2261_vm10 = vcmask 786112   ;;  %vm2268_vm11 = vcmask 851712   ;;  %vm2275_vm12 = vcmask 917312   ;;  %vm2282_vm13 = vcmask 982912  }
  0x2c   : > { %s2396_s18 = sshll.u32 %s163_s8, 1  ;;  %s2400_s29 = sld [smem:[#allocation2 + $0x100]]  ;;  %5532 = vst [vmem:[#allocation8_spill] sm:$0xff] %v3121_v2  ;;  %v281_v3 = vsub.s32 0, %v3121_v2  ;;  %v285_v4 = vsub.s32 1, %v3121_v2  ;;  %vm2289_vm14 = vcmask 1048512  }
  0x2d   : > { %s3117_s25 = scalar_lea.vmem %s5412_s0, %s2396_s18  ;;  %s2401_s30 = sld [smem:[#allocation2 + $0x180]] }
  0x2e   : > { %s170_s26 = scalar_lea.vmem %s3117_s25, %s168_s17  ;;  %s2403_s3 = sld [smem:[#allocation2 + $0x1]]  ;;  %v166_v5 = vld [vmem:[%s3117_s25] sm:$0x3] }
  0x2f   : > { %v2398_v0 = vld [vmem:[%s170_s26] ss:$0 sm:$0xff]  ;;  %s2404_s5 = sld [smem:[#allocation2 + $0x81]]  ;;  %v3126_v6 = vrot.slane %v166_v5, %v281_v3  ;;  %v3128_v7 = vrot.slane %v166_v5, %v285_v4  ;;  %v3130_v8 = vstv %s239_s27 }
  0x30   : > { %177 = vbcast.lane.b32.xlu0 %v2398_v0, 256  ;;  %185 = vbcast.lane.b32.xlu1 %v2398_v0, 272  ;;  %s2405_s6 = sld [smem:[#allocation2 + $0x101]] }
  0x31   : > { %s2406_s7 = sld [smem:[#allocation2 + $0x181]]  ;;  %v3134_v10 = vstv %s2399_s28 }
  0x32   : > { %s2408_s8 = sld [smem:[#allocation2 + $0x2]]  ;;  %v3132_v9 = vstv %s2400_s29 }
  0x33   : > { %s2409_s17 = sld [smem:[#allocation2 + $0x82]]  ;;  %v3136_v11 = vstv %s2401_s30 }
  0x34   : > { %181 = vbcast.lane.b32.xlu0 %v2398_v0, 264  ;;  %189 = vbcast.lane.b32.xlu1 %v2398_v0, 280  ;;  %s2410_s18 = sld [smem:[#allocation2 + $0x102]]  ;;  %v3138_v12 = vstv %s2403_s3 }
  0x35   : > { %s2411_s21 = sld [smem:[#allocation2 + $0x182]]  ;;  %v3142_v14 = vstv %s2404_s5 }
  0x36   : > { %s2413_s22 = sld [smem:[#allocation2 + $0x3]]  ;;  %v3140_v13 = vstv %s2405_s6  ;;  %s160_s6 = sand.u32 1, %s2976_s10  }
  0x37   : > { %v3144_v15 = vstv %s2406_s7  ;;  %s3214_s25 = sld [smem:[#allocation2 + $0x83]]  ;;  %s2419_s7 = sshll.u32 %s2988_s13, 1 }
  0x38   : > { %193 = vbcast.lane.b32.xlu0 %v2398_v0, 288  ;;  %197 = vbcast.lane.b32.xlu1 %v2398_v0, 296  ;;  %v3146_v16 = vstv %s2408_s8  ;;  %s3245_s26 = sld [smem:[#allocation2 + $0x103]]  ;;  %s2304_s8 = sadd.s32 %s2984_s12, %s2419_s7 }
  0x39   : > { %v3154_v20 = vstv %s2409_s17  ;;  %s3275_s27 = sld [smem:[#allocation2 + $0x183]]  ;;  %s2420_s13 = sshll.u32 %s2304_s8, 4 }
  0x3a   : > { %v3152_v19 = vstv %s2410_s18  ;;  %s2402_s28 = sld [smem:[#allocation2 + $0x200]]  ;;  %s161_s17 = scalar_lea.vmem [#allocation5], %s160_s6 }
  0x3b   : > { %v3156_v21 = vstv %s2411_s21  ;;  %s2407_s29 = sld [smem:[#allocation2 + $0x201]]  ;;  %s2308_s18 = sshll.u32 %s161_s17, 4  ;;  %s2309_s18 = int_to_ptr.vmem [resolvable:$true] %s2308_s18 }
  0x3c   : > { %201 = vbcast.lane.b32.xlu0 %v2398_v0, 304  ;;  %205 = vbcast.lane.b32.xlu1 %v2398_v0, 312  ;;  %v3158_v22 = vstv %s2413_s22  ;;  %s2412_s30 = sld [smem:[#allocation2 + $0x202]]  ;;  %s2294_s12 = scalar_lea.sflag [#allocation3], %s160_s6 }
  0x3d   : > { %s2417_s3 = sld [smem:[#allocation2 + $0x203]] }
  0x3e   : > { %s2418_s5 = sld [smem:[#allocation2 + $0x280]] }
  0x3f   : > { %v3339_v1 = vstv %s3275_s27  ;;  %s3003_s27 = smov [#allocation5]  }
  0x40   : > { %209 = vbcast.lane.b32.xlu0 %v2398_v0, 320  ;;  %213 = vbcast.lane.b32.xlu1 %v2398_v0, 328 }
  0x44   : > { %217 = vbcast.lane.b32.xlu0 %v2398_v0, 336  ;;  %221 = vbcast.lane.b32.xlu1 %v2398_v0, 344 }
  0x48   : > { %225 = vbcast.lane.b32.xlu0 %v2398_v0, 352  ;;  %229 = vbcast.lane.b32.xlu1 %v2398_v0, 360 }
  0x4c   : > { %233 = vbcast.lane.b32.xlu0 %v2398_v0, 368  ;;  %237 = vbcast.lane.b32.xlu1 %v2398_v0, 376 }
  0xa2   : > { %v3148_v17 = vpop.permute.xlu0 %177  ;;  %v3150_v18 = vpop.permute.xlu1 %185 }
  0xa3   : > { %v245_v23 = vmul.f32 %v3130_v8, %v3148_v17  ;;  %v322_v24 = vmul.f32 %v3134_v10, %v3148_v17  ;;  %v247_v25 = vmul.f32 %v3130_v8, %v3150_v18  ;;  %v324_v26 = vmul.f32 %v3134_v10, %v3150_v18 }
  0xa4   : > { %v730_v27 = vmul.f32 %v3138_v12, %v3148_v17  ;;  %v796_v28 = vmul.f32 %v3142_v14, %v3148_v17  ;;  %v732_v29 = vmul.f32 %v3138_v12, %v3150_v18  ;;  %v798_v30 = vmul.f32 %v3142_v14, %v3150_v18 }
  0xa5   : > { %v262_v31 = vadd.f32 %v3132_v9, %v245_v23  ;;  %v339_v32 = vadd.f32 %v3136_v11, %v322_v24  ;;  %v264_v33 = vadd.f32 %v3132_v9, %v247_v25  ;;  %v341_v34 = vadd.f32 %v3136_v11, %v324_v26 }
  0xa6   : > { %v3180_v35 = vpop.permute.xlu0 %181  ;;  %v3182_v36 = vpop.permute.xlu1 %189  ;;  %v3185_v37 = vadd.f32 %v3140_v13, %v730_v27  ;;  %v3188_v38 = vadd.f32 %v3144_v15, %v796_v28  ;;  %v3191_v39 = vadd.f32 %v3140_v13, %v732_v29  ;;  %v3194_v40 = vadd.f32 %v3144_v15, %v798_v30 }
  0xa7   : > { %v289_v41 = vmul.f32 %v3126_v6, %v262_v31  ;;  %v290_v42 = vmul.f32 %v3128_v7, %v262_v31  ;;  %v246_v43 = vmul.f32 %v3130_v8, %v3180_v35  ;;  %v323_v44 = vmul.f32 %v3134_v10, %v3180_v35 }
  0xa8   : > { %v293_v45 = vmul.f32 %v3126_v6, %v264_v33  ;;  %v294_v46 = vmul.f32 %v3128_v7, %v264_v33  ;;  %v248_v47 = vmul.f32 %v3130_v8, %v3182_v36  ;;  %v325_v48 = vmul.f32 %v3134_v10, %v3182_v36 }
  0xa9   : > { %v3208_v49 = vadd.f32 %v339_v32, %v289_v41  ;;  %v3210_v50 = vadd.f32 %v339_v32, %v290_v42  ;;  %v263_v51 = vadd.f32 %v3132_v9, %v246_v43  ;;  %v340_v52 = vadd.f32 %v3136_v11, %v323_v44 }
  0xaa   : > { %v3216_v53 = vpop.permute.xlu0 %193  ;;  %v3218_v54 = vpop.permute.xlu1 %197  ;;  %v3220_v55 = vadd.f32 %v341_v34, %v293_v45  ;;  %v3222_v56 = vadd.f32 %v341_v34, %v294_v46  ;;  %v265_v57 = vadd.f32 %v3132_v9, %v248_v47  ;;  %v342_v58 = vadd.f32 %v3136_v11, %v325_v48 }
  0xab   : > { %v387_v59 = vmax.f32 %v3208_v49, %v3210_v50  ;;  %v291_v60 = vmul.f32 %v3126_v6, %v263_v51  ;;  %v292_v61 = vmul.f32 %v3128_v7, %v263_v51  ;;  %v249_v62 = vmul.f32 %v3130_v8, %v3216_v53 }
  0xac   : > { %v393_v63 = vmax.f32 %v3220_v55, %v3222_v56  ;;  %v326_v0 = vmul.f32 %v3134_v10, %v3216_v53  ;;  %v295_v3 = vmul.f32 %v3126_v6, %v265_v57  ;;  %v296_v4 = vmul.f32 %v3128_v7, %v265_v57 }
  0xad   : > { %388 = vmax.xlane.f32.xlu0 %v387_v59  ;;  %v3238_v5 = vadd.f32 %v340_v52, %v291_v60  ;;  %v3240_v23 = vadd.f32 %v340_v52, %v292_v61  ;;  %v266_v24 = vadd.f32 %v3132_v9, %v249_v62  ;;  %v250_v25 = vmul.f32 %v3130_v8, %v3218_v54 }
  0xae   : > { %v3247_v26 = vpop.permute.xlu0 %201  ;;  %v3249_v27 = vpop.permute.xlu1 %205  ;;  %v343_v28 = vadd.f32 %v3136_v11, %v326_v0  ;;  %v3252_v29 = vadd.f32 %v342_v58, %v295_v3  ;;  %v3254_v30 = vadd.f32 %v342_v58, %v296_v4  ;;  %v327_v31 = vmul.f32 %v3134_v10, %v3218_v54 }
  0xaf   : > { %v390_v32 = vmax.f32 %v3238_v5, %v3240_v23  ;;  %v297_v33 = vmul.f32 %v3126_v6, %v266_v24  ;;  %v298_v34 = vmul.f32 %v3128_v7, %v266_v24  ;;  %v251_v41 = vmul.f32 %v3130_v8, %v3247_v26 }
  0xb0   : > { %5533 = vst [vmem:[#allocation9_spill] sm:$0xff] %v3252_v29  ;;  %5534 = vst [vmem:[#allocation10_spill] sm:$0xff] %v3254_v30  ;;  %v396_v42 = vmax.f32 %v3252_v29, %v3254_v30  ;;  %v328_v43 = vmul.f32 %v3134_v10, %v3247_v26  ;;  %v267_v44 = vadd.f32 %v3132_v9, %v250_v25  ;;  %v3278_v51 = vstv %s3214_s25  ;;  %s5366_s25 = scalar_lea.hbm %s5414_s2, %s2420_s13 }
  0xb1   : > { %v344_v45 = vadd.f32 %v3136_v11, %v327_v31  ;;  %391 = vmax.xlane.f32.xlu1 %v390_v32  ;;  %394 = vmax.xlane.f32.xlu0 %v393_v63  ;;  %v3270_v46 = vadd.f32 %v343_v28, %v297_v33  ;;  %v3272_v47 = vadd.f32 %v343_v28, %v298_v34  ;;  %v3308_v34 = vstv %s3245_s26  ;;  %s2904_s26 = scalar_lea.vmem %s2309_s18, 16 }
  0xb2   : > { %v268_v48 = vadd.f32 %v3132_v9, %v251_v41  ;;  %v3280_v52 = vpop.permute.xlu0 %209  ;;  %v3282_v57 = vpop.permute.xlu1 %213  ;;  %v345_v58 = vadd.f32 %v3136_v11, %v328_v43  ;;  %v299_v59 = vmul.f32 %v3126_v6, %v267_v44  ;;  %v300_v60 = vmul.f32 %v3128_v7, %v267_v44  ;;  %p2905_p8 = scmp.ne.s32.totalorder %s2309_s18, %s2904_s26 }
  0xb3   : > { %v252_v61 = vmul.f32 %v3130_v8, %v3249_v27  ;;  %v399_v62 = vmax.f32 %v3270_v46, %v3272_v47  ;;  %v253_v3 = vmul.f32 %v3130_v8, %v3280_v52  ;;  %v330_v25 = vmul.f32 %v3134_v10, %v3280_v52 }
  0xb4   : > { %v301_v63 = vmul.f32 %v3126_v6, %v268_v48  ;;  %v302_v0 = vmul.f32 %v3128_v7, %v268_v48  ;;  %v3295_v4 = vadd.f32 %v344_v45, %v299_v59  ;;  %v3297_v24 = vadd.f32 %v344_v45, %v300_v60  ;;  %p2906_p10 = pnand %p2905_p8, %p3071_p3 }
  0xb5   : > { %v269_v28 = vadd.f32 %v3132_v9, %v252_v61  ;;  %400 = vmax.xlane.f32.xlu1 %v399_v62  ;;  %397 = vmax.xlane.f32.xlu0 %v396_v42  ;;  %v270_v33 = vadd.f32 %v3132_v9, %v253_v3  ;;  %v347_v44 = vadd.f32 %v3136_v11, %v330_v25 }
  0xb6   : > { %5535 = vst [vmem:[#allocation11_spill] sm:$0xff] %v3295_v4  ;;  %5536 = vst [vmem:[#allocation12_spill] sm:$0xff] %v3297_v24  ;;  %v3302_v31 = vadd.f32 %v345_v58, %v301_v63  ;;  %v3304_v32 = vadd.f32 %v345_v58, %v302_v0  ;;  %v3310_v41 = vpop.permute.xlu0 %217  ;;  %v402_v43 = vmax.f32 %v3295_v4, %v3297_v24  ;;  %v3317_v48 = vpop.permute.xlu1 %221  ;;  %p2907_p12 = pneg %p2906_p10 }
  0xb7   : > { %v303_v45 = vmul.f32 %v3126_v6, %v269_v28  ;;  %v304_v42 = vmul.f32 %v3128_v7, %v269_v28  ;;  %v305_v59 = vmul.f32 %v3126_v6, %v270_v33  ;;  %v306_v60 = vmul.f32 %v3128_v7, %v270_v33 }
  0xb8   : > { %5537 = vst [vmem:[#allocation13_spill] sm:$0xff] %v3302_v31  ;;  %5538 = vst [vmem:[#allocation14_spill] sm:$0xff] %v3304_v32  ;;  %v405_v58 = vmax.f32 %v3302_v31, %v3304_v32  ;;  %v329_v61 = vmul.f32 %v3134_v10, %v3249_v27  ;;  %v255_v62 = vmul.f32 %v3130_v8, %v3310_v41 }
  0xb9   : > { %v332_v63 = vmul.f32 %v3134_v10, %v3310_v41  ;;  %v254_v0 = vmul.f32 %v3130_v8, %v3282_v57  ;;  %v331_v3 = vmul.f32 %v3134_v10, %v3282_v57  ;;  %403 = vmax.xlane.f32.xlu0 %v402_v43  ;;  %v3333_v25 = vadd.f32 %v347_v44, %v305_v59 }
  0xba   : > { %406 = vmax.xlane.f32.xlu1 %v405_v58  ;;  %v3335_v28 = vadd.f32 %v347_v44, %v306_v60  ;;  %v346_v33 = vadd.f32 %v3136_v11, %v329_v61  ;;  %v3341_v2 = vpop.permute.xlu0 %225  ;;  %v272_v24 = vadd.f32 %v3132_v9, %v255_v62 }
  0xbb   : > { %5539 = vst [vmem:[#allocation15_spill] sm:$0xff] %v3333_v25  ;;  %v349_v4 = vadd.f32 %v3136_v11, %v332_v63  ;;  %v271_v32 = vadd.f32 %v3132_v9, %v254_v0  ;;  %v348_v31 = vadd.f32 %v3136_v11, %v331_v3  ;;  %v257_v59 = vmul.f32 %v3130_v8, %v3341_v2  ;;  %v3359_v0 = vpop.permute.xlu1 %229 }
  0xbc   : > { %5540 = vst [vmem:[#allocation16_spill] sm:$0xff] %v3335_v28  ;;  %v411_v43 = vmax.f32 %v3333_v25, %v3335_v28  ;;  %v3349_v58 = vadd.f32 %v346_v33, %v303_v45  ;;  %v3351_v44 = vadd.f32 %v346_v33, %v304_v42  ;;  %v309_v60 = vmul.f32 %v3126_v6, %v272_v24 }
  0xbd   : > { %v310_v61 = vmul.f32 %v3128_v7, %v272_v24  ;;  %v307_v62 = vmul.f32 %v3126_v6, %v271_v32  ;;  %v308_v63 = vmul.f32 %v3128_v7, %v271_v32  ;;  %v274_v42 = vadd.f32 %v3132_v9, %v257_v59 }
  0xbe   : > { %5541 = vst [vmem:[#allocation17_spill] sm:$0xff] %v3349_v58  ;;  %5542 = vst [vmem:[#allocation18_spill] sm:$0xff] %v3351_v44  ;;  %412 = vmax.xlane.f32.xlu1 %v411_v43  ;;  %v408_v45 = vmax.f32 %v3349_v58, %v3351_v44  ;;  %v334_v3 = vmul.f32 %v3134_v10, %v3341_v2  ;;  %v256_v33 = vmul.f32 %v3130_v8, %v3317_v48  ;;  %v3368_v28 = vpop.permute.xlu0 %233 }
  0xbf   : > { %v3370_v24 = vadd.f32 %v349_v4, %v309_v60  ;;  %v3372_v25 = vadd.f32 %v349_v4, %v310_v61  ;;  %v3374_v32 = vadd.f32 %v348_v31, %v307_v62  ;;  %v3376_v43 = vadd.f32 %v348_v31, %v308_v63 }
  0xc0   : > { %409 = vmax.xlane.f32.xlu0 %v408_v45  ;;  %v313_v44 = vmul.f32 %v3126_v6, %v274_v42  ;;  %v314_v59 = vmul.f32 %v3128_v7, %v274_v42  ;;  %v351_v58 = vadd.f32 %v3136_v11, %v334_v3  ;;  %v273_v30 = vadd.f32 %v3132_v9, %v256_v33 }
  0xc1   : > { %5543 = vst [vmem:[#allocation19_spill] sm:$0xff] %v3370_v24  ;;  %5544 = vst [vmem:[#allocation20_spill] sm:$0xff] %v3372_v25  ;;  %v417_v29 = vmax.f32 %v3370_v24, %v3372_v25  ;;  %v414_v4 = vmax.f32 %v3374_v32, %v3376_v43  ;;  %v333_v60 = vmul.f32 %v3134_v10, %v3317_v48 }
  0xc2   : > { %5545 = vst [vmem:[#allocation21_spill] sm:$0xff] %v3374_v32  ;;  %5546 = vst [vmem:[#allocation22_spill] sm:$0xff] %v3376_v43  ;;  %v259_v31 = vmul.f32 %v3130_v8, %v3368_v28  ;;  %v3390_v61 = vadd.f32 %v351_v58, %v313_v44  ;;  %v3392_v62 = vadd.f32 %v351_v58, %v314_v59  ;;  %v3402_v32 = vpop.permute.xlu1 %237 }
  0xc3   : > { %v311_v63 = vmul.f32 %v3126_v6, %v273_v30  ;;  %v312_v45 = vmul.f32 %v3128_v7, %v273_v30  ;;  %418 = vmax.xlane.f32.xlu1 %v417_v29  ;;  %v350_v42 = vadd.f32 %v3136_v11, %v333_v60  ;;  %v336_v33 = vmul.f32 %v3134_v10, %v3368_v28 }
  0xc4   : > { %5547 = vst [vmem:[#allocation23_spill] sm:$0xff] %v3390_v61  ;;  %5548 = vst [vmem:[#allocation24_spill] sm:$0xff] %v3392_v62  ;;  %v276_v3 = vadd.f32 %v3132_v9, %v259_v31  ;;  %v258_v43 = vmul.f32 %v3130_v8, %v3359_v0  ;;  %415 = vmax.xlane.f32.xlu0 %v414_v4  ;;  %v423_v58 = vmax.f32 %v3390_v61, %v3392_v62 }
  0xc5   : > { %v335_v30 = vmul.f32 %v3134_v10, %v3359_v0  ;;  %v763_v29 = vmul.f32 %v3185_v37, %v3126_v6  ;;  %v764_v44 = vmul.f32 %v3185_v37, %v3128_v7  ;;  %v3412_v59 = vadd.f32 %v350_v42, %v311_v63 }
  0xc6   : > { %v3414_v60 = vadd.f32 %v350_v42, %v312_v45  ;;  %v317_v31 = vmul.f32 %v3126_v6, %v276_v3  ;;  %v318_v4 = vmul.f32 %v3128_v7, %v276_v3  ;;  %v353_v25 = vadd.f32 %v3136_v11, %v336_v33 }
  0xc7   : > { %v275_v62 = vadd.f32 %v3132_v9, %v258_v43  ;;  %v352_v61 = vadd.f32 %v3136_v11, %v335_v30  ;;  %v3422_v24 = vadd.f32 %v3188_v38, %v763_v29  ;;  %424 = vmax.xlane.f32.xlu1 %v423_v58  ;;  %v3427_v63 = vadd.f32 %v3188_v38, %v764_v44 }
  0xc8   : > { %v420_v37 = vmax.f32 %v3412_v59, %v3414_v60  ;;  %v260_v45 = vmul.f32 %v3130_v8, %v3402_v32  ;;  %v337_v42 = vmul.f32 %v3134_v10, %v3402_v32  ;;  %v3433_v3 = vadd.f32 %v353_v25, %v317_v31 }
  0xc9   : > { %5549 = vst [vmem:[#allocation25_spill] sm:$0xff] %v3427_v63  ;;  %v3435_v43 = vadd.f32 %v353_v25, %v318_v4  ;;  %v315_v33 = vmul.f32 %v3126_v6, %v275_v62  ;;  %v316_v58 = vmul.f32 %v3128_v7, %v275_v62  ;;  %v861_v30 = vmax.f32 %v3422_v24, %v3427_v63 }
  0xca   : > { %421 = vmax.xlane.f32.xlu0 %v420_v37  ;;  %v277_v38 = vadd.f32 %v3132_v9, %v260_v45  ;;  %v354_v29 = vadd.f32 %v3136_v11, %v337_v42  ;;  %v767_v8 = vmul.f32 %v3191_v39, %v3126_v6  ;;  %v768_v62 = vmul.f32 %v3191_v39, %v3128_v7 }
  0xcb   : > { %v429_v10 = vmax.f32 %v3433_v3, %v3435_v43  ;;  %v3447_v25 = vadd.f32 %v352_v61, %v315_v33  ;;  %v3449_v44 = vadd.f32 %v352_v61, %v316_v58  ;;  %v731_v11 = vmul.f32 %v3138_v12, %v3180_v35 }
  0xcc   : > { %v319_v31 = vmul.f32 %v3126_v6, %v277_v38  ;;  %v320_v4 = vmul.f32 %v3128_v7, %v277_v38  ;;  %v3456_v9 = vadd.f32 %v3194_v40, %v767_v8  ;;  %v3463_v61 = vadd.f32 %v3194_v40, %v768_v62 }
  0xcd   : > { %430 = vmax.xlane.f32.xlu1 %v429_v10  ;;  %v426_v37 = vmax.f32 %v3447_v25, %v3449_v44  ;;  %v797_v39 = vmul.f32 %v3142_v14, %v3180_v35  ;;  %v734_v45 = vmul.f32 %v3138_v12, %v3216_v53  ;;  %v748_v58 = vadd.f32 %v3140_v13, %v731_v11 }
  0xce   : > { %5550 = vst [vmem:[#allocation26_spill] sm:$0xff] %v3456_v9  ;;  %5551 = vst [vmem:[#allocation27_spill] sm:$0xff] %v3463_v61  ;;  %v3469_v42 = vadd.f32 %v354_v29, %v319_v31  ;;  %v3471_v33 = vadd.f32 %v354_v29, %v320_v4  ;;  %v800_v38 = vmul.f32 %v3142_v14, %v3216_v53 }
  0xcf   : > { %427 = vmax.xlane.f32.xlu0 %v426_v37  ;;  %v867_v40 = vmax.f32 %v3456_v9, %v3463_v61  ;;  %v814_v8 = vadd.f32 %v3144_v15, %v797_v39  ;;  %v751_v10 = vadd.f32 %v3140_v13, %v734_v45  ;;  %v733_v62 = vmul.f32 %v3138_v12, %v3182_v36 }
  0xd0   : > { %5552 = vst [vmem:[#allocation28_spill] sm:$0xff] %v3469_v42  ;;  %5553 = vst [vmem:[#allocation29_spill] sm:$0xff] %v3471_v33  ;;  %v432_v29 = vmax.f32 %v3469_v42, %v3471_v33  ;;  %v765_v31 = vmul.f32 %v748_v58, %v3126_v6  ;;  %v766_v4 = vmul.f32 %v748_v58, %v3128_v7 }
  0xd1   : > { %v817_v11 = vadd.f32 %v3144_v15, %v800_v38  ;;  %862 = vmax.xlane.f32.xlu1 %v861_v30  ;;  %v771_v37 = vmul.f32 %v751_v10, %v3126_v6  ;;  %v772_v61 = vmul.f32 %v751_v10, %v3128_v7  ;;  %v750_v39 = vadd.f32 %v3140_v13, %v733_v62 }
  0xd2   : > { %v799_v45 = vmul.f32 %v3142_v14, %v3182_v36  ;;  %v3492_v9 = vadd.f32 %v814_v8, %v765_v31  ;;  %v3494_v63 = vadd.f32 %v814_v8, %v766_v4  ;;  %v736_v33 = vmul.f32 %v3138_v12, %v3247_v26 }
  0xd3   : > { %v802_v58 = vmul.f32 %v3142_v14, %v3247_v26  ;;  %433 = vmax.xlane.f32.xlu0 %v432_v29  ;;  %v3500_v30 = vadd.f32 %v817_v11, %v771_v37  ;;  %v3502_v38 = vadd.f32 %v817_v11, %v772_v61  ;;  %v769_v10 = vmul.f32 %v750_v39, %v3126_v6 }
  0xd4   : > { %5554 = vst [vmem:[#allocation30_spill] sm:$0xff] %v3492_v9  ;;  %5555 = vst [vmem:[#allocation31_spill] sm:$0xff] %v3494_v63  ;;  %v770_v62 = vmul.f32 %v750_v39, %v3128_v7  ;;  %v864_v31 = vmax.f32 %v3492_v9, %v3494_v63  ;;  %v816_v8 = vadd.f32 %v3144_v15, %v799_v45 }
  0xd5   : > { %5556 = vst [vmem:[#allocation32_spill] sm:$0xff] %v3500_v30  ;;  %5557 = vst [vmem:[#allocation33_spill] sm:$0xff] %v3502_v38  ;;  %v753_v4 = vadd.f32 %v3140_v13, %v736_v33  ;;  %v819_v42 = vadd.f32 %v3144_v15, %v802_v58  ;;  %868 = vmax.xlane.f32.xlu1 %v867_v40  ;;  %v873_v29 = vmax.f32 %v3500_v30, %v3502_v38 }
  0xd6   : > { %v735_v61 = vmul.f32 %v3138_v12, %v3218_v54  ;;  %v801_v11 = vmul.f32 %v3142_v14, %v3218_v54  ;;  %v738_v37 = vmul.f32 %v3138_v12, %v3280_v52  ;;  %v3519_v39 = vadd.f32 %v816_v8, %v769_v10 }
  0xd7   : > { %v3521_v45 = vadd.f32 %v816_v8, %v770_v62  ;;  %v775_v33 = vmul.f32 %v753_v4, %v3126_v6  ;;  %v776_v40 = vmul.f32 %v753_v4, %v3128_v7  ;;  %865 = vmax.xlane.f32.xlu0 %v864_v31  ;;  %v804_v63 = vmul.f32 %v3142_v14, %v3280_v52 }
  0xd8   : > { %5558 = vst [vmem:[#allocation34_spill] sm:$0xff] %v3519_v39  ;;  %v752_v58 = vadd.f32 %v3140_v13, %v735_v61  ;;  %v818_v38 = vadd.f32 %v3144_v15, %v801_v11  ;;  %v755_v30 = vadd.f32 %v3140_v13, %v738_v37  ;;  %v737_v8 = vmul.f32 %v3138_v12, %v3249_v27 }
  0xd9   : > { %5559 = vst [vmem:[#allocation35_spill] sm:$0xff] %v3521_v45  ;;  %v870_v10 = vmax.f32 %v3519_v39, %v3521_v45  ;;  %v3532_v9 = vadd.f32 %v819_v42, %v775_v33  ;;  %v3534_v62 = vadd.f32 %v819_v42, %v776_v40  ;;  %874 = vmax.xlane.f32.xlu1 %v873_v29 }
  0xda   : > { %v773_v31 = vmul.f32 %v752_v58, %v3126_v6  ;;  %v774_v4 = vmul.f32 %v752_v58, %v3128_v7  ;;  %v779_v61 = vmul.f32 %v755_v30, %v3126_v6  ;;  %v780_v11 = vmul.f32 %v755_v30, %v3128_v7 }
  0xdb   : > { %5560 = vst [vmem:[#allocation36_spill] sm:$0xff] %v3534_v62  ;;  %v879_v37 = vmax.f32 %v3532_v9, %v3534_v62  ;;  %v821_v33 = vadd.f32 %v3144_v15, %v804_v63  ;;  %v754_v42 = vadd.f32 %v3140_v13, %v737_v8  ;;  %v803_v40 = vmul.f32 %v3142_v14, %v3249_v27 }
  0xdc   : > { %871 = vmax.xlane.f32.xlu0 %v870_v10  ;;  %v3548_v29 = vadd.f32 %v818_v38, %v773_v31  ;;  %v3550_v45 = vadd.f32 %v818_v38, %v774_v4  ;;  %v740_v58 = vmul.f32 %v3138_v12, %v3310_v41  ;;  %v806_v30 = vmul.f32 %v3142_v14, %v3310_v41 }
  0xdd   : > { %v3556_v39 = vadd.f32 %v821_v33, %v779_v61  ;;  %v3558_v62 = vadd.f32 %v821_v33, %v780_v11  ;;  %v777_v63 = vmul.f32 %v754_v42, %v3126_v6  ;;  %v778_v8 = vmul.f32 %v754_v42, %v3128_v7  ;;  %880 = vmax.xlane.f32.xlu1 %v879_v37 }
  0xde   : > { %5561 = vst [vmem:[#allocation37_spill] sm:$0xff] %v3548_v29  ;;  %5562 = vst [vmem:[#allocation38_spill] sm:$0xff] %v3550_v45  ;;  %v876_v10 = vmax.f32 %v3548_v29, %v3550_v45  ;;  %v820_v38 = vadd.f32 %v3144_v15, %v803_v40  ;;  %v757_v31 = vadd.f32 %v3140_v13, %v740_v58 }
  0xdf   : > { %5563 = vst [vmem:[#allocation39_spill] sm:$0xff] %v3556_v39  ;;  %5564 = vst [vmem:[#allocation40_spill] sm:$0xff] %v3558_v62  ;;  %v823_v4 = vadd.f32 %v3144_v15, %v806_v30  ;;  %v885_v61 = vmax.f32 %v3556_v39, %v3558_v62  ;;  %v739_v11 = vmul.f32 %v3138_v12, %v3282_v57 }
  0xe0   : > { %v805_v33 = vmul.f32 %v3142_v14, %v3282_v57  ;;  %v742_v37 = vmul.f32 %v3138_v12, %v3341_v2  ;;  %877 = vmax.xlane.f32.xlu0 %v876_v10  ;;  %v3575_v42 = vadd.f32 %v820_v38, %v777_v63  ;;  %v3577_v40 = vadd.f32 %v820_v38, %v778_v8 }
  0xe1   : > { %v783_v58 = vmul.f32 %v757_v31, %v3126_v6  ;;  %v784_v30 = vmul.f32 %v757_v31, %v3128_v7  ;;  %v756_v62 = vadd.f32 %v3140_v13, %v739_v11  ;;  %v808_v29 = vmul.f32 %v3142_v14, %v3341_v2  ;;  %886 = vmax.xlane.f32.xlu1 %v885_v61 }
  0xe2   : > { %5565 = vst [vmem:[#allocation41_spill] sm:$0xff] %v3575_v42  ;;  %5566 = vst [vmem:[#allocation42_spill] sm:$0xff] %v3577_v40  ;;  %v822_v39 = vadd.f32 %v3144_v15, %v805_v33  ;;  %v759_v45 = vadd.f32 %v3140_v13, %v742_v37  ;;  %v882_v63 = vmax.f32 %v3575_v42, %v3577_v40 }
  0xe3   : > { %v3588_v10 = vadd.f32 %v823_v4, %v783_v58  ;;  %v3590_v8 = vadd.f32 %v823_v4, %v784_v30  ;;  %v741_v38 = vmul.f32 %v3138_v12, %v3317_v48  ;;  %v781_v31 = vmul.f32 %v756_v62, %v3126_v6 }
  0xe4   : > { %v782_v11 = vmul.f32 %v756_v62, %v3128_v7  ;;  %v787_v33 = vmul.f32 %v759_v45, %v3126_v6  ;;  %v788_v37 = vmul.f32 %v759_v45, %v3128_v7  ;;  %883 = vmax.xlane.f32.xlu0 %v882_v63  ;;  %v825_v58 = vadd.f32 %v3144_v15, %v808_v29 }
  0xe5   : > { %5567 = vst [vmem:[#allocation43_spill] sm:$0xff] %v3588_v10  ;;  %5568 = vst [vmem:[#allocation44_spill] sm:$0xff] %v3590_v8  ;;  %v891_v61 = vmax.f32 %v3588_v10, %v3590_v8  ;;  %v758_v4 = vadd.f32 %v3140_v13, %v741_v38  ;;  %v807_v30 = vmul.f32 %v3142_v14, %v3317_v48 }
  0xe6   : > { %v3604_v40 = vadd.f32 %v822_v39, %v781_v31  ;;  %v3606_v42 = vadd.f32 %v822_v39, %v782_v11  ;;  %v744_v62 = vmul.f32 %v3138_v12, %v3368_v28  ;;  %v810_v45 = vmul.f32 %v3142_v14, %v3368_v28 }
  0xe7   : > { %892 = vmax.xlane.f32.xlu1 %v891_v61  ;;  %v3612_v63 = vadd.f32 %v825_v58, %v787_v33  ;;  %v3614_v8 = vadd.f32 %v825_v58, %v788_v37  ;;  %v785_v29 = vmul.f32 %v758_v4, %v3126_v6  ;;  %v786_v38 = vmul.f32 %v758_v4, %v3128_v7 }
  0xe8   : > { %5569 = vst [vmem:[#allocation45_spill] sm:$0xff] %v3604_v40  ;;  %5570 = vst [vmem:[#allocation46_spill] sm:$0xff] %v3606_v42  ;;  %v888_v31 = vmax.f32 %v3604_v40, %v3606_v42  ;;  %v824_v39 = vadd.f32 %v3144_v15, %v807_v30  ;;  %v761_v11 = vadd.f32 %v3140_v13, %v744_v62 }
  0xe9   : > { %5571 = vst [vmem:[#allocation47_spill] sm:$0xff] %v3612_v63  ;;  %5572 = vst [vmem:[#allocation48_spill] sm:$0xff] %v3614_v8  ;;  %v827_v10 = vadd.f32 %v3144_v15, %v810_v45  ;;  %v897_v61 = vmax.f32 %v3612_v63, %v3614_v8  ;;  %v743_v33 = vmul.f32 %v3138_v12, %v3359_v0 }
  0xea   : > { %v809_v37 = vmul.f32 %v3142_v14, %v3359_v0  ;;  %v1204_v58 = vmul.f32 %v3146_v16, %v3148_v17  ;;  %889 = vmax.xlane.f32.xlu0 %v888_v31  ;;  %v3631_v4 = vadd.f32 %v824_v39, %v785_v29  ;;  %v3633_v30 = vadd.f32 %v824_v39, %v786_v38 }
  0xeb   : > { %v791_v62 = vmul.f32 %v761_v11, %v3126_v6  ;;  %v792_v45 = vmul.f32 %v761_v11, %v3128_v7  ;;  %898 = vmax.xlane.f32.xlu1 %v897_v61  ;;  %v760_v8 = vadd.f32 %v3140_v13, %v743_v33  ;;  %v1270_v40 = vmul.f32 %v3154_v20, %v3148_v17 }
  0xec   : > { %5573 = vst [vmem:[#allocation49_spill] sm:$0xff] %v3633_v30  ;;  %v826_v63 = vadd.f32 %v3144_v15, %v809_v37  ;;  %v1221_v42 = vadd.f32 %v3152_v19, %v1204_v58  ;;  %v894_v29 = vmax.f32 %v3631_v4, %v3633_v30  ;;  %v745_v39 = vmul.f32 %v3138_v12, %v3402_v32 }
  0xed   : > { %v3644_v31 = vadd.f32 %v827_v10, %v791_v62  ;;  %v3646_v38 = vadd.f32 %v827_v10, %v792_v45  ;;  %v789_v11 = vmul.f32 %v760_v8, %v3126_v6  ;;  %v790_v61 = vmul.f32 %v760_v8, %v3128_v7 }
  0xee   : > { %v1237_v33 = vmul.f32 %v1221_v42, %v3126_v6  ;;  %v1238_v37 = vmul.f32 %v1221_v42, %v3128_v7  ;;  %895 = vmax.xlane.f32.xlu0 %v894_v29  ;;  %v1287_v62 = vadd.f32 %v3156_v21, %v1270_v40  ;;  %v762_v10 = vadd.f32 %v3140_v13, %v745_v39 }
  0xef   : > { %5574 = vst [vmem:[#allocation50_spill] sm:$0xff] %v3646_v38  ;;  %v903_v58 = vmax.f32 %v3644_v31, %v3646_v38  ;;  %v811_v45 = vmul.f32 %v3142_v14, %v3402_v32  ;;  %v3660_v12 = vadd.f32 %v826_v63, %v789_v11  ;;  %v3662_v30 = vadd.f32 %v826_v63, %v790_v61 }
  0xf0   : > { %v1206_v8 = vmul.f32 %v3146_v16, %v3150_v18  ;;  %v1272_v42 = vmul.f32 %v3154_v20, %v3150_v18  ;;  %v3668_v29 = vadd.f32 %v1287_v62, %v1237_v33  ;;  %v3670_v38 = vadd.f32 %v1287_v62, %v1238_v37 }
  0xf1   : > { %904 = vmax.xlane.f32.xlu1 %v903_v58  ;;  %v793_v13 = vmul.f32 %v762_v10, %v3126_v6  ;;  %v794_v40 = vmul.f32 %v762_v10, %v3128_v7  ;;  %v900_v14 = vmax.f32 %v3660_v12, %v3662_v30  ;;  %v828_v63 = vadd.f32 %v3144_v15, %v811_v45 }
  0xf2   : > { %5575 = vst [vmem:[#allocation51_spill] sm:$0xff] %v3668_v29  ;;  %5576 = vst [vmem:[#allocation52_spill] sm:$0xff] %v3670_v38  ;;  %v1223_v39 = vadd.f32 %v3152_v19, %v1206_v8  ;;  %v1289_v11 = vadd.f32 %v3156_v21, %v1272_v42  ;;  %v1335_v61 = vmax.f32 %v3668_v29, %v3670_v38 }
  0xf3   : > { %v1205_v33 = vmul.f32 %v3146_v16, %v3180_v35  ;;  %v1271_v37 = vmul.f32 %v3154_v20, %v3180_v35  ;;  %v1678_v58 = vmul.f32 %v3158_v22, %v3148_v17  ;;  %901 = vmax.xlane.f32.xlu0 %v900_v14  ;;  %v3687_v62 = vadd.f32 %v828_v63, %v793_v13 }
  0xf4   : > { %v3689_v15 = vadd.f32 %v828_v63, %v794_v40  ;;  %v1241_v10 = vmul.f32 %v1223_v39, %v3126_v6  ;;  %v1242_v45 = vmul.f32 %v1223_v39, %v3128_v7  ;;  %v1744_v29 = vmul.f32 %v3278_v51, %v3148_v17 }
  0xf5   : > { %1336 = vmax.xlane.f32.xlu1 %v1335_v61  ;;  %v1222_v8 = vadd.f32 %v3152_v19, %v1205_v33  ;;  %v1288_v42 = vadd.f32 %v3156_v21, %v1271_v37  ;;  %v1695_v38 = vadd.f32 %v3308_v34, %v1678_v58  ;;  %v1207_v63 = vmul.f32 %v3146_v16, %v3182_v36 }
  0xf6   : > { %5577 = vst [vmem:[#allocation53_spill] sm:$0xff] %v3689_v15  ;;  %v906_v13 = vmax.f32 %v3687_v62, %v3689_v15  ;;  %v3700_v14 = vadd.f32 %v1289_v11, %v1241_v10  ;;  %v3702_v40 = vadd.f32 %v1289_v11, %v1242_v45  ;;  %v1761_v58 = vadd.f32 %v3339_v1, %v1744_v29 }
  0xf7   : > { %v1239_v39 = vmul.f32 %v1222_v8, %v3126_v6  ;;  %v1240_v61 = vmul.f32 %v1222_v8, %v3128_v7  ;;  %v1711_v33 = vmul.f32 %v1695_v38, %v3126_v6  ;;  %v1712_v37 = vmul.f32 %v1695_v38, %v3128_v7 }
  0xf8   : > { %5578 = vst [vmem:[#allocation54_spill] sm:$0xff] %v3700_v14  ;;  %5579 = vst [vmem:[#allocation55_spill] sm:$0xff] %v3702_v40  ;;  %907 = vmax.xlane.f32.xlu0 %v906_v13  ;;  %v1341_v17 = vmax.f32 %v3700_v14, %v3702_v40  ;;  %v1224_v11 = vadd.f32 %v3152_v19, %v1207_v63  ;;  %v1273_v10 = vmul.f32 %v3154_v20, %v3182_v36 }
  0xf9   : > { %v3716_v45 = vadd.f32 %v1288_v42, %v1239_v39  ;;  %v3718_v15 = vadd.f32 %v1288_v42, %v1240_v61  ;;  %v1208_v8 = vmul.f32 %v3146_v16, %v3216_v53  ;;  %v1274_v38 = vmul.f32 %v3154_v20, %v3216_v53 }
  0xfa   : > { %1342 = vmax.xlane.f32.xlu1 %v1341_v17  ;;  %v3724_v13 = vadd.f32 %v1761_v58, %v1711_v33  ;;  %v3726_v40 = vadd.f32 %v1761_v58, %v1712_v37  ;;  %v1243_v29 = vmul.f32 %v1224_v11, %v3126_v6  ;;  %v1244_v63 = vmul.f32 %v1224_v11, %v3128_v7 }
  0xfb   : > { %5580 = vst [vmem:[#allocation56_spill] sm:$0xff] %v3716_v45  ;;  %5581 = vst [vmem:[#allocation57_spill] sm:$0xff] %v3718_v15  ;;  %v1338_v39 = vmax.f32 %v3716_v45, %v3718_v15  ;;  %v1290_v42 = vadd.f32 %v3156_v21, %v1273_v10  ;;  %v1225_v61 = vadd.f32 %v3152_v19, %v1208_v8 }
  0xfc   : > { %5582 = vst [vmem:[#allocation58_spill] sm:$0xff] %v3726_v40  ;;  %v1291_v14 = vadd.f32 %v3156_v21, %v1274_v38  ;;  %v1809_v17 = vmax.f32 %v3724_v13, %v3726_v40  ;;  %v1679_v33 = vmul.f32 %v3158_v22, %v3180_v35  ;;  %v1745_v37 = vmul.f32 %v3278_v51, %v3180_v35 }
  0xfd   : > { %v1209_v58 = vmul.f32 %v3146_v16, %v3218_v54  ;;  %1339 = vmax.xlane.f32.xlu0 %v1338_v39  ;;  %v3743_v11 = vadd.f32 %v1290_v42, %v1243_v29  ;;  %v3745_v10 = vadd.f32 %v1290_v42, %v1244_v63  ;;  %v1245_v8 = vmul.f32 %v1225_v61, %v3126_v6 }
  0xfe   : > { %v1246_v38 = vmul.f32 %v1225_v61, %v3128_v7  ;;  %1810 = vmax.xlane.f32.xlu1 %v1809_v17  ;;  %v1696_v15 = vadd.f32 %v3308_v34, %v1679_v33  ;;  %v1762_v45 = vadd.f32 %v3339_v1, %v1745_v37  ;;  %v1275_v35 = vmul.f32 %v3154_v20, %v3218_v54 }
  0xff   : > { %5583 = vst [vmem:[#allocation59_spill] sm:$0xff] %v3743_v11  ;;  %5584 = vst [vmem:[#allocation60_spill] sm:$0xff] %v3745_v10  ;;  %v1226_v40 = vadd.f32 %v3152_v19, %v1209_v58  ;;  %v1344_v29 = vmax.f32 %v3743_v11, %v3745_v10  ;;  %v3756_v39 = vadd.f32 %v1291_v14, %v1245_v8 }
 0x100   : > { %v3758_v63 = vadd.f32 %v1291_v14, %v1246_v38  ;;  %v1680_v42 = vmul.f32 %v3158_v22, %v3150_v18  ;;  %v1713_v61 = vmul.f32 %v1696_v15, %v3126_v6  ;;  %v1714_v17 = vmul.f32 %v1696_v15, %v3128_v7 }
 0x101   : > { %v1247_v33 = vmul.f32 %v1226_v40, %v3126_v6  ;;  %v1248_v37 = vmul.f32 %v1226_v40, %v3128_v7  ;;  %1345 = vmax.xlane.f32.xlu0 %v1344_v29  ;;  %v1292_v8 = vadd.f32 %v3156_v21, %v1275_v35  ;;  %v1746_v38 = vmul.f32 %v3278_v51, %v3150_v18 }
 0x102   : > { %5585 = vst [vmem:[#allocation61_spill] sm:$0xff] %v3758_v63  ;;  %v1347_v58 = vmax.f32 %v3756_v39, %v3758_v63  ;;  %v1697_v14 = vadd.f32 %v3308_v34, %v1680_v42  ;;  %v3772_v10 = vadd.f32 %v1762_v45, %v1713_v61  ;;  %v3774_v11 = vadd.f32 %v1762_v45, %v1714_v17 }
 0x103   : > { %v1210_v15 = vmul.f32 %v3146_v16, %v3247_v26  ;;  %v1276_v40 = vmul.f32 %v3154_v20, %v3247_v26  ;;  %v3780_v29 = vadd.f32 %v1292_v8, %v1247_v33  ;;  %v3782_v63 = vadd.f32 %v1292_v8, %v1248_v37 }
 0x104   : > { %5586 = vst [vmem:[#allocation62_spill] sm:$0xff] %v3774_v11  ;;  %1348 = vmax.xlane.f32.xlu1 %v1347_v58  ;;  %v1715_v35 = vmul.f32 %v1697_v14, %v3126_v6  ;;  %v1716_v42 = vmul.f32 %v1697_v14, %v3128_v7  ;;  %v1812_v18 = vmax.f32 %v3772_v10, %v3774_v11 }
 0x105   : > { %5587 = vst [vmem:[#allocation63_spill] sm:$0xff] %v3780_v29  ;;  %5588 = vst [vmem:[#allocation64_spill] sm:$0xff] %v3782_v63  ;;  %v1763_v45 = vadd.f32 %v3339_v1, %v1746_v38  ;;  %v1227_v61 = vadd.f32 %v3152_v19, %v1210_v15  ;;  %v1293_v17 = vadd.f32 %v3156_v21, %v1276_v40 }
 0x106   : > { %v1350_v58 = vmax.f32 %v3780_v29, %v3782_v63  ;;  %v1681_v33 = vmul.f32 %v3158_v22, %v3182_v36  ;;  %v1747_v37 = vmul.f32 %v3278_v51, %v3182_v36  ;;  %v1211_v8 = vmul.f32 %v3146_v16, %v3249_v27  ;;  %1813 = vmax.xlane.f32.xlu0 %v1812_v18 }
 0x107   : > { %v3799_v14 = vadd.f32 %v1763_v45, %v1715_v35  ;;  %v3801_v38 = vadd.f32 %v1763_v45, %v1716_v42  ;;  %v1249_v15 = vmul.f32 %v1227_v61, %v3126_v6  ;;  %v1250_v40 = vmul.f32 %v1227_v61, %v3128_v7 }
 0x108   : > { %1351 = vmax.xlane.f32.xlu1 %v1350_v58  ;;  %v1698_v63 = vadd.f32 %v3308_v34, %v1681_v33  ;;  %v1764_v29 = vadd.f32 %v3339_v1, %v1747_v37  ;;  %v1228_v11 = vadd.f32 %v3152_v19, %v1211_v8  ;;  %v1277_v36 = vmul.f32 %v3154_v20, %v3249_v27 }
 0x109   : > { %5589 = vst [vmem:[#allocation65_spill] sm:$0xff] %v3799_v14  ;;  %5590 = vst [vmem:[#allocation66_spill] sm:$0xff] %v3801_v38  ;;  %v1815_v35 = vmax.f32 %v3799_v14, %v3801_v38  ;;  %v3812_v18 = vadd.f32 %v1293_v17, %v1249_v15  ;;  %v3814_v42 = vadd.f32 %v1293_v17, %v1250_v40 }
 0x10a   : > { %v1682_v45 = vmul.f32 %v3158_v22, %v3216_v53  ;;  %v1717_v61 = vmul.f32 %v1698_v63, %v3126_v6  ;;  %v1718_v58 = vmul.f32 %v1698_v63, %v3128_v7  ;;  %v1251_v33 = vmul.f32 %v1228_v11, %v3126_v6 }
 0x10b   : > { %5591 = vst [vmem:[#allocation67_spill] sm:$0xff] %v3814_v42  ;;  %v1252_v37 = vmul.f32 %v1228_v11, %v3128_v7  ;;  %1816 = vmax.xlane.f32.xlu0 %v1815_v35  ;;  %v1353_v8 = vmax.f32 %v3812_v18, %v3814_v42  ;;  %v1294_v15 = vadd.f32 %v3156_v21, %v1277_v36 }
 0x10c   : > { %v1699_v17 = vadd.f32 %v3308_v34, %v1682_v45  ;;  %v1748_v40 = vmul.f32 %v3278_v51, %v3216_v53  ;;  %v3828_v38 = vadd.f32 %v1764_v29, %v1717_v61  ;;  %v3830_v14 = vadd.f32 %v1764_v29, %v1718_v58 }
 0x10d   : > { %v1212_v63 = vmul.f32 %v3146_v16, %v3280_v52  ;;  %v1278_v11 = vmul.f32 %v3154_v20, %v3280_v52  ;;  %1354 = vmax.xlane.f32.xlu1 %v1353_v8  ;;  %v3836_v35 = vadd.f32 %v1294_v15, %v1251_v33  ;;  %v3838_v42 = vadd.f32 %v1294_v15, %v1252_v37 }
 0x10e   : > { %5592 = vst [vmem:[#allocation68_spill] sm:$0xff] %v3830_v14  ;;  %v1719_v36 = vmul.f32 %v1699_v17, %v3126_v6  ;;  %v1720_v45 = vmul.f32 %v1699_v17, %v3128_v7  ;;  %v1818_v53 = vmax.f32 %v3828_v38, %v3830_v14  ;;  %v1765_v29 = vadd.f32 %v3339_v1, %v1748_v40 }
 0x10f   : > { %5593 = vst [vmem:[#allocation69_spill] sm:$0xff] %v3836_v35  ;;  %5594 = vst [vmem:[#allocation70_spill] sm:$0xff] %v3838_v42  ;;  %v1229_v61 = vadd.f32 %v3152_v19, %v1212_v63  ;;  %v1295_v58 = vadd.f32 %v3156_v21, %v1278_v11  ;;  %v1356_v8 = vmax.f32 %v3836_v35, %v3838_v42 }
 0x110   : > { %v1683_v33 = vmul.f32 %v3158_v22, %v3218_v54  ;;  %v1749_v37 = vmul.f32 %v3278_v51, %v3218_v54  ;;  %v1213_v15 = vmul.f32 %v3146_v16, %v3282_v57  ;;  %1819 = vmax.xlane.f32.xlu0 %v1818_v53  ;;  %v3855_v17 = vadd.f32 %v1765_v29, %v1719_v36 }
 0x111   : > { %v3857_v40 = vadd.f32 %v1765_v29, %v1720_v45  ;;  %v1253_v63 = vmul.f32 %v1229_v61, %v3126_v6  ;;  %v1254_v11 = vmul.f32 %v1229_v61, %v3128_v7  ;;  %1357 = vmax.xlane.f32.xlu1 %v1356_v8  ;;  %v1279_v54 = vmul.f32 %v3154_v20, %v3282_v57 }
 0x112   : > { %5595 = vst [vmem:[#allocation71_spill] sm:$0xff] %v3855_v17  ;;  %v1700_v42 = vadd.f32 %v3308_v34, %v1683_v33  ;;  %v1766_v35 = vadd.f32 %v3339_v1, %v1749_v37  ;;  %v1230_v14 = vadd.f32 %v3152_v19, %v1213_v15  ;;  %v1684_v29 = vmul.f32 %v3158_v22, %v3247_v26 }
 0x113   : > { %5596 = vst [vmem:[#allocation72_spill] sm:$0xff] %v3857_v40  ;;  %v1821_v36 = vmax.f32 %v3855_v17, %v3857_v40  ;;  %v3868_v53 = vadd.f32 %v1295_v58, %v1253_v63  ;;  %v3870_v45 = vadd.f32 %v1295_v58, %v1254_v11  ;;  %v1296_v63 = vadd.f32 %v3156_v21, %v1279_v54 }
 0x114   : > { %v1721_v61 = vmul.f32 %v1700_v42, %v3126_v6  ;;  %v1722_v8 = vmul.f32 %v1700_v42, %v3128_v7  ;;  %v1255_v33 = vmul.f32 %v1230_v14, %v3126_v6  ;;  %v1256_v37 = vmul.f32 %v1230_v14, %v3128_v7 }
 0x115   : > { %5597 = vst [vmem:[#allocation73_spill] sm:$0xff] %v3870_v45  ;;  %1822 = vmax.xlane.f32.xlu0 %v1821_v36  ;;  %v1359_v15 = vmax.f32 %v3868_v53, %v3870_v45  ;;  %v1701_v58 = vadd.f32 %v3308_v34, %v1684_v29  ;;  %v1750_v11 = vmul.f32 %v3278_v51, %v3247_v26 }
 0x116   : > { %v3884_v40 = vadd.f32 %v1766_v35, %v1721_v61  ;;  %v3886_v17 = vadd.f32 %v1766_v35, %v1722_v8  ;;  %v1214_v42 = vmul.f32 %v3146_v16, %v3310_v41  ;;  %v1280_v14 = vmul.f32 %v3154_v20, %v3310_v41 }
 0x117   : > { %1360 = vmax.xlane.f32.xlu1 %v1359_v15  ;;  %v3892_v36 = vadd.f32 %v1296_v63, %v1255_v33  ;;  %v3894_v45 = vadd.f32 %v1296_v63, %v1256_v37  ;;  %v1723_v54 = vmul.f32 %v1701_v58, %v3126_v6  ;;  %v1724_v29 = vmul.f32 %v1701_v58, %v3128_v7 }
 0x118   : > { %5598 = vst [vmem:[#allocation74_spill] sm:$0xff] %v3886_v17  ;;  %v1824_v26 = vmax.f32 %v3884_v40, %v3886_v17  ;;  %v1767_v35 = vadd.f32 %v3339_v1, %v1750_v11  ;;  %v1231_v61 = vadd.f32 %v3152_v19, %v1214_v42  ;;  %v1297_v8 = vadd.f32 %v3156_v21, %v1280_v14 }
 0x119   : > { %5599 = vst [vmem:[#allocation75_spill] sm:$0xff] %v3892_v36  ;;  %5600 = vst [vmem:[#allocation76_spill] sm:$0xff] %v3894_v45  ;;  %v1362_v15 = vmax.f32 %v3892_v36, %v3894_v45  ;;  %v1685_v33 = vmul.f32 %v3158_v22, %v3249_v27  ;;  %v1751_v37 = vmul.f32 %v3278_v51, %v3249_v27 }
 0x11a   : > { %v1215_v63 = vmul.f32 %v3146_v16, %v3317_v48  ;;  %1825 = vmax.xlane.f32.xlu0 %v1824_v26  ;;  %v3911_v58 = vadd.f32 %v1767_v35, %v1723_v54  ;;  %v3913_v11 = vadd.f32 %v1767_v35, %v1724_v29  ;;  %v1257_v42 = vmul.f32 %v1231_v61, %v3126_v6 }
 0x11b   : > { %v1258_v14 = vmul.f32 %v1231_v61, %v3128_v7  ;;  %1363 = vmax.xlane.f32.xlu1 %v1362_v15  ;;  %v1702_v45 = vadd.f32 %v3308_v34, %v1685_v33  ;;  %v1768_v36 = vadd.f32 %v3339_v1, %v1751_v37  ;;  %v1281_v27 = vmul.f32 %v3154_v20, %v3317_v48 }
 0x11c   : > { %5601 = vst [vmem:[#allocation77_spill] sm:$0xff] %v3911_v58  ;;  %5602 = vst [vmem:[#allocation78_spill] sm:$0xff] %v3913_v11  ;;  %v1232_v17 = vadd.f32 %v3152_v19, %v1215_v63  ;;  %v1827_v54 = vmax.f32 %v3911_v58, %v3913_v11  ;;  %v3924_v26 = vadd.f32 %v1297_v8, %v1257_v42 }
 0x11d   : > { %v3926_v29 = vadd.f32 %v1297_v8, %v1258_v14  ;;  %v1686_v35 = vmul.f32 %v3158_v22, %v3280_v52  ;;  %v1725_v61 = vmul.f32 %v1702_v45, %v3126_v6  ;;  %v1726_v15 = vmul.f32 %v1702_v45, %v3128_v7 }
 0x11e   : > { %5603 = vst [vmem:[#allocation79_spill] sm:$0xff] %v3924_v26  ;;  %v1259_v33 = vmul.f32 %v1232_v17, %v3126_v6  ;;  %v1260_v37 = vmul.f32 %v1232_v17, %v3128_v7  ;;  %1828 = vmax.xlane.f32.xlu0 %v1827_v54  ;;  %v1298_v42 = vadd.f32 %v3156_v21, %v1281_v27 }
 0x11f   : > { %5604 = vst [vmem:[#allocation80_spill] sm:$0xff] %v3926_v29  ;;  %v1365_v63 = vmax.f32 %v3924_v26, %v3926_v29  ;;  %v1703_v8 = vadd.f32 %v3308_v34, %v1686_v35  ;;  %v1752_v14 = vmul.f32 %v3278_v51, %v3280_v52  ;;  %v3940_v11 = vadd.f32 %v1768_v36, %v1725_v61 }
 0x120   : > { %v3942_v58 = vadd.f32 %v1768_v36, %v1726_v15  ;;  %v1216_v45 = vmul.f32 %v3146_v16, %v3341_v2  ;;  %v1282_v17 = vmul.f32 %v3154_v20, %v3341_v2  ;;  %v3948_v54 = vadd.f32 %v1298_v42, %v1259_v33 }
 0x121   : > { %5605 = vst [vmem:[#allocation81_spill] sm:$0xff] %v3940_v11  ;;  %1366 = vmax.xlane.f32.xlu1 %v1365_v63  ;;  %v3950_v29 = vadd.f32 %v1298_v42, %v1260_v37  ;;  %v1727_v27 = vmul.f32 %v1703_v8, %v3126_v6  ;;  %v1728_v35 = vmul.f32 %v1703_v8, %v3128_v7 }
 0x122   : > { %5606 = vst [vmem:[#allocation82_spill] sm:$0xff] %v3942_v58  ;;  %5607 = vst [vmem:[#allocation83_spill] sm:$0xff] %v3948_v54  ;;  %v1830_v52 = vmax.f32 %v3940_v11, %v3942_v58  ;;  %v1769_v36 = vadd.f32 %v3339_v1, %v1752_v14  ;;  %v1233_v61 = vadd.f32 %v3152_v19, %v1216_v45 }
 0x123   : > { %5608 = vst [vmem:[#allocation84_spill] sm:$0xff] %v3950_v29  ;;  %v1299_v15 = vadd.f32 %v3156_v21, %v1282_v17  ;;  %v1368_v63 = vmax.f32 %v3948_v54, %v3950_v29  ;;  %v1687_v33 = vmul.f32 %v3158_v22, %v3282_v57  ;;  %v1753_v37 = vmul.f32 %v3278_v51, %v3282_v57 }
 0x124   : > { %v1217_v42 = vmul.f32 %v3146_v16, %v3359_v0  ;;  %1831 = vmax.xlane.f32.xlu0 %v1830_v52  ;;  %v3967_v8 = vadd.f32 %v1769_v36, %v1727_v27  ;;  %v3969_v14 = vadd.f32 %v1769_v36, %v1728_v35  ;;  %v1261_v45 = vmul.f32 %v1233_v61, %v3126_v6 }
 0x125   : > { %v1262_v17 = vmul.f32 %v1233_v61, %v3128_v7  ;;  %1369 = vmax.xlane.f32.xlu1 %v1368_v63  ;;  %v1704_v29 = vadd.f32 %v3308_v34, %v1687_v33  ;;  %v1770_v54 = vadd.f32 %v3339_v1, %v1753_v37  ;;  %v1283_v57 = vmul.f32 %v3154_v20, %v3359_v0 }
 0x126   : > { %5609 = vst [vmem:[#allocation85_spill] sm:$0xff] %v3967_v8  ;;  %5610 = vst [vmem:[#allocation86_spill] sm:$0xff] %v3969_v14  ;;  %v1234_v58 = vadd.f32 %v3152_v19, %v1217_v42  ;;  %v1833_v27 = vmax.f32 %v3967_v8, %v3969_v14  ;;  %v3980_v52 = vadd.f32 %v1299_v15, %v1261_v45 }
 0x127   : > { %v3982_v35 = vadd.f32 %v1299_v15, %v1262_v17  ;;  %v1688_v36 = vmul.f32 %v3158_v22, %v3310_v41  ;;  %v1729_v61 = vmul.f32 %v1704_v29, %v3126_v6  ;;  %v1730_v63 = vmul.f32 %v1704_v29, %v3128_v7 }
 0x128   : > { %5611 = vst [vmem:[#allocation87_spill] sm:$0xff] %v3980_v52  ;;  %v1263_v33 = vmul.f32 %v1234_v58, %v3126_v6  ;;  %v1264_v37 = vmul.f32 %v1234_v58, %v3128_v7  ;;  %1834 = vmax.xlane.f32.xlu0 %v1833_v27  ;;  %v1300_v45 = vadd.f32 %v3156_v21, %v1283_v57 }
 0x129   : > { %5612 = vst [vmem:[#allocation88_spill] sm:$0xff] %v3982_v35  ;;  %v1371_v42 = vmax.f32 %v3980_v52, %v3982_v35  ;;  %v1705_v15 = vadd.f32 %v3308_v34, %v1688_v36  ;;  %v1754_v17 = vmul.f32 %v3278_v51, %v3310_v41  ;;  %v3996_v14 = vadd.f32 %v1770_v54, %v1729_v61 }
 0x12a   : > { %v3998_v8 = vadd.f32 %v1770_v54, %v1730_v63  ;;  %v1218_v29 = vmul.f32 %v3146_v16, %v3368_v28  ;;  %v1284_v58 = vmul.f32 %v3154_v20, %v3368_v28  ;;  %v4004_v27 = vadd.f32 %v1300_v45, %v1263_v33 }
 0x12b   : > { %5613 = vst [vmem:[#allocation89_spill] sm:$0xff] %v3996_v14  ;;  %1372 = vmax.xlane.f32.xlu1 %v1371_v42  ;;  %v4006_v35 = vadd.f32 %v1300_v45, %v1264_v37  ;;  %v1731_v57 = vmul.f32 %v1705_v15, %v3126_v6  ;;  %v1732_v36 = vmul.f32 %v1705_v15, %v3128_v7 }
 0x12c   : > { %5614 = vst [vmem:[#allocation90_spill] sm:$0xff] %v3998_v8  ;;  %5615 = vst [vmem:[#allocation91_spill] sm:$0xff] %v4004_v27  ;;  %v1836_v41 = vmax.f32 %v3996_v14, %v3998_v8  ;;  %v1771_v54 = vadd.f32 %v3339_v1, %v1754_v17  ;;  %v1235_v61 = vadd.f32 %v3152_v19, %v1218_v29 }
 0x12d   : > { %5616 = vst [vmem:[#allocation92_spill] sm:$0xff] %v4006_v35  ;;  %v1301_v63 = vadd.f32 %v3156_v21, %v1284_v58  ;;  %v1374_v42 = vmax.f32 %v4004_v27, %v4006_v35  ;;  %v1219_v33 = vmul.f32 %v3146_v16, %v3402_v32  ;;  %v1285_v37 = vmul.f32 %v3154_v20, %v3402_v32 }
 0x12e   : > { %v1689_v45 = vmul.f32 %v3158_v22, %v3317_v48  ;;  %1837 = vmax.xlane.f32.xlu0 %v1836_v41  ;;  %v4023_v15 = vadd.f32 %v1771_v54, %v1731_v57  ;;  %v4025_v17 = vadd.f32 %v1771_v54, %v1732_v36  ;;  %v1265_v29 = vmul.f32 %v1235_v61, %v3126_v6 }
 0x12f   : > { %v1266_v58 = vmul.f32 %v1235_v61, %v3128_v7  ;;  %1375 = vmax.xlane.f32.xlu1 %v1374_v42  ;;  %v1236_v35 = vadd.f32 %v3152_v19, %v1219_v33  ;;  %v1302_v16 = vadd.f32 %v3156_v21, %v1285_v37  ;;  %v1755_v20 = vmul.f32 %v3278_v51, %v3317_v48 }
 0x130   : > { %5617 = vst [vmem:[#allocation93_spill] sm:$0xff] %v4023_v15  ;;  %5618 = vst [vmem:[#allocation94_spill] sm:$0xff] %v4025_v17  ;;  %v1706_v27 = vadd.f32 %v3308_v34, %v1689_v45  ;;  %v1839_v57 = vmax.f32 %v4023_v15, %v4025_v17  ;;  %v4036_v41 = vadd.f32 %v1301_v63, %v1265_v29 }
 0x131   : > { %v4038_v36 = vadd.f32 %v1301_v63, %v1266_v58  ;;  %v1692_v54 = vmul.f32 %v3158_v22, %v3368_v28  ;;  %v1267_v61 = vmul.f32 %v1236_v35, %v3126_v6  ;;  %v1268_v19 = vmul.f32 %v1236_v35, %v3128_v7 }
 0x132   : > { %5619 = vst [vmem:[#allocation95_spill] sm:$0xff] %v4036_v41  ;;  %v1733_v21 = vmul.f32 %v1706_v27, %v3126_v6  ;;  %v1734_v42 = vmul.f32 %v1706_v27, %v3128_v7  ;;  %1840 = vmax.xlane.f32.xlu0 %v1839_v57  ;;  %v1772_v48 = vadd.f32 %v3339_v1, %v1755_v20 }
 0x133   : > { %5620 = vst [vmem:[#allocation96_spill] sm:$0xff] %v4038_v36  ;;  %v1709_v33 = vadd.f32 %v3308_v34, %v1692_v54  ;;  %v1758_v63 = vmul.f32 %v3278_v51, %v3368_v28  ;;  %v4050_v37 = vadd.f32 %v1302_v16, %v1267_v61  ;;  %v4052_v45 = vadd.f32 %v1302_v16, %v1268_v19 }
 0x134   : > { %v1690_v29 = vmul.f32 %v3158_v22, %v3341_v2  ;;  %v1756_v35 = vmul.f32 %v3278_v51, %v3341_v2  ;;  %v4058_v58 = vadd.f32 %v1772_v48, %v1733_v21  ;;  %v4060_v27 = vadd.f32 %v1772_v48, %v1734_v42 }
 0x135   : > { %5621 = vst [vmem:[#allocation97_spill] sm:$0xff] %v4050_v37  ;;  %5622 = vst [vmem:[#allocation98_spill] sm:$0xff] %v4052_v45  ;;  %v1739_v20 = vmul.f32 %v1709_v33, %v3126_v6  ;;  %v1740_v57 = vmul.f32 %v1709_v33, %v3128_v7  ;;  %v1775_v28 = vadd.f32 %v3339_v1, %v1758_v63  ;;  %v5665_v45 = vld [vmem:[#allocation41_spill] sm:$0xff] }
 0x136   : > { %5623 = vst [vmem:[#allocation99_spill] sm:$0xff] %v4058_v58  ;;  %5624 = vst [vmem:[#allocation100_spill] sm:$0xff] %v4060_v27  ;;  %v1707_v54 = vadd.f32 %v3308_v34, %v1690_v29  ;;  %v1773_v16 = vadd.f32 %v3339_v1, %v1756_v35  ;;  %v1691_v61 = vmul.f32 %v3158_v22, %v3359_v0 }
 0x137   : > { %v1757_v2 = vmul.f32 %v3278_v51, %v3359_v0  ;;  %v1693_v19 = vmul.f32 %v3158_v22, %v3402_v32  ;;  %v4073_v21 = vadd.f32 %v1775_v28, %v1739_v20  ;;  %v4075_v42 = vadd.f32 %v1775_v28, %v1740_v57 }
 0x138   : > { %v1735_v48 = vmul.f32 %v1707_v54, %v3126_v6  ;;  %v1736_v33 = vmul.f32 %v1707_v54, %v3128_v7  ;;  %v1708_v63 = vadd.f32 %v3308_v34, %v1691_v61  ;;  %v1759_v0 = vmul.f32 %v3278_v51, %v3402_v32  ;;  %v389_v32 = vpop.xlane.xlu0 %388 }
 0x139   : > { %5625 = vst [vmem:[#allocation101_spill] sm:$0xff] %v4073_v21  ;;  %5626 = vst [vmem:[#allocation102_spill] sm:$0xff] %v4075_v42  ;;  %v1774_v29 = vadd.f32 %v3339_v1, %v1757_v2  ;;  %v1710_v35 = vadd.f32 %v3308_v34, %v1693_v19 }
 0x13a   : > { %v4084_v58 = vadd.f32 %v1773_v16, %v1735_v48  ;;  %v4086_v22 = vadd.f32 %v1773_v16, %v1736_v33  ;;  %v1737_v20 = vmul.f32 %v1708_v63, %v3126_v6  ;;  %v1738_v57 = vmul.f32 %v1708_v63, %v3128_v7 }
 0x13b   : > { %v1741_v28 = vmul.f32 %v1710_v35, %v3126_v6  ;;  %v1742_v54 = vmul.f32 %v1710_v35, %v3128_v7  ;;  %v1776_v61 = vadd.f32 %v3339_v1, %v1759_v0  ;;  %v435_v16 = vsub.f32 %v3208_v49, %v389_v32 }
 0x13c   : > { %5627 = vst [vmem:[#allocation103_spill] sm:$0xff] %v4084_v58  ;;  %5628 = vst [vmem:[#allocation104_spill] sm:$0xff] %v4086_v22  ;;  %v4093_v2 = vadd.f32 %v1774_v29, %v1737_v20  ;;  %v4095_v34 = vadd.f32 %v1774_v29, %v1738_v57  ;;  %v436_v48 = vsub.f32 %v3210_v50, %v389_v32  ;;  %v392_v58 = vpop.xlane.xlu1 %391  ;;  %v395_v22 = vpop.xlane.xlu0 %394 }
 0x13d   : > { %v4097_v19 = vadd.f32 %v1776_v61, %v1741_v28  ;;  %v4099_v51 = vadd.f32 %v1776_v61, %v1742_v54  ;;  %v467_v33 = vmul.f32 1.442695, %v435_v16  ;;  %v437_v1 = vsub.f32 %v3238_v5, %v392_v58  ;;  %v5633_v16 = vld [vmem:[#allocation9_spill] sm:$0xff] }
 0x13e   : > { %5629 = vst [vmem:[#allocation105_spill] sm:$0xff] %v4093_v2  ;;  %5630 = vst [vmem:[#allocation106_spill] sm:$0xff] %v4095_v34  ;;  %v469_v63 = vmul.f32 1.442695, %v436_v48  ;;  %v438_v35 = vsub.f32 %v3240_v23, %v392_v58  ;;  %v439_v29 = vsub.f32 %v3220_v55, %v395_v22  ;;  %v440_v0 = vsub.f32 %v3222_v56, %v395_v22  ;;  %v5634_v23 = vld [vmem:[#allocation10_spill] sm:$0xff] }
 0x13f   : > { %5631 = vst [vmem:[#allocation107_spill] sm:$0xff] %v4097_v19  ;;  %5632 = vst [vmem:[#allocation108_spill] sm:$0xff] %v4099_v51  ;;  %2505 = vpow2.f32 %v467_v33  ;;  %v471_v20 = vmul.f32 1.442695, %v437_v1  ;;  %v5635_v1 = vld [vmem:[#allocation13_spill] sm:$0xff] }
 0x140   : > { %2507 = vpow2.f32 %v469_v63  ;;  %v473_v57 = vmul.f32 1.442695, %v438_v35  ;;  %v475_v28 = vmul.f32 1.442695, %v439_v29  ;;  %v477_v49 = vmul.f32 1.442695, %v440_v0  ;;  %v401_v54 = vpop.xlane.xlu1 %400  ;;  %v398_v50 = vpop.xlane.xlu0 %397 }
 0x141   : > { %2509 = vpow2.f32 %v471_v20  ;;  %v443_v61 = vsub.f32 %v3270_v46, %v401_v54  ;;  %v444_v32 = vsub.f32 %v3272_v47, %v401_v54  ;;  %v441_v5 = vsub.f32 %v5633_v16, %v398_v50  ;;  %v5636_v29 = vld [vmem:[#allocation14_spill] sm:$0xff]  ;;  %v5637_v0 = vld [vmem:[#allocation11_spill] sm:$0xff]  ;;  %v5638_v20 = vld [vmem:[#allocation12_spill] sm:$0xff] }
 0x142   : > { %2511 = vpow2.f32 %v473_v57  ;;  %v442_v58 = vsub.f32 %v5634_v23, %v398_v50 }
 0x143   : > { %2513 = vpow2.f32 %v475_v28  ;;  %v483_v55 = vmul.f32 1.442695, %v443_v61  ;;  %v485_v48 = vmul.f32 1.442695, %v444_v32  ;;  %v479_v56 = vmul.f32 1.442695, %v441_v5 }
 0x144   : > { %2515 = vpow2.f32 %v477_v49  ;;  %v481_v22 = vmul.f32 1.442695, %v442_v58  ;;  %v407_v33 = vpop.xlane.xlu1 %406  ;;  %v404_v63 = vpop.xlane.xlu0 %403  ;;  %v5639_v32 = vld [vmem:[#allocation15_spill] sm:$0xff]  ;;  %v5640_v5 = vld [vmem:[#allocation16_spill] sm:$0xff] }
 0x145   : > { %2517 = vpow2.f32 %v483_v55  ;;  %v447_v35 = vsub.f32 %v5635_v1, %v407_v33  ;;  %v448_v46 = vsub.f32 %v5636_v29, %v407_v33  ;;  %v445_v47 = vsub.f32 %v5637_v0, %v404_v63 }
 0x146   : > { %2519 = vpow2.f32 %v485_v48  ;;  %v446_v57 = vsub.f32 %v5638_v20, %v404_v63  ;;  %v5641_v63 = vld [vmem:[#allocation17_spill] sm:$0xff] }
 0x147   : > { %2521 = vpow2.f32 %v479_v56  ;;  %v491_v54 = vmul.f32 1.442695, %v447_v35  ;;  %v493_v28 = vmul.f32 1.442695, %v448_v46  ;;  %v487_v50 = vmul.f32 1.442695, %v445_v47 }
 0x148   : > { %2523 = vpow2.f32 %v481_v22  ;;  %v489_v61 = vmul.f32 1.442695, %v446_v57  ;;  %v413_v49 = vpop.xlane.xlu1 %412  ;;  %v5642_v35 = vld [vmem:[#allocation18_spill] sm:$0xff] }
 0x149   : > { %2525 = vpow2.f32 %v491_v54  ;;  %v451_v16 = vsub.f32 %v5639_v32, %v413_v49  ;;  %v452_v23 = vsub.f32 %v5640_v5, %v413_v49  ;;  %v410_v55 = vpop.xlane.xlu0 %409  ;;  %v5644_v49 = vld [vmem:[#allocation20_spill] sm:$0xff]  ;;  %v5645_v5 = vld [vmem:[#allocation21_spill] sm:$0xff] }
 0x14a   : > { %2527 = vpow2.f32 %v493_v28  ;;  %v449_v56 = vsub.f32 %v5641_v63, %v410_v55  ;;  %v450_v29 = vsub.f32 %v5642_v35, %v410_v55  ;;  %v5643_v28 = vld [vmem:[#allocation19_spill] sm:$0xff]  ;;  %v5646_v55 = vld [vmem:[#allocation22_spill] sm:$0xff] }
 0x14b   : > { %2529 = vpow2.f32 %v487_v50  ;;  %v499_v48 = vmul.f32 1.442695, %v451_v16  ;;  %v501_v1 = vmul.f32 1.442695, %v452_v23 }
 0x14c   : > { %v2506_v58 = vpop.eup %2505  ;;  %2531 = vpow2.f32 %v489_v61  ;;  %v495_v0 = vmul.f32 1.442695, %v449_v56  ;;  %v419_v47 = vpop.xlane.xlu1 %418  ;;  %v497_v54 = vmul.f32 1.442695, %v450_v29 }
 0x14d   : > { %v2508_v33 = vpop.eup %2507  ;;  %v579_v46 = vmul.f32 %v2506_v58, %v3126_v6  ;;  %2533 = vpow2.f32 %v499_v48  ;;  %v455_v50 = vsub.f32 %v5643_v28, %v419_v47  ;;  %v456_v32 = vsub.f32 %v5644_v49, %v419_v47  ;;  %v416_v16 = vpop.xlane.xlu0 %415  ;;  %v5647_v49 = vld [vmem:[#allocation23_spill] sm:$0xff] }
 0x14e   : > { %v531_v22 = vadd.f32 %v2508_v33, %v2506_v58  ;;  %v580_v20 = vmul.f32 %v2508_v33, %v3128_v7  ;;  %v2510_v57 = vpop.eup %2509  ;;  %2535 = vpow2.f32 %v501_v1  ;;  %v453_v23 = vsub.f32 %v5645_v5, %v416_v16 }
 0x14f   : > { %v2512_v61 = vpop.eup %2511  ;;  %2537 = vpow2.f32 %v495_v0  ;;  %v454_v58 = vsub.f32 %v5646_v55, %v416_v16  ;;  %v507_v33 = vmul.f32 1.442695, %v455_v50  ;;  %v509_v56 = vmul.f32 1.442695, %v456_v32  ;;  %v5648_v16 = vld [vmem:[#allocation24_spill] sm:$0xff] }
 0x150   : > { %532 = vadd.xlane.f32.xlu1 %v531_v22  ;;  %v4125_v48 = vadd.f32 %v580_v20, %v579_v46  ;;  %v2514_v63 = vpop.eup %2513  ;;  %2539 = vpow2.f32 %v497_v54  ;;  %v534_v1 = vadd.f32 %v2512_v61, %v2510_v57  ;;  %v503_v29 = vmul.f32 1.442695, %v453_v23  ;;  %v425_v19 = vpop.xlane.xlu1 %424 }
 0x151   : > { %v2516_v35 = vpop.eup %2515  ;;  %v505_v28 = vmul.f32 1.442695, %v454_v58  ;;  %v583_v47 = vmul.f32 %v2514_v63, %v3126_v6  ;;  %v581_v22 = vmul.f32 %v2510_v57, %v3126_v6  ;;  %2541 = vpow2.f32 %v507_v33 }
 0x152   : > { %v2518_v0 = vpop.eup %2517  ;;  %v459_v5 = vsub.f32 %v5647_v49, %v425_v19  ;;  %v460_v46 = vsub.f32 %v5648_v16, %v425_v19  ;;  %535 = vadd.xlane.f32.xlu0 %v534_v1  ;;  %v537_v20 = vadd.f32 %v2516_v35, %v2514_v63  ;;  %2543 = vpow2.f32 %v509_v56 }
 0x153   : > { %v2520_v54 = vpop.eup %2519  ;;  %v422_v50 = vpop.xlane.xlu0 %421  ;;  %v584_v32 = vmul.f32 %v2516_v35, %v3128_v7  ;;  %v582_v23 = vmul.f32 %v2512_v61, %v3128_v7  ;;  %v587_v55 = vmul.f32 %v2518_v0, %v3126_v6  ;;  %2545 = vpow2.f32 %v503_v29 }
 0x154   : > { %v2522_v58 = vpop.eup %2521  ;;  %v515_v57 = vmul.f32 1.442695, %v459_v5  ;;  %v517_v51 = vmul.f32 1.442695, %v460_v46  ;;  %v457_v33 = vsub.f32 %v3412_v59, %v422_v50  ;;  %538 = vadd.xlane.f32.xlu1 %v537_v20  ;;  %2547 = vpow2.f32 %v505_v28 }
 0x155   : > { %v2524_v49 = vpop.eup %2523  ;;  %v458_v19 = vsub.f32 %v3414_v60, %v422_v50  ;;  %v543_v63 = vadd.f32 %v2520_v54, %v2518_v0  ;;  %v4136_v56 = vadd.f32 %v584_v32, %v583_v47  ;;  %v4138_v2 = vadd.f32 %v582_v23, %v581_v22 }
 0x156   : > { %v2526_v1 = vpop.eup %2525  ;;  %2549 = vpow2.f32 %v515_v57  ;;  %v511_v35 = vmul.f32 1.442695, %v457_v33  ;;  %v431_v61 = vpop.xlane.xlu1 %430  ;;  %v540_v16 = vadd.f32 %v2524_v49, %v2522_v58  ;;  %v588_v0 = vmul.f32 %v2520_v54, %v3128_v7 }
 0x157   : > { %v2528_v29 = vpop.eup %2527  ;;  %2551 = vpow2.f32 %v517_v51  ;;  %v513_v5 = vmul.f32 1.442695, %v458_v19  ;;  %v463_v59 = vsub.f32 %v3433_v3, %v431_v61  ;;  %v464_v46 = vsub.f32 %v3435_v43, %v431_v61 }
 0x158   : > { %v2530_v28 = vpop.eup %2529  ;;  %2553 = vpow2.f32 %v511_v35  ;;  %v428_v60 = vpop.xlane.xlu0 %427  ;;  %544 = vadd.xlane.f32.xlu1 %v543_v63  ;;  %541 = vadd.xlane.f32.xlu0 %v540_v16  ;;  %v549_v47 = vadd.f32 %v2528_v29, %v2526_v1  ;;  %v585_v20 = vmul.f32 %v2522_v58, %v3126_v6  ;;  %v4151_v33 = vadd.f32 %v588_v0, %v587_v55  ;;  %v5649_v35 = vld [vmem:[#allocation25_spill] sm:$0xff] }
 0x159   : > { %v4144_v50 = vpop.eup %2531  ;;  %2555 = vpow2.f32 %v513_v5  ;;  %v523_v22 = vmul.f32 1.442695, %v463_v59  ;;  %v525_v51 = vmul.f32 1.442695, %v464_v46  ;;  %v461_v32 = vsub.f32 %v3447_v25, %v428_v60  ;;  %v5651_v0 = vld [vmem:[#allocation29_spill] sm:$0xff] }
 0x15a   : > { %v4147_v3 = vpop.eup %2533  ;;  %v462_v43 = vsub.f32 %v3449_v44, %v428_v60  ;;  %v863_v23 = vpop.xlane.xlu1 %862  ;;  %v546_v57 = vadd.f32 %v4144_v50, %v2530_v28  ;;  %v586_v54 = vmul.f32 %v2524_v49, %v3128_v7 }
 0x15b   : > { %v4154_v19 = vpop.eup %2535  ;;  %2557 = vpow2.f32 %v523_v22  ;;  %v519_v58 = vmul.f32 1.442695, %v461_v32  ;;  %v909_v63 = vsub.f32 %v3422_v24, %v863_v23  ;;  %v910_v61 = vsub.f32 %v5649_v35, %v863_v23  ;;  %v5650_v24 = vld [vmem:[#allocation28_spill] sm:$0xff]  ;;  %v5652_v23 = vld [vmem:[#allocation26_spill] sm:$0xff] }
 0x15c   : > { %v4158_v25 = vpop.eup %2537  ;;  %2559 = vpow2.f32 %v525_v51  ;;  %v521_v16 = vmul.f32 1.442695, %v462_v43  ;;  %v434_v44 = vpop.xlane.xlu0 %433  ;;  %550 = vadd.xlane.f32.xlu1 %v549_v47  ;;  %547 = vadd.xlane.f32.xlu0 %v546_v57  ;;  %v555_v55 = vadd.f32 %v4154_v19, %v4147_v3  ;;  %v4162_v5 = vadd.f32 %v586_v54, %v585_v20  ;;  %v5653_v54 = vld [vmem:[#allocation27_spill] sm:$0xff] }
 0x15d   : > { %v4164_v49 = vpop.eup %2539  ;;  %2561 = vpow2.f32 %v519_v58  ;;  %v941_v59 = vmul.f32 1.442695, %v909_v63  ;;  %v943_v46 = vmul.f32 1.442695, %v910_v61  ;;  %v465_v60 = vsub.f32 %v5650_v24, %v434_v44 }
 0x15e   : > { %2563 = vpow2.f32 %v521_v16  ;;  %v466_v22 = vsub.f32 %v5651_v0, %v434_v44  ;;  %v869_v51 = vpop.xlane.xlu1 %868  ;;  %v552_v47 = vadd.f32 %v4164_v49, %v4158_v25  ;;  %v591_v32 = vmul.f32 %v2526_v1, %v3126_v6  ;;  %v4171_v43 = vpop.eup %2541 }
 0x15f   : > { %2565 = vpow2.f32 %v941_v59  ;;  %v527_v20 = vmul.f32 1.442695, %v465_v60  ;;  %v913_v57 = vsub.f32 %v5652_v23, %v869_v51  ;;  %v914_v58 = vsub.f32 %v5653_v54, %v869_v51  ;;  %v4175_v63 = vpop.eup %2543  ;;  %v5654_v60 = vld [vmem:[#allocation30_spill] sm:$0xff]  ;;  %v5655_v51 = vld [vmem:[#allocation31_spill] sm:$0xff]  ;;  %v5657_v54 = vld [vmem:[#allocation33_spill] sm:$0xff] }
 0x160   : > { %2567 = vpow2.f32 %v943_v46  ;;  %v529_v35 = vmul.f32 1.442695, %v466_v22  ;;  %v866_v61 = vpop.xlane.xlu0 %865  ;;  %556 = vadd.xlane.f32.xlu1 %v555_v55  ;;  %553 = vadd.xlane.f32.xlu0 %v552_v47  ;;  %v592_v16 = vmul.f32 %v2528_v29, %v3128_v7  ;;  %v589_v44 = vmul.f32 %v2530_v28, %v3126_v6  ;;  %v4179_v1 = vpop.eup %2545 }
 0x161   : > { %2569 = vpow2.f32 %v527_v20  ;;  %v949_v59 = vmul.f32 1.442695, %v913_v57  ;;  %v951_v24 = vmul.f32 1.442695, %v914_v58  ;;  %v911_v0 = vsub.f32 %v5654_v60, %v866_v61  ;;  %v4182_v23 = vpop.eup %2547  ;;  %v5656_v20 = vld [vmem:[#allocation32_spill] sm:$0xff] }
 0x162   : > { %2571 = vpow2.f32 %v529_v35  ;;  %v912_v46 = vsub.f32 %v5655_v51, %v866_v61  ;;  %v875_v22 = vpop.xlane.xlu1 %874  ;;  %v561_v55 = vadd.f32 %v4175_v63, %v4171_v43  ;;  %v4187_v47 = vadd.f32 %v592_v16, %v591_v32  ;;  %v5658_v51 = vld [vmem:[#allocation34_spill] sm:$0xff] }
 0x163   : > { %v4189_v29 = vpop.eup %2549  ;;  %2573 = vpow2.f32 %v949_v59  ;;  %v945_v28 = vmul.f32 1.442695, %v911_v0  ;;  %v917_v57 = vsub.f32 %v5656_v20, %v875_v22  ;;  %v918_v58 = vsub.f32 %v5657_v54, %v875_v22 }
 0x164   : > { %v4193_v60 = vpop.eup %2551  ;;  %2575 = vpow2.f32 %v951_v24  ;;  %v947_v35 = vmul.f32 1.442695, %v912_v46  ;;  %562 = vadd.xlane.f32.xlu1 %v561_v55  ;;  %v558_v61 = vadd.f32 %v4182_v23, %v4179_v1  ;;  %v590_v32 = vmul.f32 %v4144_v50, %v3128_v7  ;;  %v5659_v24 = vld [vmem:[#allocation35_spill] sm:$0xff] }
 0x165   : > { %v872_v34 = vpop.xlane.xlu0 %871  ;;  %v4199_v16 = vpop.eup %2553  ;;  %2577 = vpow2.f32 %v945_v28  ;;  %v957_v59 = vmul.f32 1.442695, %v917_v57  ;;  %v959_v0 = vmul.f32 1.442695, %v918_v58  ;;  %v567_v54 = vadd.f32 %v4193_v60, %v4189_v29  ;;  %v5660_v57 = vld [vmem:[#allocation36_spill] sm:$0xff] }
 0x166   : > { %v915_v20 = vsub.f32 %v5658_v51, %v872_v34  ;;  %v4202_v22 = vpop.eup %2555  ;;  %2579 = vpow2.f32 %v947_v35  ;;  %v916_v46 = vsub.f32 %v5659_v24, %v872_v34  ;;  %559 = vadd.xlane.f32.xlu0 %v558_v61  ;;  %v881_v55 = vpop.xlane.xlu1 %880  ;;  %v4207_v21 = vadd.f32 %v590_v32, %v589_v44 }
 0x167   : > { %2581 = vpow2.f32 %v957_v59  ;;  %v921_v28 = vsub.f32 %v3532_v9, %v881_v55  ;;  %v922_v58 = vsub.f32 %v5660_v57, %v881_v55  ;;  %v564_v34 = vadd.f32 %v4202_v22, %v4199_v16  ;;  %v5661_v9 = vld [vmem:[#allocation37_spill] sm:$0xff] }
 0x168   : > { %v953_v50 = vmul.f32 1.442695, %v915_v20  ;;  %v4211_v42 = vpop.eup %2557  ;;  %2583 = vpow2.f32 %v959_v0  ;;  %v955_v51 = vmul.f32 1.442695, %v916_v46  ;;  %568 = vadd.xlane.f32.xlu1 %v567_v54  ;;  %v595_v61 = vmul.f32 %v4147_v3, %v3126_v6  ;;  %v5662_v0 = vld [vmem:[#allocation38_spill] sm:$0xff] }
 0x169   : > { %v878_v35 = vpop.xlane.xlu0 %877  ;;  %v4217_v44 = vpop.eup %2559  ;;  %v965_v32 = vmul.f32 1.442695, %v921_v28  ;;  %v967_v59 = vmul.f32 1.442695, %v922_v58  ;;  %v596_v3 = vmul.f32 %v4154_v19, %v3128_v7  ;;  %v5663_v28 = vld [vmem:[#allocation39_spill] sm:$0xff] }
 0x16a   : > { %2585 = vpow2.f32 %v953_v50  ;;  %v919_v20 = vsub.f32 %v5661_v9, %v878_v35  ;;  %v4220_v24 = vpop.eup %2561  ;;  %v920_v46 = vsub.f32 %v5662_v0, %v878_v35  ;;  %565 = vadd.xlane.f32.xlu0 %v564_v34  ;;  %v887_v55 = vpop.xlane.xlu1 %886  ;;  %v573_v54 = vadd.f32 %v4217_v44, %v4211_v42  ;;  %v5664_v9 = vld [vmem:[#allocation40_spill] sm:$0xff] }
 0x16b   : > { %2587 = vpow2.f32 %v955_v51  ;;  %v4227_v57 = vpop.eup %2563  ;;  %v925_v58 = vsub.f32 %v5663_v28, %v887_v55  ;;  %v926_v27 = vsub.f32 %v5664_v9, %v887_v55  ;;  %v4235_v0 = vadd.f32 %v596_v3, %v595_v61  ;;  %v5666_v55 = vld [vmem:[#allocation42_spill] sm:$0xff] }
 0x16c   : > { %2589 = vpow2.f32 %v965_v32  ;;  %v961_v50 = vmul.f32 1.442695, %v919_v20  ;;  %v4231_v37 = vpop.eup %2565  ;;  %v963_v51 = vmul.f32 1.442695, %v920_v46  ;;  %574 = vadd.xlane.f32.xlu1 %v573_v54  ;;  %v570_v34 = vadd.f32 %v4227_v57, %v4220_v24 }
 0x16d   : > { %2591 = vpow2.f32 %v967_v59  ;;  %v884_v35 = vpop.xlane.xlu0 %883  ;;  %v4237_v19 = vpop.eup %2567  ;;  %v973_v32 = vmul.f32 1.442695, %v925_v58  ;;  %v975_v20 = vmul.f32 1.442695, %v926_v27  ;;  %v593_v61 = vmul.f32 %v4158_v25, %v3126_v6  ;;  %v5667_v27 = vld [vmem:[#allocation43_spill] sm:$0xff] }
 0x16e   : > { %2593 = vpow2.f32 %v961_v50  ;;  %v923_v28 = vsub.f32 %v5665_v45, %v884_v35  ;;  %v4240_v41 = vpop.eup %2569  ;;  %v924_v59 = vsub.f32 %v5666_v55, %v884_v35  ;;  %571 = vadd.xlane.f32.xlu0 %v570_v34  ;;  %v1005_v54 = vadd.f32 %v4237_v19, %v4231_v37  ;;  %v5668_v45 = vld [vmem:[#allocation44_spill] sm:$0xff] }
 0x16f   : > { %2595 = vpow2.f32 %v963_v51  ;;  %v4247_v3 = vpop.eup %2571  ;;  %v594_v34 = vmul.f32 %v4164_v49, %v3128_v7 }
 0x170   : > { %v893_v46 = vpop.xlane.xlu1 %892  ;;  %2597 = vpow2.f32 %v973_v32  ;;  %v969_v50 = vmul.f32 1.442695, %v923_v28  ;;  %v4251_v36 = vpop.eup %2573  ;;  %v971_v51 = vmul.f32 1.442695, %v924_v59  ;;  %1006 = vadd.xlane.f32.xlu1 %v1005_v54  ;;  %v576_v35 = vadd.f32 %v4247_v3, %v4240_v41  ;;  %v5670_v54 = vld [vmem:[#allocation46_spill] sm:$0xff] }
 0x171   : > { %v929_v58 = vsub.f32 %v5667_v27, %v893_v46  ;;  %v930_v9 = vsub.f32 %v5668_v45, %v893_v46  ;;  %2599 = vpow2.f32 %v975_v20  ;;  %v4257_v25 = vpop.eup %2575  ;;  %v599_v46 = vmul.f32 %v4171_v43, %v3126_v6  ;;  %v5669_v20 = vld [vmem:[#allocation45_spill] sm:$0xff] }
 0x172   : > { %2601 = vpow2.f32 %v969_v50  ;;  %v4261_v27 = vpop.eup %2577  ;;  %577 = vadd.xlane.f32.xlu0 %v576_v35  ;;  %v1011_v49 = vadd.f32 %v4257_v25, %v4251_v36  ;;  %v5671_v50 = vld [vmem:[#allocation47_spill] sm:$0xff]  ;;  %v4271_v43 = vadd.f32 %v594_v34, %v593_v61 }
 0x173   : > { %v981_v32 = vmul.f32 1.442695, %v929_v58  ;;  %v983_v28 = vmul.f32 1.442695, %v930_v9  ;;  %v890_v55 = vpop.xlane.xlu0 %889  ;;  %2603 = vpow2.f32 %v971_v51  ;;  %v4267_v15 = vpop.eup %2579  ;;  %v5672_v9 = vld [vmem:[#allocation48_spill] sm:$0xff] }
 0x174   : > { %v927_v59 = vsub.f32 %v5669_v20, %v890_v55  ;;  %v928_v45 = vsub.f32 %v5670_v54, %v890_v55  ;;  %v899_v17 = vpop.xlane.xlu1 %898  ;;  %v4273_v14 = vpop.eup %2581  ;;  %1012 = vadd.xlane.f32.xlu1 %v1011_v49  ;;  %v1008_v35 = vadd.f32 %v4267_v15, %v4261_v27 }
 0x175   : > { %2605 = vpow2.f32 %v981_v32  ;;  %v933_v58 = vsub.f32 %v5671_v50, %v899_v17  ;;  %v934_v8 = vsub.f32 %v5672_v9, %v899_v17  ;;  %v4277_v55 = vpop.eup %2583  ;;  %v600_v50 = vmul.f32 %v4175_v63, %v3128_v7 }
 0x176   : > { %2607 = vpow2.f32 %v983_v28  ;;  %v977_v51 = vmul.f32 1.442695, %v927_v59  ;;  %v979_v20 = vmul.f32 1.442695, %v928_v45  ;;  %v597_v17 = vmul.f32 %v4179_v1, %v3126_v6  ;;  %v5673_v28 = vld [vmem:[#allocation49_spill] sm:$0xff]  ;;  %1009 = vadd.xlane.f32.xlu0 %v1008_v35 }
 0x177   : > { %v989_v54 = vmul.f32 1.442695, %v933_v58  ;;  %v991_v52 = vmul.f32 1.442695, %v934_v8  ;;  %v896_v32 = vpop.xlane.xlu0 %895  ;;  %v4283_v61 = vpop.eup %2585  ;;  %v1017_v45 = vadd.f32 %v4277_v55, %v4273_v14  ;;  %v4291_v58 = vadd.f32 %v600_v50, %v599_v46 }
 0x178   : > { %2609 = vpow2.f32 %v977_v51  ;;  %v931_v34 = vsub.f32 %v3631_v4, %v896_v32  ;;  %v932_v59 = vsub.f32 %v5673_v28, %v896_v32  ;;  %v4289_v49 = vpop.eup %2587  ;;  %v598_v63 = vmul.f32 %v4182_v23, %v3128_v7 }
 0x179   : > { %2611 = vpow2.f32 %v979_v20  ;;  %5674 = vst [vmem:[#allocation9_spill] sm:$0xff] %v4291_v58  ;;  %v603_v1 = vmul.f32 %v4189_v29, %v3126_v6  ;;  %v4297_v9 = vpop.eup %2589  ;;  %1018 = vadd.xlane.f32.xlu1 %v1017_v45  ;;  %v5675_v20 = vld [vmem:[#allocation50_spill] sm:$0xff]  ;;  %v1014_v50 = vadd.f32 %v4289_v49, %v4283_v61 }
 0x17a   : > { %v905_v8 = vpop.xlane.xlu1 %904  ;;  %2613 = vpow2.f32 %v989_v54  ;;  %v985_v4 = vmul.f32 1.442695, %v931_v34  ;;  %v987_v51 = vmul.f32 1.442695, %v932_v59  ;;  %v4300_v32 = vpop.eup %2591  ;;  %v4305_v23 = vadd.f32 %v598_v63, %v597_v17 }
 0x17b   : > { %v937_v35 = vsub.f32 %v3644_v31, %v905_v8  ;;  %2615 = vpow2.f32 %v991_v52  ;;  %v938_v46 = vsub.f32 %v5675_v20, %v905_v8  ;;  %v4307_v28 = vpop.eup %2593  ;;  %v1023_v34 = vadd.f32 %v4300_v32, %v4297_v9  ;;  %1015 = vadd.xlane.f32.xlu0 %v1014_v50  ;;  %v5678_v20 = vld [vmem:[#allocation52_spill] sm:$0xff] }
 0x17c   : > { %5676 = vst [vmem:[#allocation10_spill] sm:$0xff] %v4305_v23  ;;  %2617 = vpow2.f32 %v985_v4  ;;  %v902_v54 = vpop.xlane.xlu0 %901  ;;  %v604_v31 = vmul.f32 %v4193_v60, %v3128_v7  ;;  %v4313_v59 = vpop.eup %2595  ;;  %v5677_v4 = vld [vmem:[#allocation51_spill] sm:$0xff] }
 0x17d   : > { %v997_v29 = vmul.f32 1.442695, %v937_v35  ;;  %2619 = vpow2.f32 %v987_v51  ;;  %v999_v52 = vmul.f32 1.442695, %v938_v46  ;;  %v935_v45 = vsub.f32 %v3660_v12, %v902_v54  ;;  %v4317_v63 = vpop.eup %2597  ;;  %1024 = vadd.xlane.f32.xlu1 %v1023_v34 }
 0x17e   : > { %v936_v17 = vsub.f32 %v3662_v30, %v902_v54  ;;  %v1337_v8 = vpop.xlane.xlu1 %1336  ;;  %v1020_v60 = vadd.f32 %v4313_v59, %v4307_v28  ;;  %v4323_v11 = vpop.eup %2599  ;;  %v4325_v46 = vadd.f32 %v604_v31, %v603_v1  ;;  %v601_v34 = vmul.f32 %v4199_v16, %v3126_v6 }
 0x17f   : > { %2621 = vpow2.f32 %v997_v29  ;;  %v1383_v35 = vsub.f32 %v5677_v4, %v1337_v8  ;;  %v1384_v23 = vsub.f32 %v5678_v20, %v1337_v8  ;;  %v993_v51 = vmul.f32 1.442695, %v935_v45  ;;  %v4327_v30 = vpop.eup %2601 }
 0x180   : > { %2623 = vpow2.f32 %v999_v52  ;;  %v995_v12 = vmul.f32 1.442695, %v936_v17  ;;  %5679 = vst [vmem:[#allocation13_spill] sm:$0xff] %v4325_v46  ;;  %v1029_v29 = vadd.f32 %v4323_v11, %v4317_v63  ;;  %v4333_v8 = vpop.eup %2603  ;;  %v5680_v52 = vld [vmem:[#allocation53_spill] sm:$0xff]  ;;  %1021 = vadd.xlane.f32.xlu0 %v1020_v60  ;;  %v602_v1 = vmul.f32 %v4202_v22, %v3128_v7  ;;  %v5681_v22 = vld [vmem:[#allocation54_spill] sm:$0xff] }
 0x181   : > { %v1415_v50 = vmul.f32 1.442695, %v1383_v35  ;;  %v908_v54 = vpop.xlane.xlu0 %907  ;;  %2625 = vpow2.f32 %v993_v51  ;;  %v1026_v35 = vadd.f32 %v4333_v8, %v4327_v30  ;;  %v607_v16 = vmul.f32 %v4211_v42, %v3126_v6 }
 0x182   : > { %v939_v4 = vsub.f32 %v3687_v62, %v908_v54  ;;  %v940_v45 = vsub.f32 %v5680_v52, %v908_v54  ;;  %v4339_v31 = vpop.eup %2605  ;;  %2627 = vpow2.f32 %v995_v12  ;;  %1030 = vadd.xlane.f32.xlu1 %v1029_v29  ;;  %v608_v62 = vmul.f32 %v4217_v44, %v3128_v7  ;;  %v5682_v12 = vld [vmem:[#allocation55_spill] sm:$0xff] }
 0x183   : > { %v1343_v17 = vpop.xlane.xlu1 %1342  ;;  %v4347_v20 = vpop.eup %2607  ;;  %v1417_v60 = vmul.f32 1.442695, %v1384_v23  ;;  %2629 = vpow2.f32 %v1415_v50  ;;  %v4353_v26 = vadd.f32 %v602_v1, %v601_v34 }
 0x184   : > { %v1001_v51 = vmul.f32 1.442695, %v939_v4  ;;  %v1003_v54 = vmul.f32 1.442695, %v940_v45  ;;  %v1387_v52 = vsub.f32 %v5681_v22, %v1343_v17  ;;  %v1388_v46 = vsub.f32 %v5682_v12, %v1343_v17  ;;  %1027 = vadd.xlane.f32.xlu0 %v1026_v35 }
 0x185   : > { %v1035_v29 = vadd.f32 %v4347_v20, %v4339_v31  ;;  %v4355_v58 = vpop.eup %2609  ;;  %v4359_v44 = vadd.f32 %v608_v62, %v607_v16  ;;  %v605_v45 = vmul.f32 %v4220_v24, %v3126_v6  ;;  %v606_v62 = vmul.f32 %v4227_v57, %v3128_v7 }
 0x186   : > { %2631 = vpow2.f32 %v1001_v51  ;;  %v4357_v42 = vpop.xlane.xlu0 %1339  ;;  %v4361_v23 = vpop.eup %2611  ;;  %v1423_v4 = vmul.f32 1.442695, %v1387_v52  ;;  %v1425_v34 = vmul.f32 1.442695, %v1388_v46  ;;  %v5685_v51 = vld [vmem:[#allocation58_spill] sm:$0xff]  ;;  %v1053_v46 = vmul.f32 %v4231_v37, %v3126_v6 }
 0x187   : > { %5683 = vst [vmem:[#allocation14_spill] sm:$0xff] %v4357_v42  ;;  %5684 = vst [vmem:[#allocation11_spill] sm:$0xff] %v4359_v44  ;;  %2633 = vpow2.f32 %v1003_v54  ;;  %v1811_v50 = vpop.xlane.xlu1 %1810  ;;  %1036 = vadd.xlane.f32.xlu1 %v1035_v29  ;;  %v4365_v17 = vpop.eup %2613  ;;  %v1032_v35 = vadd.f32 %v4361_v23, %v4355_v58  ;;  %v4385_v57 = vadd.f32 %v606_v62, %v605_v45 }
 0x188   : > { %v1857_v1 = vsub.f32 %v3724_v13, %v1811_v50  ;;  %v1858_v22 = vsub.f32 %v5685_v51, %v1811_v50  ;;  %v4371_v16 = vpop.eup %2615  ;;  %2635 = vpow2.f32 %v1417_v60  ;;  %v5686_v50 = vld [vmem:[#allocation59_spill] sm:$0xff]  ;;  %v5687_v51 = vld [vmem:[#allocation60_spill] sm:$0xff]  ;;  %v1054_v37 = vmul.f32 %v4237_v19, %v3128_v7 }
 0x189   : > { %v4375_v54 = vpop.eup %2617  ;;  %1033 = vadd.xlane.f32.xlu0 %v1032_v35  ;;  %v1041_v13 = vadd.f32 %v4371_v16, %v4365_v17  ;;  %2637 = vpow2.f32 %v1423_v4  ;;  %5688 = vst [vmem:[#allocation12_spill] sm:$0xff] %v4385_v57  ;;  %v609_v4 = vmul.f32 %v4240_v41, %v3126_v6 }
 0x18a   : > { %v1889_v52 = vmul.f32 1.442695, %v1857_v1  ;;  %v1891_v24 = vmul.f32 1.442695, %v1858_v22  ;;  %v1346_v12 = vpop.xlane.xlu0 %1345  ;;  %v4381_v29 = vpop.eup %2619  ;;  %2639 = vpow2.f32 %v1425_v34  ;;  %v5689_v34 = vld [vmem:[#allocation61_spill] sm:$0xff] }
 0x18b   : > { %v1389_v60 = vsub.f32 %v5686_v50, %v1346_v12  ;;  %v1390_v42 = vsub.f32 %v5687_v51, %v1346_v12  ;;  %1042 = vadd.xlane.f32.xlu1 %v1041_v13  ;;  %v1038_v22 = vadd.f32 %v4381_v29, %v4375_v54  ;;  %v4401_v51 = vadd.f32 %v1054_v37, %v1053_v46  ;;  %v5692_v37 = vld [vmem:[#allocation63_spill] sm:$0xff] }
 0x18c   : > { %v4387_v44 = vpop.eup %2621  ;;  %2641 = vpow2.f32 %v1889_v52  ;;  %v610_v52 = vmul.f32 %v4247_v3, %v3128_v7 }
 0x18d   : > { %v1349_v1 = vpop.xlane.xlu1 %1348  ;;  %v4395_v35 = vpop.eup %2623  ;;  %v1427_v12 = vmul.f32 1.442695, %v1389_v60  ;;  %v1429_v45 = vmul.f32 1.442695, %v1390_v42  ;;  %2643 = vpow2.f32 %v1891_v24  ;;  %1039 = vadd.xlane.f32.xlu0 %v1038_v22  ;;  %5690 = vst [vmem:[#allocation15_spill] sm:$0xff] %v4401_v51 }
 0x18e   : > { %v1391_v62 = vsub.f32 %v3756_v39, %v1349_v1  ;;  %v1392_v50 = vsub.f32 %v5689_v34, %v1349_v1  ;;  %v1047_v13 = vadd.f32 %v4395_v35, %v4387_v44  ;;  %v4403_v19 = vpop.eup %2625  ;;  %v1057_v39 = vmul.f32 %v4251_v36, %v3126_v6  ;;  %v5691_v1 = vld [vmem:[#allocation62_spill] sm:$0xff] }
 0x18f   : > { %2645 = vpow2.f32 %v1427_v12  ;;  %v1814_v57 = vpop.xlane.xlu0 %1813  ;;  %v4409_v42 = vpop.eup %2627 }
 0x190   : > { %v1431_v41 = vmul.f32 1.442695, %v1391_v62  ;;  %2647 = vpow2.f32 %v1429_v45  ;;  %v1433_v24 = vmul.f32 1.442695, %v1392_v50  ;;  %v1859_v60 = vsub.f32 %v3772_v10, %v1814_v57  ;;  %1048 = vadd.xlane.f32.xlu1 %v1047_v13  ;;  %v5693_v62 = vld [vmem:[#allocation64_spill] sm:$0xff]  ;;  %v4417_v51 = vpop.eup %2629 }
 0x191   : > { %v1860_v46 = vsub.f32 %v5691_v1, %v1814_v57  ;;  %v1352_v22 = vpop.xlane.xlu1 %1351  ;;  %v1044_v3 = vadd.f32 %v4409_v42, %v4403_v19  ;;  %v4419_v50 = vadd.f32 %v610_v52, %v609_v4  ;;  %v1056_v52 = vmul.f32 %v4267_v15, %v3128_v7 }
 0x192   : > { %2649 = vpow2.f32 %v1431_v41  ;;  %v1393_v12 = vsub.f32 %v5692_v37, %v1352_v22  ;;  %v1394_v34 = vsub.f32 %v5693_v62, %v1352_v22  ;;  %v1893_v36 = vmul.f32 1.442695, %v1859_v60 }
 0x193   : > { %2651 = vpow2.f32 %v1433_v24  ;;  %v1895_v45 = vmul.f32 1.442695, %v1860_v46  ;;  %v4421_v10 = vpop.eup %2631  ;;  %1045 = vadd.xlane.f32.xlu0 %v1044_v3  ;;  %v1058_v41 = vmul.f32 %v4257_v25, %v3128_v7  ;;  %v1055_v22 = vmul.f32 %v4261_v27, %v3126_v6  ;;  %v5694_v24 = vld [vmem:[#allocation65_spill] sm:$0xff]  ;;  %v5695_v46 = vld [vmem:[#allocation66_spill] sm:$0xff] }
 0x194   : > { %v1435_v57 = vmul.f32 1.442695, %v1393_v12  ;;  %v1437_v1 = vmul.f32 1.442695, %v1394_v34  ;;  %v1817_v13 = vpop.xlane.xlu0 %1816  ;;  %v4427_v37 = vpop.eup %2633  ;;  %2653 = vpow2.f32 %v1893_v36  ;;  %612 = vadd.xlane.f32.xlu1 %v4125_v48  ;;  %v5696_v48 = vld [vmem:[#allocation67_spill] sm:$0xff] }
 0x195   : > { %v1861_v60 = vsub.f32 %v5694_v24, %v1817_v13  ;;  %v1862_v4 = vsub.f32 %v5695_v46, %v1817_v13  ;;  %2655 = vpow2.f32 %v1895_v45  ;;  %v1050_v25 = vadd.f32 %v4427_v37, %v4421_v10  ;;  %v4438_v27 = vpop.eup %2635 }
 0x196   : > { %v1355_v12 = vpop.xlane.xlu1 %1354  ;;  %v4436_v62 = vadd.f32 %v1058_v41, %v1057_v39  ;;  %v1061_v13 = vmul.f32 %v4273_v14, %v3126_v6  ;;  %2657 = vpow2.f32 %v1435_v57  ;;  %v4444_v15 = vadd.f32 %v1056_v52, %v1055_v22  ;;  %v4448_v39 = vpop.eup %2637 }
 0x197   : > { %v1897_v34 = vmul.f32 1.442695, %v1861_v60  ;;  %v1899_v3 = vmul.f32 1.442695, %v1862_v4  ;;  %v1395_v36 = vsub.f32 %v3812_v18, %v1355_v12  ;;  %v1396_v24 = vsub.f32 %v5696_v48, %v1355_v12  ;;  %1051 = vadd.xlane.f32.xlu0 %v1050_v25  ;;  %v4455_v57 = vpop.eup %2639  ;;  %v5698_v12 = vld [vmem:[#allocation69_spill] sm:$0xff]  ;;  %v5699_v25 = vld [vmem:[#allocation70_spill] sm:$0xff] }
 0x198   : > { %v1062_v45 = vmul.f32 %v4277_v55, %v3128_v7  ;;  %2659 = vpow2.f32 %v1437_v1  ;;  %618 = vadd.xlane.f32.xlu1 %v4136_v56  ;;  %v1059_v18 = vmul.f32 %v4283_v61, %v3126_v6  ;;  %v1060_v14 = vmul.f32 %v4289_v49, %v3128_v7  ;;  %v5697_v55 = vld [vmem:[#allocation68_spill] sm:$0xff] }
 0x199   : > { %v1439_v41 = vmul.f32 1.442695, %v1395_v36  ;;  %v1820_v60 = vpop.xlane.xlu0 %1819  ;;  %2661 = vpow2.f32 %v1897_v34  ;;  %v1441_v22 = vmul.f32 1.442695, %v1396_v24  ;;  %v4459_v1 = vpop.eup %2641 }
 0x19a   : > { %v1863_v46 = vsub.f32 %v3828_v38, %v1820_v60  ;;  %v1864_v4 = vsub.f32 %v5697_v55, %v1820_v60  ;;  %v1358_v52 = vpop.xlane.xlu1 %1357  ;;  %2663 = vpow2.f32 %v1899_v3  ;;  %v4463_v61 = vadd.f32 %v1062_v45, %v1061_v13  ;;  %v4465_v48 = vpop.eup %2643 }
 0x19b   : > { %v1397_v56 = vsub.f32 %v5698_v12, %v1358_v52  ;;  %v1398_v36 = vsub.f32 %v5699_v25, %v1358_v52  ;;  %2665 = vpow2.f32 %v1439_v41  ;;  %615 = vadd.xlane.f32.xlu0 %v4138_v2  ;;  %v4468_v38 = vadd.f32 %v1060_v14, %v1059_v18  ;;  %v5701_v2 = vld [vmem:[#allocation72_spill] sm:$0xff] }
 0x19c   : > { %v1901_v49 = vmul.f32 1.442695, %v1863_v46  ;;  %v1903_v34 = vmul.f32 1.442695, %v1864_v4  ;;  %v4470_v24 = vpop.eup %2645  ;;  %2667 = vpow2.f32 %v1441_v22  ;;  %624 = vadd.xlane.f32.xlu1 %v4151_v33  ;;  %v1065_v3 = vmul.f32 %v4297_v9, %v3126_v6  ;;  %v5700_v46 = vld [vmem:[#allocation71_spill] sm:$0xff] }
 0x19d   : > { %v1066_v13 = vmul.f32 %v4300_v32, %v3128_v7  ;;  %v4477_v45 = vpop.eup %2647  ;;  %v1443_v41 = vmul.f32 1.442695, %v1397_v56  ;;  %v1063_v14 = vmul.f32 %v4307_v28, %v3126_v6  ;;  %v1445_v33 = vmul.f32 1.442695, %v1398_v36 }
 0x19e   : > { %v1823_v60 = vpop.xlane.xlu0 %1822  ;;  %2669 = vpow2.f32 %v1901_v49  ;;  %v1064_v9 = vmul.f32 %v4313_v59, %v3128_v7  ;;  %v1069_v28 = vmul.f32 %v4317_v63, %v3126_v6  ;;  %v5702_v49 = vld [vmem:[#allocation73_spill] sm:$0xff]  ;;  %v1070_v59 = vmul.f32 %v4323_v11, %v3128_v7 }
 0x19f   : > { %v1865_v55 = vsub.f32 %v5700_v46, %v1823_v60  ;;  %v1866_v18 = vsub.f32 %v5701_v2, %v1823_v60  ;;  %v4483_v22 = vpop.eup %2649  ;;  %v4485_v52 = vadd.f32 %v1066_v13, %v1065_v3  ;;  %2671 = vpow2.f32 %v1903_v34  ;;  %621 = vadd.xlane.f32.xlu0 %v4162_v5 }
 0x1a0   : > { %v1361_v4 = vpop.xlane.xlu1 %1360  ;;  %v4489_v32 = vpop.eup %2651  ;;  %630 = vadd.xlane.f32.xlu1 %v4187_v47  ;;  %v4497_v60 = vadd.f32 %v1064_v9, %v1063_v14  ;;  %2673 = vpow2.f32 %v1443_v41  ;;  %v1067_v5 = vmul.f32 %v4327_v30, %v3126_v6  ;;  %v1068_v63 = vmul.f32 %v4333_v8, %v3128_v7 }
 0x1a1   : > { %v1905_v12 = vmul.f32 1.442695, %v1865_v55  ;;  %v1399_v56 = vsub.f32 %v3868_v53, %v1361_v4  ;;  %v1907_v25 = vmul.f32 1.442695, %v1866_v18  ;;  %v1400_v36 = vsub.f32 %v5702_v49, %v1361_v4  ;;  %v4501_v3 = vpop.eup %2653  ;;  %v5705_v55 = vld [vmem:[#allocation74_spill] sm:$0xff]  ;;  %v5706_v18 = vld [vmem:[#allocation75_spill] sm:$0xff] }
 0x1a2   : > { %5703 = vst [vmem:[#allocation16_spill] sm:$0xff] %v4501_v3  ;;  %v4507_v13 = vpop.eup %2655  ;;  %2675 = vpow2.f32 %v1445_v33  ;;  %v4513_v14 = vadd.f32 %v1070_v59, %v1069_v28  ;;  %v5707_v4 = vld [vmem:[#allocation76_spill] sm:$0xff]  ;;  %v4519_v33 = vadd.f32 %v1068_v63, %v1067_v5  ;;  %v5708_v49 = vld [vmem:[#allocation77_spill] sm:$0xff] }
 0x1a3   : > { %v1447_v34 = vmul.f32 1.442695, %v1399_v56  ;;  %v1826_v53 = vpop.xlane.xlu0 %1825  ;;  %5704 = vst [vmem:[#allocation17_spill] sm:$0xff] %v4507_v13  ;;  %v1449_v47 = vmul.f32 1.442695, %v1400_v36  ;;  %2677 = vpow2.f32 %v1905_v12  ;;  %627 = vadd.xlane.f32.xlu0 %v4207_v21  ;;  %v4515_v30 = vpop.eup %2657  ;;  %v1073_v56 = vmul.f32 %v4339_v31, %v3126_v6 }
 0x1a4   : > { %v1867_v46 = vsub.f32 %v3884_v40, %v1826_v53  ;;  %v1868_v2 = vsub.f32 %v5705_v55, %v1826_v53  ;;  %v1364_v11 = vpop.xlane.xlu1 %1363  ;;  %2679 = vpow2.f32 %v1907_v25  ;;  %636 = vadd.xlane.f32.xlu1 %v4235_v0  ;;  %v1074_v21 = vmul.f32 %v4347_v20, %v3128_v7  ;;  %v5710_v55 = vld [vmem:[#allocation9_spill] sm:$0xff] }
 0x1a5   : > { %v1401_v41 = vsub.f32 %v5706_v18, %v1364_v11  ;;  %v1402_v9 = vsub.f32 %v5707_v4, %v1364_v11  ;;  %v4521_v40 = vpop.eup %2659  ;;  %2681 = vpow2.f32 %v1447_v34  ;;  %v1071_v0 = vmul.f32 %v4355_v58, %v3126_v6  ;;  %v5709_v34 = vld [vmem:[#allocation78_spill] sm:$0xff]  ;;  %v5711_v18 = vld [vmem:[#allocation79_spill] sm:$0xff] }
 0x1a6   : > { %v1909_v8 = vmul.f32 1.442695, %v1867_v46  ;;  %v4527_v28 = vpop.eup %2661  ;;  %2683 = vpow2.f32 %v1449_v47  ;;  %v1911_v25 = vmul.f32 1.442695, %v1868_v2  ;;  %v4536_v31 = vadd.f32 %v1074_v21, %v1073_v56 }
 0x1a7   : > { %v1829_v12 = vpop.xlane.xlu0 %1828  ;;  %v4532_v59 = vpop.eup %2663  ;;  %v1451_v53 = vmul.f32 1.442695, %v1401_v41  ;;  %633 = vadd.xlane.f32.xlu0 %v4271_v43  ;;  %v1072_v20 = vmul.f32 %v4361_v23, %v3128_v7  ;;  %v1453_v46 = vmul.f32 1.442695, %v1402_v9  ;;  %v1075_v58 = vmul.f32 %v4375_v54, %v3126_v6  ;;  %v5712_v23 = vld [vmem:[#allocation80_spill] sm:$0xff] }
 0x1a8   : > { %v1869_v36 = vsub.f32 %v5708_v49, %v1829_v12  ;;  %v1870_v5 = vsub.f32 %v5709_v34, %v1829_v12  ;;  %v4540_v47 = vpop.eup %2665  ;;  %2685 = vpow2.f32 %v1909_v8  ;;  %642 = vadd.xlane.f32.xlu1 %v5710_v55  ;;  %v1076_v4 = vmul.f32 %v4381_v29, %v3128_v7  ;;  %v5714_v49 = vld [vmem:[#allocation81_spill] sm:$0xff]  ;;  %v5716_v29 = vld [vmem:[#allocation10_spill] sm:$0xff]  ;;  %v5719_v55 = vld [vmem:[#allocation83_spill] sm:$0xff] }
 0x1a9   : > { %v4545_v2 = vpop.eup %2667  ;;  %v4548_v43 = vadd.f32 %v1072_v20, %v1071_v0  ;;  %2687 = vpow2.f32 %v1911_v25  ;;  %v1077_v9 = vmul.f32 %v4365_v17, %v3126_v6  ;;  %v1078_v54 = vmul.f32 %v4371_v16, %v3128_v7  ;;  %v5715_v0 = vld [vmem:[#allocation82_spill] sm:$0xff] }
 0x1aa   : > { %v1367_v63 = vpop.xlane.xlu1 %1366  ;;  %v1913_v11 = vmul.f32 1.442695, %v1869_v36  ;;  %2689 = vpow2.f32 %v1451_v53  ;;  %v1915_v21 = vmul.f32 1.442695, %v1870_v5  ;;  %v4565_v17 = vadd.f32 %v1076_v4, %v1075_v58  ;;  %v5722_v4 = vld [vmem:[#allocation85_spill] sm:$0xff] }
 0x1ab   : > { %v1403_v41 = vsub.f32 %v5711_v18, %v1367_v63  ;;  %v1404_v12 = vsub.f32 %v5712_v23, %v1367_v63  ;;  %v4557_v56 = vpop.eup %2669  ;;  %639 = vadd.xlane.f32.xlu0 %v5716_v29  ;;  %2691 = vpow2.f32 %v1453_v46  ;;  %v5718_v63 = vld [vmem:[#allocation13_spill] sm:$0xff]  ;;  %v4568_v53 = vadd.f32 %v1078_v54, %v1077_v9 }
 0x1ac   : > { %5713 = vst [vmem:[#allocation18_spill] sm:$0xff] %v4557_v56  ;;  %v4562_v25 = vpop.eup %2671  ;;  %648 = vadd.xlane.f32.xlu1 %v5718_v63  ;;  %2693 = vpow2.f32 %v1913_v11  ;;  %v1081_v29 = vmul.f32 %v4387_v44, %v3126_v6  ;;  %v1082_v46 = vmul.f32 %v4395_v35, %v3128_v7  ;;  %v1079_v35 = vmul.f32 %v4403_v19, %v3126_v6 }
 0x1ad   : > { %v1832_v8 = vpop.xlane.xlu0 %1831  ;;  %5717 = vst [vmem:[#allocation19_spill] sm:$0xff] %v4562_v25  ;;  %v1455_v16 = vmul.f32 1.442695, %v1403_v41  ;;  %5720 = vst [vmem:[#allocation20_spill] sm:$0xff] %v4568_v53  ;;  %v4570_v5 = vpop.eup %2673  ;;  %v1457_v23 = vmul.f32 1.442695, %v1404_v12  ;;  %2695 = vpow2.f32 %v1915_v21  ;;  %v1080_v21 = vmul.f32 %v4409_v42, %v3128_v7 }
 0x1ae   : > { %v1871_v36 = vsub.f32 %v5714_v49, %v1832_v8  ;;  %v1872_v34 = vsub.f32 %v5715_v0, %v1832_v8  ;;  %v1370_v20 = vpop.xlane.xlu1 %1369  ;;  %v5721_v8 = vld [vmem:[#allocation84_spill] sm:$0xff]  ;;  %v5723_v12 = vld [vmem:[#allocation86_spill] sm:$0xff]  ;;  %v4585_v44 = vadd.f32 %v1082_v46, %v1081_v29 }
 0x1af   : > { %v1405_v18 = vsub.f32 %v5719_v55, %v1370_v20  ;;  %v1406_v49 = vsub.f32 %v5721_v8, %v1370_v20  ;;  %v4577_v58 = vpop.eup %2675  ;;  %645 = vadd.xlane.f32.xlu0 %v4353_v26  ;;  %v5724_v55 = vld [vmem:[#allocation11_spill] sm:$0xff]  ;;  %2697 = vpow2.f32 %v1455_v16  ;;  %v4597_v29 = vadd.f32 %v1080_v21, %v1079_v35  ;;  %v5729_v42 = vld [vmem:[#allocation12_spill] sm:$0xff] }
 0x1b0   : > { %v1917_v11 = vmul.f32 1.442695, %v1871_v36  ;;  %v1919_v41 = vmul.f32 1.442695, %v1872_v34  ;;  %v4581_v54 = vpop.eup %2677  ;;  %654 = vadd.xlane.f32.xlu1 %v5724_v55  ;;  %5725 = vst [vmem:[#allocation21_spill] sm:$0xff] %v4585_v44  ;;  %v5726_v26 = vld [vmem:[#allocation87_spill] sm:$0xff]  ;;  %2699 = vpow2.f32 %v1457_v23  ;;  %v1083_v16 = vmul.f32 %v4421_v10, %v3126_v6 }
 0x1b1   : > { %v1835_v0 = vpop.xlane.xlu0 %1834  ;;  %v4591_v36 = vpop.eup %2679  ;;  %v1459_v34 = vmul.f32 1.442695, %v1405_v18  ;;  %5728 = vst [vmem:[#allocation22_spill] sm:$0xff] %v4597_v29  ;;  %v1084_v18 = vmul.f32 %v4427_v37, %v3128_v7  ;;  %v5735_v37 = vld [vmem:[#allocation92_spill] sm:$0xff] }
 0x1b2   : > { %v1873_v9 = vsub.f32 %v5722_v4, %v1835_v0  ;;  %v1874_v20 = vsub.f32 %v5723_v12, %v1835_v0  ;;  %v4594_v4 = vpop.eup %2681  ;;  %v1461_v0 = vmul.f32 1.442695, %v1406_v49  ;;  %v5727_v12 = vld [vmem:[#allocation88_spill] sm:$0xff]  ;;  %2701 = vpow2.f32 %v1917_v11  ;;  %v5730_v49 = vld [vmem:[#allocation89_spill] sm:$0xff] }
 0x1b3   : > { %v4599_v46 = vpop.eup %2683  ;;  %651 = vadd.xlane.f32.xlu0 %v5729_v42  ;;  %2703 = vpow2.f32 %v1919_v41  ;;  %v5734_v42 = vld [vmem:[#allocation91_spill] sm:$0xff]  ;;  %v4612_v53 = vadd.f32 %v1084_v18, %v1083_v16 }
 0x1b4   : > { %v1373_v63 = vpop.xlane.xlu1 %1372  ;;  %v1921_v19 = vmul.f32 1.442695, %v1873_v9  ;;  %v1923_v23 = vmul.f32 1.442695, %v1874_v20  ;;  %2705 = vpow2.f32 %v1459_v34 }
 0x1b5   : > { %v1407_v8 = vsub.f32 %v5726_v26, %v1373_v63  ;;  %v1408_v55 = vsub.f32 %v5727_v12, %v1373_v63  ;;  %v5731_v63 = vld [vmem:[#allocation90_spill] sm:$0xff]  ;;  %v5732_v12 = vld [vmem:[#allocation15_spill] sm:$0xff]  ;;  %v4609_v11 = vpop.eup %2685  ;;  %2707 = vpow2.f32 %v1461_v0 }
 0x1b6   : > { %1086 = vadd.xlane.f32.xlu1 %v5732_v12  ;;  %5733 = vst [vmem:[#allocation23_spill] sm:$0xff] %v4609_v11  ;;  %v4615_v20 = vpop.eup %2687  ;;  %2709 = vpow2.f32 %v1921_v19 }
 0x1b7   : > { %v1838_v44 = vpop.xlane.xlu0 %1837  ;;  %v1463_v9 = vmul.f32 1.442695, %v1407_v8  ;;  %v1465_v10 = vmul.f32 1.442695, %v1408_v55  ;;  %5736 = vst [vmem:[#allocation24_spill] sm:$0xff] %v4615_v20  ;;  %657 = vadd.xlane.f32.xlu0 %v4419_v50  ;;  %2711 = vpow2.f32 %v1923_v23  ;;  %v5737_v8 = vld [vmem:[#allocation93_spill] sm:$0xff] }
 0x1b8   : > { %v1875_v26 = vsub.f32 %v5730_v49, %v1838_v44  ;;  %v1876_v35 = vsub.f32 %v5731_v63, %v1838_v44  ;;  %v1376_v21 = vpop.xlane.xlu1 %1375  ;;  %v4618_v63 = vpop.eup %2689 }
 0x1b9   : > { %v1409_v29 = vsub.f32 %v5734_v42, %v1376_v21  ;;  %v1410_v41 = vsub.f32 %v5735_v37, %v1376_v21  ;;  %v5738_v42 = vld [vmem:[#allocation94_spill] sm:$0xff]  ;;  %v4623_v0 = vpop.eup %2691  ;;  %2713 = vpow2.f32 %v1463_v9  ;;  %v1533_v9 = vmul.f32 %v4470_v24, %v3126_v6 }
 0x1ba   : > { %v1925_v49 = vmul.f32 1.442695, %v1875_v26  ;;  %v1927_v34 = vmul.f32 1.442695, %v1876_v35  ;;  %1092 = vadd.xlane.f32.xlu1 %v4436_v62  ;;  %v4625_v18 = vpop.eup %2693  ;;  %2715 = vpow2.f32 %v1465_v10  ;;  %v1528_v35 = vmul.f32 %v4438_v27, %v3128_v7 }
 0x1bb   : > { %v1841_v44 = vpop.xlane.xlu0 %1840  ;;  %v1467_v55 = vmul.f32 1.442695, %v1409_v29  ;;  %v1469_v19 = vmul.f32 1.442695, %v1410_v41  ;;  %1089 = vadd.xlane.f32.xlu0 %v4444_v15  ;;  %v4628_v23 = vpop.eup %2695  ;;  %v1527_v29 = vmul.f32 %v4417_v51, %v3126_v6  ;;  %v1531_v15 = vmul.f32 %v4448_v39, %v3126_v6 }
 0x1bc   : > { %v1877_v12 = vsub.f32 %v5737_v8, %v1841_v44  ;;  %v1878_v16 = vsub.f32 %v5738_v42, %v1841_v44  ;;  %2717 = vpow2.f32 %v1925_v49  ;;  %v4631_v62 = vpop.eup %2697  ;;  %v1534_v41 = vmul.f32 %v4477_v45, %v3128_v7 }
 0x1bd   : > { %2719 = vpow2.f32 %v1927_v34  ;;  %v4637_v21 = vpop.eup %2699  ;;  %v4649_v37 = vadd.f32 %v1528_v35, %v1527_v29  ;;  %v2001_v44 = vmul.f32 %v4459_v1, %v3126_v6  ;;  %v2002_v34 = vmul.f32 %v4465_v48, %v3128_v7 }
 0x1be   : > { %v1929_v50 = vmul.f32 1.442695, %v1877_v12  ;;  %v1931_v26 = vmul.f32 1.442695, %v1878_v16  ;;  %1098 = vadd.xlane.f32.xlu1 %v4463_v61  ;;  %2721 = vpow2.f32 %v1467_v55  ;;  %v1532_v61 = vmul.f32 %v4455_v57, %v3128_v7 }
 0x1bf   : > { %2723 = vpow2.f32 %v1469_v19  ;;  %1095 = vadd.xlane.f32.xlu0 %v4468_v38  ;;  %v4646_v10 = vpop.eup %2701  ;;  %5739 = vst [vmem:[#allocation25_spill] sm:$0xff] %v4649_v37  ;;  %v1535_v8 = vmul.f32 %v4483_v22, %v3126_v6  ;;  %v1536_v42 = vmul.f32 %v4489_v32, %v3128_v7  ;;  %v2003_v16 = vmul.f32 %v4501_v3, %v3126_v6 }
 0x1c0   : > { %2725 = vpow2.f32 %v1929_v50  ;;  %v4653_v38 = vpop.eup %2703  ;;  %v4655_v49 = vadd.f32 %v1532_v61, %v1531_v15  ;;  %v4674_v19 = vadd.f32 %v2002_v34, %v2001_v44  ;;  %v2004_v50 = vmul.f32 %v4507_v13, %v3128_v7  ;;  %v5743_v15 = vld [vmem:[#allocation96_spill] sm:$0xff]  ;;  %v5744_v61 = vld [vmem:[#allocation95_spill] sm:$0xff] }
 0x1c1   : > { %2727 = vpow2.f32 %v1931_v26  ;;  %v4663_v12 = vpop.eup %2705  ;;  %v2005_v26 = vmul.f32 %v4527_v28, %v3126_v6  ;;  %v2006_v29 = vmul.f32 %v4532_v59, %v3128_v7  ;;  %v1538_v44 = vmul.f32 %v4521_v40, %v3128_v7 }
 0x1c2   : > { %1104 = vadd.xlane.f32.xlu1 %v4485_v52  ;;  %5740 = vst [vmem:[#allocation28_spill] sm:$0xff] %v4655_v49  ;;  %v4665_v52 = vadd.f32 %v1534_v41, %v1533_v9  ;;  %v4671_v55 = vpop.eup %2707  ;;  %5742 = vst [vmem:[#allocation26_spill] sm:$0xff] %v4674_v19  ;;  %v1377_v9 = vmax.f32 %v5744_v61, %v5743_v15  ;;  %v4687_v41 = vadd.f32 %v1536_v42, %v1535_v8  ;;  %v5746_v19 = vld [vmem:[#allocation98_spill] sm:$0xff] }
 0x1c3   : > { %1101 = vadd.xlane.f32.xlu0 %v4497_v60  ;;  %v4682_v35 = vpop.eup %2709  ;;  %v1537_v60 = vmul.f32 %v4515_v30, %v3126_v6  ;;  %v4697_v37 = vadd.f32 %v2004_v50, %v2003_v16  ;;  %v4699_v13 = vadd.f32 %v2006_v29, %v2005_v26  ;;  %v1539_v15 = vmul.f32 %v4540_v47, %v3126_v6  ;;  %v5751_v50 = vld [vmem:[#allocation100_spill] sm:$0xff]  ;;  %v5752_v26 = vld [vmem:[#allocation99_spill] sm:$0xff]  ;;  %v5756_v61 = vld [vmem:[#allocation14_spill] sm:$0xff] }
 0x1c4   : > { %5741 = vst [vmem:[#allocation29_spill] sm:$0xff] %v4665_v52  ;;  %5745 = vst [vmem:[#allocation27_spill] sm:$0xff] %v4687_v41  ;;  %v4693_v34 = vpop.eup %2711  ;;  %v5747_v52 = vld [vmem:[#allocation97_spill] sm:$0xff]  ;;  %v2008_v41 = vmul.f32 %v4562_v25, %v3128_v7  ;;  %v1842_v29 = vmax.f32 %v5752_v26, %v5751_v50  ;;  %v2011_v50 = vmul.f32 %v4609_v11, %v3126_v6  ;;  %v5757_v25 = vld [vmem:[#allocation56_spill] sm:$0xff] }
 0x1c5   : > { %v1380_v49 = vmax.f32 %v5747_v52, %v5746_v19  ;;  %5748 = vst [vmem:[#allocation30_spill] sm:$0xff] %v4697_v37  ;;  %5749 = vst [vmem:[#allocation31_spill] sm:$0xff] %v4699_v13  ;;  %v4705_v42 = vadd.f32 %v1538_v44, %v1537_v60  ;;  %v1540_v19 = vmul.f32 %v4545_v2, %v3128_v7 }
 0x1c6   : > { %1110 = vadd.xlane.f32.xlu1 %v4513_v14  ;;  %v2007_v14 = vmul.f32 %v4557_v56, %v3126_v6  ;;  %v4703_v8 = vpop.eup %2713  ;;  %v2009_v60 = vmul.f32 %v4581_v54, %v3126_v6  ;;  %v2010_v44 = vmul.f32 %v4591_v36, %v3128_v7  ;;  %v1385_v56 = vsub.f32 %v5757_v25, %v5756_v61 }
 0x1c7   : > { %5750 = vst [vmem:[#allocation32_spill] sm:$0xff] %v4705_v42  ;;  %v4713_v16 = vpop.eup %2715  ;;  %1107 = vadd.xlane.f32.xlu0 %v4519_v33  ;;  %v1541_v42 = vmul.f32 %v4570_v5, %v3126_v6  ;;  %v4729_v52 = vadd.f32 %v1540_v19, %v1539_v15  ;;  %v1542_v33 = vmul.f32 %v4577_v58, %v3128_v7 }
 0x1c8   : > { %v4727_v37 = vadd.f32 %v2008_v41, %v2007_v14  ;;  %v4739_v3 = vadd.f32 %v2010_v44, %v2009_v60  ;;  %v1543_v19 = vmul.f32 %v4594_v4, %v3126_v6  ;;  %v1544_v14 = vmul.f32 %v4599_v46, %v3128_v7  ;;  %v5760_v44 = vld [vmem:[#allocation57_spill] sm:$0xff] }
 0x1c9   : > { %v4724_v13 = vpop.eup %2717  ;;  %5754 = vst [vmem:[#allocation34_spill] sm:$0xff] %v4729_v52  ;;  %v4747_v41 = vadd.f32 %v1542_v33, %v1541_v42  ;;  %v2013_v52 = vmul.f32 %v4625_v18, %v3126_v6  ;;  %v2014_v25 = vmul.f32 %v4628_v23, %v3128_v7  ;;  %v1545_v42 = vmul.f32 %v4618_v63, %v3126_v6 }
 0x1ca   : > { %1116 = vadd.xlane.f32.xlu1 %v4536_v31  ;;  %5753 = vst [vmem:[#allocation33_spill] sm:$0xff] %v4727_v37  ;;  %v4735_v26 = vpop.eup %2719  ;;  %5758 = vst [vmem:[#allocation36_spill] sm:$0xff] %v4739_v3  ;;  %v2012_v31 = vmul.f32 %v4615_v20, %v3128_v7  ;;  %v1386_v3 = vsub.f32 %v5760_v44, %v5756_v61  ;;  %v1546_v33 = vmul.f32 %v4623_v0, %v3128_v7 }
 0x1cb   : > { %5755 = vst [vmem:[#allocation35_spill] sm:$0xff] %v4735_v26  ;;  %v4745_v15 = vpop.eup %2721  ;;  %5759 = vst [vmem:[#allocation37_spill] sm:$0xff] %v4747_v41  ;;  %1113 = vadd.xlane.f32.xlu0 %v4548_v43  ;;  %v4768_v20 = vadd.f32 %v1544_v14, %v1543_v19  ;;  %v4770_v11 = vadd.f32 %v2014_v25, %v2013_v52  ;;  %v2015_v61 = vmul.f32 %v4646_v10, %v3126_v6 }
 0x1cc   : > { %v4755_v60 = vpop.eup %2723  ;;  %v4760_v37 = vadd.f32 %v2012_v31, %v2011_v50  ;;  %v2016_v43 = vmul.f32 %v4653_v38, %v3128_v7  ;;  %v4778_v31 = vadd.f32 %v1546_v33, %v1545_v42  ;;  %v1547_v44 = vmul.f32 %v4631_v62, %v3126_v6 }
 0x1cd   : > { %v4766_v41 = vpop.eup %2725  ;;  %5763 = vst [vmem:[#allocation40_spill] sm:$0xff] %v4768_v20  ;;  %5764 = vst [vmem:[#allocation41_spill] sm:$0xff] %v4770_v11  ;;  %v2017_v52 = vmul.f32 %v4682_v35, %v3126_v6  ;;  %v2018_v14 = vmul.f32 %v4693_v34, %v3128_v7  ;;  %v1549_v25 = vmul.f32 %v4663_v12, %v3126_v6 }
 0x1ce   : > { %5761 = vst [vmem:[#allocation38_spill] sm:$0xff] %v4760_v37  ;;  %5762 = vst [vmem:[#allocation39_spill] sm:$0xff] %v4766_v41  ;;  %1378 = vmax.xlane.f32.xlu1 %v1377_v9  ;;  %v4776_v50 = vpop.eup %2727  ;;  %v1548_v9 = vmul.f32 %v4637_v21, %v3128_v7  ;;  %v4786_v19 = vadd.f32 %v2016_v43, %v2015_v61  ;;  %v1550_v42 = vmul.f32 %v4671_v55, %v3128_v7  ;;  %v5775_v37 = vld [vmem:[#allocation103_spill] sm:$0xff] }
 0x1cf   : > { %5765 = vst [vmem:[#allocation42_spill] sm:$0xff] %v4776_v50  ;;  %5766 = vst [vmem:[#allocation43_spill] sm:$0xff] %v4778_v31  ;;  %1119 = vadd.xlane.f32.xlu0 %v4565_v17  ;;  %v2019_v31 = vmul.f32 %v4724_v13, %v3126_v6  ;;  %v2020_v61 = vmul.f32 %v4735_v26, %v3128_v7  ;;  %v1551_v43 = vmul.f32 %v4703_v8, %v3126_v6  ;;  %v5777_v26 = vld [vmem:[#allocation106_spill] sm:$0xff] }
 0x1d0   : > { %5767 = vst [vmem:[#allocation44_spill] sm:$0xff] %v4786_v19  ;;  %v4795_v33 = vadd.f32 %v1548_v9, %v1547_v44  ;;  %v4803_v19 = vadd.f32 %v2018_v14, %v2017_v52  ;;  %v4805_v11 = vadd.f32 %v1550_v42, %v1549_v25  ;;  %v1552_v20 = vmul.f32 %v4713_v16, %v3128_v7  ;;  %v5772_v52 = vld [vmem:[#allocation102_spill] sm:$0xff]  ;;  %v5773_v14 = vld [vmem:[#allocation101_spill] sm:$0xff] }
 0x1d1   : > { %v2021_v17 = vmul.f32 %v4766_v41, %v3126_v6  ;;  %v4811_v44 = vadd.f32 %v2020_v61, %v2019_v31  ;;  %v2022_v9 = vmul.f32 %v4776_v50, %v3128_v7  ;;  %v1851_v25 = vmax.f32 %v5773_v14, %v5772_v52  ;;  %v5776_v41 = vld [vmem:[#allocation20_spill] sm:$0xff]  ;;  %v5778_v52 = vld [vmem:[#allocation105_spill] sm:$0xff] }
 0x1d2   : > { %5768 = vst [vmem:[#allocation45_spill] sm:$0xff] %v4795_v33  ;;  %1381 = vmax.xlane.f32.xlu1 %v1380_v49  ;;  %5769 = vst [vmem:[#allocation46_spill] sm:$0xff] %v4803_v19  ;;  %v1553_v33 = vmul.f32 %v4745_v15, %v3126_v6  ;;  %v1554_v49 = vmul.f32 %v4755_v60, %v3128_v7  ;;  %v4821_v42 = vadd.f32 %v1552_v20, %v1551_v43 }
 0x1d3   : > { %5770 = vst [vmem:[#allocation47_spill] sm:$0xff] %v4805_v11  ;;  %5771 = vst [vmem:[#allocation48_spill] sm:$0xff] %v4811_v44  ;;  %1843 = vmax.xlane.f32.xlu0 %v1842_v29  ;;  %v4823_v11 = vadd.f32 %v2022_v9, %v2021_v17  ;;  %v1419_v31 = vmul.f32 1.442695, %v1385_v56  ;;  %v1421_v61 = vmul.f32 1.442695, %v1386_v3  ;;  %v1848_v20 = vmax.f32 %v5778_v52, %v5777_v26 }
 0x1d4   : > { %v4825_v19 = vadd.f32 %v1554_v49, %v1553_v33  ;;  %v5774_v44 = vld [vmem:[#allocation104_spill] sm:$0xff]  ;;  %v5779_v29 = vld [vmem:[#allocation21_spill] sm:$0xff]  ;;  %v5781_v56 = vld [vmem:[#allocation107_spill] sm:$0xff]  ;;  %v1479_v3 = vadd.f32 %v4438_v27, %v4417_v51  ;;  %v1491_v51 = vadd.f32 %v4489_v32, %v4483_v22  ;;  %v1488_v22 = vadd.f32 %v4477_v45, %v4470_v24 }
 0x1d5   : > { %v1845_v50 = vmax.f32 %v5775_v37, %v5774_v44  ;;  %2729 = vpow2.f32 %v1419_v31  ;;  %v5780_v33 = vld [vmem:[#allocation108_spill] sm:$0xff]  ;;  %v5782_v49 = vld [vmem:[#allocation22_spill] sm:$0xff]  ;;  %v1503_v32 = vadd.f32 %v4599_v46, %v4594_v4  ;;  %v1500_v24 = vadd.f32 %v4577_v58, %v4570_v5  ;;  %v5785_v46 = vld [vmem:[#allocation17_spill] sm:$0xff] }
 0x1d6   : > { %1852 = vmax.xlane.f32.xlu1 %v1851_v25  ;;  %2731 = vpow2.f32 %v1421_v61  ;;  %v1854_v17 = vmax.f32 %v5781_v56, %v5780_v33  ;;  %v1959_v4 = vadd.f32 %v4532_v59, %v4527_v28  ;;  %v5784_v58 = vld [vmem:[#allocation16_spill] sm:$0xff]  ;;  %v1971_v59 = vadd.f32 %v4628_v23, %v4625_v18 }
 0x1d7   : > { %1846 = vmax.xlane.f32.xlu0 %v1845_v50  ;;  %v1485_v50 = vadd.f32 %v4455_v57, %v4448_v39  ;;  %v1497_v57 = vadd.f32 %v4545_v2, %v4540_v47  ;;  %v1953_v2 = vadd.f32 %v4465_v48, %v4459_v1  ;;  %v1965_v48 = vadd.f32 %v4591_v36, %v4581_v54 }
 0x1d8   : > { %v1509_v36 = vadd.f32 %v4637_v21, %v4631_v62  ;;  %v1512_v18 = vadd.f32 %v4671_v55, %v4663_v12  ;;  %v1515_v62 = vadd.f32 %v4713_v16, %v4703_v8  ;;  %v1518_v12 = vadd.f32 %v4755_v60, %v4745_v15  ;;  %v5791_v8 = vld [vmem:[#allocation35_spill] sm:$0xff] }
 0x1d9   : > { %v4832_v43 = vpop.xlane.xlu1 %532  ;;  %v1980_v16 = vadd.f32 %v5791_v8, %v4724_v13 }
 0x1da   : > { %1122 = vadd.xlane.f32.xlu1 %v5776_v41 }
 0x1db   : > { %1849 = vmax.xlane.f32.xlu0 %v1848_v20  ;;  %v4839_v9 = vpop.xlane.xlu0 %535 }
 0x1dd   : > { %v4841_v41 = vpop.xlane.xlu1 %538 }
 0x1de   : > { %1128 = vadd.xlane.f32.xlu1 %v5779_v29 }
 0x1df   : > { %1855 = vmax.xlane.f32.xlu0 %v1854_v17 }
 0x1e1   : > { %v4846_v25 = vpop.xlane.xlu1 %544  ;;  %v4848_v31 = vpop.xlane.xlu0 %541 }
 0x1e2   : > { %1480 = vadd.xlane.f32.xlu1 %v1479_v3  ;;  %v2730_v61 = vpop.eup %2729  ;;  %2733 = vrcp.f32 %v4846_v25  ;;  %v4968_v25 = vstv %s2402_s28  ;;  %s2908_s28 = sshll.u32 %s3003_s27, 4  ;;  %s2909_s28 = int_to_ptr.vmem [resolvable:$false] %s2908_s28 }
 0x1e3   : > { %1125 = vadd.xlane.f32.xlu0 %v5782_v49  ;;  %v2732_v20 = vpop.eup %2731  ;;  %v1529_v55 = vmul.f32 %v2730_v61, %v3126_v6  ;;  %p2911_p13 = scmp.lt.s32.totalorder %s2309_s18, %s2909_s28 }
 0x1e4   : > { %v1482_v39 = vadd.f32 %v2732_v20, %v2730_v61  ;;  %v5794_v61 = vld [vmem:[#allocation25_spill] sm:$0xff] }
 0x1e5   : > { %v4853_v27 = vpop.xlane.xlu1 %550  ;;  %v4855_v29 = vpop.xlane.xlu0 %547 }
 0x1e6   : > { %1486 = vadd.xlane.f32.xlu1 %v1485_v50  ;;  %5783 = vst [vmem:[#allocation49_spill] sm:$0xff] %v4855_v29  ;;  %v1494_v50 = vadd.f32 %v4521_v40, %v4515_v30  ;;  %v1506_v40 = vadd.f32 %v4623_v0, %v4618_v63  ;;  %v5786_v0 = vld [vmem:[#allocation18_spill] sm:$0xff] }
 0x1e7   : > { %1131 = vadd.xlane.f32.xlu0 %v4612_v53 }
 0x1e9   : > { %v4859_v17 = vpop.xlane.xlu1 %556  ;;  %v4861_v3 = vpop.xlane.xlu0 %553 }
 0x1ea   : > { %1492 = vadd.xlane.f32.xlu1 %v1491_v51  ;;  %v1956_v51 = vadd.f32 %v5785_v46, %v5784_v58  ;;  %v1530_v58 = vmul.f32 %v2732_v20, %v3128_v7 }
 0x1eb   : > { %1483 = vadd.xlane.f32.xlu0 %v1482_v39  ;;  %v5787_v39 = vld [vmem:[#allocation19_spill] sm:$0xff] }
 0x1ec   : > { %v1562_v46 = vadd.f32 %v1530_v58, %v1529_v55 }
 0x1ed   : > { %v4867_v53 = vpop.xlane.xlu1 %562 }
 0x1ee   : > { %1498 = vadd.xlane.f32.xlu1 %v1497_v57  ;;  %v1962_v57 = vadd.f32 %v5787_v39, %v5786_v0 }
 0x1ef   : > { %1489 = vadd.xlane.f32.xlu0 %v1488_v22  ;;  %v4871_v47 = vpop.xlane.xlu0 %559 }
 0x1f1   : > { %v4875_v49 = vpop.xlane.xlu1 %568 }
 0x1f2   : > { %1504 = vadd.xlane.f32.xlu1 %v1503_v32  ;;  %v5788_v32 = vld [vmem:[#allocation23_spill] sm:$0xff] }
 0x1f3   : > { %1495 = vadd.xlane.f32.xlu0 %v1494_v50  ;;  %v4879_v45 = vpop.xlane.xlu0 %565  ;;  %v5789_v50 = vld [vmem:[#allocation24_spill] sm:$0xff] }
 0x1f5   : > { %v4883_v30 = vpop.xlane.xlu1 %574 }
 0x1f6   : > { %1954 = vadd.xlane.f32.xlu1 %v1953_v2  ;;  %v1968_v2 = vadd.f32 %v5789_v50, %v5788_v32 }
 0x1f7   : > { %1501 = vadd.xlane.f32.xlu0 %v1500_v24  ;;  %v4887_v1 = vpop.xlane.xlu0 %571 }
 0x1f9   : > { %v4891_v5 = vpop.xlane.xlu1 %1006 }
 0x1fa   : > { %1960 = vadd.xlane.f32.xlu1 %v1959_v4  ;;  %v1974_v4 = vadd.f32 %v4653_v38, %v4646_v10 }
 0x1fb   : > { %1507 = vadd.xlane.f32.xlu0 %v1506_v40  ;;  %v4895_v28 = vpop.xlane.xlu0 %577 }
 0x1fd   : > { %v4899_v63 = vpop.xlane.xlu1 %1012 }
 0x1fe   : > { %1966 = vadd.xlane.f32.xlu1 %v1965_v48  ;;  %v1977_v48 = vadd.f32 %v4693_v34, %v4682_v35  ;;  %v5793_v35 = vld [vmem:[#allocation42_spill] sm:$0xff] }
 0x1ff   : > { %1957 = vadd.xlane.f32.xlu0 %v1956_v51  ;;  %v4903_v54 = vpop.xlane.xlu0 %1009 }
 0x202   : > { %1972 = vadd.xlane.f32.xlu1 %v1971_v59  ;;  %v1019_v22 = vpop.xlane.xlu1 %1018  ;;  %v5792_v59 = vld [vmem:[#allocation39_spill] sm:$0xff] }
 0x203   : > { %1963 = vadd.xlane.f32.xlu0 %v1962_v57  ;;  %v1983_v34 = vadd.f32 %v5793_v35, %v5792_v59  ;;  %2735 = vrcp.f32 %v1019_v22 }
 0x204   : > { %v4911_v23 = vpop.xlane.xlu0 %1015  ;;  %2737 = vrcp.f32 %v4853_v27 }
 0x206   : > { %1510 = vadd.xlane.f32.xlu1 %v1509_v36  ;;  %v1025_v24 = vpop.xlane.xlu1 %1024 }
 0x207   : > { %1969 = vadd.xlane.f32.xlu0 %v1968_v2  ;;  %2739 = vrcp.f32 %v1025_v24 }
 0x208   : > { %2741 = vrcp.f32 %v4859_v17 }
 0x209   : > { %v4917_v21 = vpop.xlane.xlu0 %1021 }
 0x20a   : > { %1513 = vadd.xlane.f32.xlu1 %v1512_v18  ;;  %5790 = vst [vmem:[#allocation50_spill] sm:$0xff] %v4917_v21 }
 0x20b   : > { %1975 = vadd.xlane.f32.xlu0 %v1974_v4  ;;  %v1031_v40 = vpop.xlane.xlu1 %1030 }
 0x20c   : > { %2743 = vrcp.f32 %v1031_v40 }
 0x20d   : > { %v1028_v10 = vpop.xlane.xlu0 %1027  ;;  %2745 = vrcp.f32 %v4861_v3 }
 0x20e   : > { %1516 = vadd.xlane.f32.xlu1 %v1515_v62  ;;  %2747 = vrcp.f32 %v4867_v53 }
 0x20f   : > { %1978 = vadd.xlane.f32.xlu0 %v1977_v48  ;;  %2749 = vrcp.f32 %v1028_v10 }
 0x210   : > { %v1037_v38 = vpop.xlane.xlu1 %1036 }
 0x211   : > { %2751 = vrcp.f32 %v1037_v38 }
 0x212   : > { %1519 = vadd.xlane.f32.xlu1 %v1518_v12  ;;  %v1034_v51 = vpop.xlane.xlu0 %1033  ;;  %2753 = vrcp.f32 %v4871_v47 }
 0x213   : > { %1981 = vadd.xlane.f32.xlu0 %v1980_v16  ;;  %2755 = vrcp.f32 %v1034_v51 }
 0x214   : > { %v4929_v0 = vpop.xlane.xlu1 %1042  ;;  %2757 = vrcp.f32 %v4879_v45 }
 0x216   : > { %1563 = vadd.xlane.f32.xlu1 %v1562_v46  ;;  %v1040_v15 = vpop.xlane.xlu0 %1039 }
 0x217   : > { %1984 = vadd.xlane.f32.xlu0 %v1983_v34  ;;  %v4974_v34 = vstv %s2407_s29  ;;  %2759 = vrcp.f32 %v1040_v15  ;;  %s2910_s29 = scalar_lea.vmem %s2909_s28, 32 }
 0x218   : > { %2761 = vrcp.f32 %v4875_v49  ;;  %p2912_p0 = scmp.lt.s32.totalorder %s2910_s29, %s2904_s26 }
 0x219   : > { %v4931_v60 = vpop.xlane.xlu1 %1048  ;;  %2763 = vrcp.f32 %v4929_v0 }
 0x21a   : > { %p2913_p1 = por %p2912_p0, %p2911_p13 }
 0x21b   : > { %1560 = vadd.xlane.f32.xlu0 %v5794_v61  ;;  %v2734_v61 = vpop.eup %2733  ;;  %2765 = vrcp.f32 %v4883_v30 }
 0x21c   : > { %v4934_v20 = vpop.xlane.xlu0 %1045  ;;  %p2914_p2 = pnand %p2913_p1, %p2907_p12 }
 0x21d   : > { %v4936_v39 = vpop.xlane.xlu1 %612 }
 0x220   : > { %v4938_v13 = vpop.xlane.xlu0 %1051 }
 0x221   : > { %v4940_v57 = vpop.xlane.xlu1 %618 }
 0x222   : > { %5795 = vst [vmem:[#allocation51_spill] sm:$0xff] %v4940_v57 }
 0x224   : > { %v4942_v36 = vpop.xlane.xlu0 %615 }
 0x225   : > { %v625_v32 = vpop.xlane.xlu1 %624 }
 0x226   : > { %v664_v22 = vmul.f32 %v4968_v25, %v625_v32 }
 0x228   : > { %v4944_v50 = vpop.xlane.xlu0 %621  ;;  %v685_v3 = vmul.f32 %v2734_v61, %v664_v22 }
 0x229   : > { %5796 = vst [vmem:[#allocation52_spill] sm:$0xff] %v4944_v50  ;;  %v631_v2 = vpop.xlane.xlu1 %630 }
 0x22a   : > { %v666_v40 = vmul.f32 %v4968_v25, %v631_v2 }
 0x22c   : > { %v4946_v18 = vpop.xlane.xlu0 %627 }
 0x22d   : > { %5797 = vst [vmem:[#allocation53_spill] sm:$0xff] %v4946_v18  ;;  %v637_v4 = vpop.xlane.xlu1 %636  ;;  %v2736_v18 = vpop.eup %2735  ;;  %2767 = vrcp.f32 %v4931_v60 }
 0x22e   : > { %v2738_v21 = vpop.eup %2737 }
 0x22f   : > { %v2740_v57 = vpop.eup %2739  ;;  %v689_v38 = vmul.f32 %v2738_v21, %v666_v40 }
 0x230   : > { %v634_v62 = vpop.xlane.xlu0 %633 }
 0x231   : > { %v643_v48 = vpop.xlane.xlu1 %642 }
 0x232   : > { %v670_v45 = vmul.f32 %v4968_v25, %v643_v48 }
 0x234   : > { %v4948_v12 = vpop.xlane.xlu0 %639 }
 0x235   : > { %v4950_v55 = vpop.xlane.xlu1 %648 }
 0x238   : > { %v4952_v58 = vpop.xlane.xlu0 %645 }
 0x239   : > { %v4955_v8 = vpop.xlane.xlu1 %654 }
 0x23c   : > { %v4957_v16 = vpop.xlane.xlu0 %651 }
 0x23f   : > { %v4960_v46 = vpop.xlane.xlu1 %1086 }
 0x240   : > { %v4962_v59 = vpop.xlane.xlu0 %657 }
 0x243   : > { %v4965_v35 = vpop.xlane.xlu1 %1092 }
 0x244   : > { %v4972_v27 = vpop.xlane.xlu0 %1089 }
 0x247   : > { %v1099_v24 = vpop.xlane.xlu1 %1098 }
 0x248   : > { %v1138_v17 = vmul.f32 %v4974_v34, %v1099_v24  ;;  %v4979_v53 = vpop.xlane.xlu0 %1095  ;;  %v668_v24 = vmul.f32 %v4968_v25, %v637_v4 }
 0x24a   : > { %v1159_v29 = vmul.f32 %v2736_v18, %v1138_v17  ;;  %v2742_v18 = vpop.eup %2741  ;;  %v667_v17 = vmul.f32 %v4968_v25, %v634_v62  ;;  %v669_v62 = vmul.f32 %v4968_v25, %v4948_v12  ;;  %v5803_v12 = vld [vmem:[#allocation96_spill] sm:$0xff] }
 0x24b   : > { %v1105_v32 = vpop.xlane.xlu1 %1104 }
 0x24c   : > { %v4981_v10 = vadd.f32 %v1159_v29, %v685_v3  ;;  %v1140_v50 = vmul.f32 %v4974_v34, %v1105_v32  ;;  %v4986_v22 = vpop.xlane.xlu0 %1101  ;;  %v2744_v29 = vpop.eup %2743  ;;  %v693_v32 = vmul.f32 %v2742_v18, %v668_v24 }
 0x24d   : > { %v2746_v3 = vpop.eup %2745 }
 0x24e   : > { %5798 = vst [vmem:[#allocation54_spill] sm:$0xff] %v4981_v10  ;;  %v1163_v47 = vmul.f32 %v2740_v57, %v1140_v50  ;;  %v2748_v4 = vpop.eup %2747 }
 0x24f   : > { %v1111_v2 = vpop.xlane.xlu1 %1110  ;;  %v2750_v15 = vpop.eup %2749  ;;  %v697_v24 = vmul.f32 %v2748_v4, %v670_v45  ;;  %v671_v4 = vmul.f32 %v4968_v25, %v4952_v58 }
 0x250   : > { %v4988_v61 = vadd.f32 %v1163_v47, %v689_v38  ;;  %v1142_v51 = vmul.f32 %v4974_v34, %v1111_v2  ;;  %v1108_v40 = vpop.xlane.xlu0 %1107  ;;  %v2752_v47 = vpop.eup %2751  ;;  %v691_v2 = vmul.f32 %v2746_v3, %v667_v17  ;;  %v5802_v17 = vld [vmem:[#allocation95_spill] sm:$0xff] }
 0x251   : > { %v1141_v57 = vmul.f32 %v4974_v34, %v1108_v40 }
 0x252   : > { %5799 = vst [vmem:[#allocation55_spill] sm:$0xff] %v4988_v61  ;;  %v1167_v21 = vmul.f32 %v2744_v29, %v1142_v51  ;;  %v2754_v51 = vpop.eup %2753 }
 0x253   : > { %v1117_v50 = vpop.xlane.xlu1 %1116  ;;  %v1165_v61 = vmul.f32 %v2750_v15, %v1141_v57  ;;  %v695_v45 = vmul.f32 %v2754_v51, %v669_v62  ;;  %v5805_v62 = vld [vmem:[#allocation97_spill] sm:$0xff]  ;;  %v5806_v51 = vld [vmem:[#allocation98_spill] sm:$0xff] }
 0x254   : > { %v4994_v10 = vadd.f32 %v1167_v21, %v693_v32  ;;  %v1144_v38 = vmul.f32 %v4974_v34, %v1117_v50  ;;  %v1114_v48 = vpop.xlane.xlu0 %1113  ;;  %v2756_v21 = vpop.eup %2755 }
 0x255   : > { %v5000_v29 = vadd.f32 %v1165_v61, %v691_v2  ;;  %v1143_v40 = vmul.f32 %v4974_v34, %v1114_v48 }
 0x256   : > { %5800 = vst [vmem:[#allocation58_spill] sm:$0xff] %v4994_v10  ;;  %v1171_v18 = vmul.f32 %v2752_v47, %v1144_v38  ;;  %v2758_v47 = vpop.eup %2757 }
 0x257   : > { %v1379_v32 = vpop.xlane.xlu1 %1378  ;;  %v1169_v15 = vmul.f32 %v2756_v21, %v1143_v40  ;;  %v699_v40 = vmul.f32 %v2758_v47, %v671_v4  ;;  %v672_v4 = vmul.f32 %v4968_v25, %v4950_v55  ;;  %v674_v55 = vmul.f32 %v4968_v25, %v4955_v8 }
 0x258   : > { %v5004_v50 = vadd.f32 %v1171_v18, %v697_v24  ;;  %v1411_v3 = vsub.f32 %v5802_v17, %v1379_v32  ;;  %v1412_v57 = vsub.f32 %v5803_v12, %v1379_v32  ;;  %v1120_v38 = vpop.xlane.xlu0 %1119  ;;  %v2760_v18 = vpop.eup %2759 }
 0x259   : > { %v5012_v0 = vadd.f32 %v1169_v15, %v695_v45  ;;  %v1145_v2 = vmul.f32 %v4974_v34, %v1120_v38 }
 0x25a   : > { %5801 = vst [vmem:[#allocation59_spill] sm:$0xff] %v5004_v50  ;;  %v1471_v49 = vmul.f32 1.442695, %v1411_v3  ;;  %v1473_v61 = vmul.f32 1.442695, %v1412_v57  ;;  %v5808_v3 = vld [vmem:[#allocation99_spill] sm:$0xff] }
 0x25b   : > { %5804 = vst [vmem:[#allocation60_spill] sm:$0xff] %v5012_v0  ;;  %v1382_v24 = vpop.xlane.xlu1 %1381  ;;  %v1173_v30 = vmul.f32 %v2760_v18, %v1145_v2  ;;  %v5809_v57 = vld [vmem:[#allocation100_spill] sm:$0xff] }
 0x25c   : > { %2769 = vpow2.f32 %v1471_v49  ;;  %v1413_v48 = vsub.f32 %v5805_v62, %v1382_v24  ;;  %v1414_v58 = vsub.f32 %v5806_v51, %v1382_v24  ;;  %v1844_v17 = vpop.xlane.xlu0 %1843  ;;  %v2762_v24 = vpop.eup %2761 }
 0x25d   : > { %2771 = vpow2.f32 %v1473_v61  ;;  %v5018_v60 = vadd.f32 %v1173_v30, %v699_v40  ;;  %v1879_v12 = vsub.f32 %v5808_v3, %v1844_v17  ;;  %v1880_v45 = vsub.f32 %v5809_v57, %v1844_v17  ;;  %v2764_v62 = vpop.eup %2763 }
 0x25e   : > { %v1475_v32 = vmul.f32 1.442695, %v1413_v48  ;;  %v1477_v21 = vmul.f32 1.442695, %v1414_v58  ;;  %2773 = vrcp.f32 %v4887_v1  ;;  %v2766_v40 = vpop.eup %2765 }
 0x25f   : > { %5807 = vst [vmem:[#allocation61_spill] sm:$0xff] %v5018_v60  ;;  %v5022_v15 = vpop.xlane.xlu1 %1852  ;;  %v1933_v49 = vmul.f32 1.442695, %v1879_v12  ;;  %v1935_v38 = vmul.f32 1.442695, %v1880_v45  ;;  %v705_v8 = vmul.f32 %v2766_v40, %v674_v55  ;;  %v5832_v60 = vld [vmem:[#allocation44_spill] sm:$0xff] }
 0x260   : > { %2775 = vpow2.f32 %v1475_v32  ;;  %v1847_v61 = vpop.xlane.xlu0 %1846 }
 0x261   : > { %2777 = vpow2.f32 %v1477_v21  ;;  %v1881_v1 = vsub.f32 %v5775_v37, %v1847_v61  ;;  %v1882_v47 = vsub.f32 %v5774_v44, %v1847_v61  ;;  %v2768_v21 = vpop.eup %2767 }
 0x262   : > { %2779 = vrcp.f32 %v4934_v20  ;;  %v701_v20 = vmul.f32 %v2762_v24, %v672_v4 }
 0x263   : > { %2781 = vpow2.f32 %v1933_v49  ;;  %v1123_v2 = vpop.xlane.xlu1 %1122  ;;  %v1937_v48 = vmul.f32 1.442695, %v1881_v1  ;;  %v1939_v51 = vmul.f32 1.442695, %v1882_v47  ;;  %v1885_v1 = vsub.f32 %v5773_v14, %v5022_v15 }
 0x264   : > { %2783 = vpow2.f32 %v1935_v38  ;;  %v1146_v18 = vmul.f32 %v4974_v34, %v1123_v2  ;;  %v1850_v37 = vpop.xlane.xlu0 %1849 }
 0x265   : > { %2785 = vrcp.f32 %v4895_v28  ;;  %v1883_v44 = vsub.f32 %v5778_v52, %v1850_v37  ;;  %v1884_v30 = vsub.f32 %v5777_v26, %v1850_v37  ;;  %v673_v52 = vmul.f32 %v4968_v25, %v4957_v16 }
 0x266   : > { %2787 = vrcp.f32 %v4938_v13  ;;  %v1175_v58 = vmul.f32 %v2764_v62, %v1146_v18  ;;  %v5812_v62 = vld [vmem:[#allocation102_spill] sm:$0xff] }
 0x267   : > { %2789 = vpow2.f32 %v1937_v48  ;;  %v1129_v32 = vpop.xlane.xlu1 %1128  ;;  %v1941_v3 = vmul.f32 1.442695, %v1883_v44  ;;  %v1943_v12 = vmul.f32 1.442695, %v1884_v30  ;;  %v1886_v48 = vsub.f32 %v5812_v62, %v5022_v15 }
 0x268   : > { %2791 = vpow2.f32 %v1939_v51  ;;  %v5036_v28 = vadd.f32 %v1175_v58, %v701_v20  ;;  %v1148_v17 = vmul.f32 %v4974_v34, %v1129_v32  ;;  %v1856_v49 = vpop.xlane.xlu0 %1855  ;;  %v675_v30 = vmul.f32 %v4968_v25, %v4962_v59 }
 0x269   : > { %v2770_v13 = vpop.eup %2769  ;;  %2793 = vpow2.f32 %v1941_v3  ;;  %v1945_v32 = vmul.f32 1.442695, %v1885_v1  ;;  %v1887_v15 = vsub.f32 %v5781_v56, %v1856_v49 }
 0x26a   : > { %5810 = vst [vmem:[#allocation62_spill] sm:$0xff] %v5036_v28  ;;  %v2772_v57 = vpop.eup %2771  ;;  %v1179_v45 = vmul.f32 %v2768_v21, %v1148_v17  ;;  %v1555_v38 = vmul.f32 %v2770_v13, %v3126_v6  ;;  %2795 = vpow2.f32 %v1943_v12 }
 0x26b   : > { %v5042_v26 = vpop.xlane.xlu1 %1480  ;;  %v1521_v4 = vadd.f32 %v2772_v57, %v2770_v13  ;;  %v2774_v61 = vpop.eup %2773  ;;  %v1556_v2 = vmul.f32 %v2772_v57, %v3128_v7  ;;  %v1947_v57 = vmul.f32 1.442695, %v1886_v48  ;;  %2797 = vpow2.f32 %v1945_v32 }
 0x26c   : > { %v5046_v47 = vadd.f32 %v1179_v45, %v705_v8  ;;  %v1126_v16 = vpop.xlane.xlu0 %1125  ;;  %v703_v44 = vmul.f32 %v2774_v61, %v673_v52  ;;  %v1888_v8 = vsub.f32 %v5780_v33, %v1856_v49  ;;  %v1949_v48 = vmul.f32 1.442695, %v1887_v15 }
 0x26d   : > { %v2776_v24 = vpop.eup %2775  ;;  %1522 = vadd.xlane.f32.xlu1 %v1521_v4  ;;  %v5051_v51 = vadd.f32 %v1556_v2, %v1555_v38  ;;  %v1147_v58 = vmul.f32 %v4974_v34, %v1126_v16  ;;  %2799 = vpow2.f32 %v1947_v57 }
 0x26e   : > { %5811 = vst [vmem:[#allocation63_spill] sm:$0xff] %v5046_v47  ;;  %v2778_v18 = vpop.eup %2777  ;;  %v1557_v20 = vmul.f32 %v2776_v24, %v3126_v6  ;;  %2801 = vpow2.f32 %v1949_v48  ;;  %v5818_v48 = vld [vmem:[#allocation27_spill] sm:$0xff] }
 0x26f   : > { %v2780_v55 = vpop.eup %2779  ;;  %v5055_v14 = vpop.xlane.xlu1 %1486  ;;  %v1558_v37 = vmul.f32 %v2778_v18, %v3128_v7 }
 0x270   : > { %v2782_v40 = vpop.eup %2781  ;;  %v1177_v17 = vmul.f32 %v2780_v55, %v1147_v58  ;;  %v1132_v45 = vpop.xlane.xlu0 %1131 }
 0x271   : > { %v2784_v21 = vpop.eup %2783  ;;  %v2023_v13 = vmul.f32 %v2782_v40, %v3126_v6  ;;  %v5062_v3 = vadd.f32 %v1558_v37, %v1557_v20  ;;  %v1149_v59 = vmul.f32 %v4974_v34, %v1132_v45  ;;  %v1951_v20 = vmul.f32 1.442695, %v1888_v8  ;;  %v5816_v45 = vld [vmem:[#allocation29_spill] sm:$0xff] }
 0x272   : > { %v2786_v12 = vpop.eup %2785  ;;  %v1986_v38 = vadd.f32 %v2784_v21, %v2782_v40  ;;  %v2024_v52 = vmul.f32 %v2784_v21, %v3128_v7  ;;  %v5066_v61 = vadd.f32 %v1177_v17, %v703_v44  ;;  %v5815_v21 = vld [vmem:[#allocation28_spill] sm:$0xff] }
 0x273   : > { %v2788_v4 = vpop.eup %2787  ;;  %v5069_v1 = vpop.xlane.xlu1 %1492  ;;  %v707_v2 = vmul.f32 %v2786_v12, %v675_v30  ;;  %2803 = vpow2.f32 %v1951_v20  ;;  %v1524_v12 = vadd.f32 %v2778_v18, %v2776_v24 }
 0x274   : > { %5813 = vst [vmem:[#allocation64_spill] sm:$0xff] %v5066_v61  ;;  %v2790_v56 = vpop.eup %2789  ;;  %1987 = vadd.xlane.f32.xlu0 %v1986_v38  ;;  %v5071_v62 = vadd.f32 %v2024_v52, %v2023_v13  ;;  %v1181_v33 = vmul.f32 %v2788_v4, %v1149_v59  ;;  %v1484_v55 = vpop.xlane.xlu0 %1483  ;;  %2805 = vrcp.f32 %v4903_v54 }
 0x275   : > { %v2792_v16 = vpop.eup %2791  ;;  %v2025_v49 = vmul.f32 %v2790_v56, %v3126_v6  ;;  %2807 = vrcp.f32 %v4839_v9  ;;  %v1135_v9 = vmul.f32 %v4974_v34, %v4972_v27 }
 0x276   : > { %v1989_v58 = vadd.f32 %v2792_v16, %v2790_v56  ;;  %v2026_v37 = vmul.f32 %v2792_v16, %v3128_v7  ;;  %v5075_v40 = vadd.f32 %v1181_v33, %v707_v2  ;;  %v2794_v30 = vpop.eup %2793  ;;  %v5817_v56 = vld [vmem:[#allocation26_spill] sm:$0xff]  ;;  %2809 = vrcp.f32 %v1484_v55 }
 0x277   : > { %v5077_v44 = vpop.xlane.xlu1 %1498  ;;  %v2796_v32 = vpop.eup %2795  ;;  %v2027_v15 = vmul.f32 %v2794_v30, %v3126_v6  ;;  %v5819_v33 = vld [vmem:[#allocation30_spill] sm:$0xff]  ;;  %2811 = vrcp.f32 %v4891_v5  ;;  %v661_v5 = vmul.f32 %v4968_v25, %v4942_v36 }
 0x278   : > { %5814 = vst [vmem:[#allocation65_spill] sm:$0xff] %v5075_v40  ;;  %1566 = vadd.xlane.f32.xlu0 %v5815_v21  ;;  %1990 = vadd.xlane.f32.xlu1 %v1989_v58  ;;  %v5080_v17 = vadd.f32 %v2026_v37, %v2025_v49  ;;  %v5083_v13 = vpop.xlane.xlu0 %1489  ;;  %v2028_v57 = vmul.f32 %v2796_v32, %v3128_v7  ;;  %v5096_v2 = vpop.eup %2797  ;;  %v5820_v21 = vld [vmem:[#allocation31_spill] sm:$0xff]  ;;  %2813 = vrcp.f32 %v4832_v43 }
 0x279   : > { %v1992_v4 = vadd.f32 %v2796_v32, %v2794_v30  ;;  %2815 = vrcp.f32 %v5042_v26  ;;  %v5830_v40 = vld [vmem:[#allocation43_spill] sm:$0xff]  ;;  %v5833_v26 = vld [vmem:[#allocation45_spill] sm:$0xff] }
 0x27a   : > { %v5089_v38 = vadd.f32 %v2028_v57, %v2027_v15  ;;  %v5100_v18 = vpop.eup %2799  ;;  %v5821_v57 = vld [vmem:[#allocation32_spill] sm:$0xff]  ;;  %2817 = vrcp.f32 %v4899_v63 }
 0x27b   : > { %v5086_v8 = vpop.xlane.xlu1 %1504  ;;  %v5106_v49 = vpop.eup %2801  ;;  %v1995_v58 = vadd.f32 %v5100_v18, %v5096_v2  ;;  %2819 = vrcp.f32 %v4841_v41 }
 0x27c   : > { %1525 = vadd.xlane.f32.xlu0 %v1524_v12  ;;  %1569 = vadd.xlane.f32.xlu1 %v5816_v45  ;;  %v5091_v52 = vpop.xlane.xlu0 %1495  ;;  %2821 = vrcp.f32 %v4911_v23 }
 0x27d   : > { %2823 = vrcp.f32 %v5055_v14 }
 0x27e   : > { %2825 = vrcp.f32 %v4848_v31  ;;  %v1137_v31 = vmul.f32 %v4974_v34, %v4979_v53 }
 0x27f   : > { %v5093_v59 = vpop.xlane.xlu1 %1954  ;;  %2827 = vrcp.f32 %v5083_v13 }
 0x280   : > { %2034 = vadd.xlane.f32.xlu1 %v5817_v56  ;;  %1993 = vadd.xlane.f32.xlu0 %v1992_v4  ;;  %v5098_v24 = vpop.xlane.xlu0 %1501  ;;  %v5112_v37 = vpop.eup %2803  ;;  %v5822_v56 = vld [vmem:[#allocation33_spill] sm:$0xff]  ;;  %2829 = vrcp.f32 %v5093_v59 }
 0x281   : > { %v1998_v15 = vadd.f32 %v5112_v37, %v5106_v49  ;;  %2831 = vrcp.f32 %v5069_v1 }
 0x283   : > { %v5102_v16 = vpop.xlane.xlu1 %1960 }
 0x284   : > { %1572 = vadd.xlane.f32.xlu1 %v5818_v48  ;;  %2037 = vadd.xlane.f32.xlu0 %v5819_v33  ;;  %v5108_v20 = vpop.xlane.xlu0 %1507  ;;  %v5823_v48 = vld [vmem:[#allocation34_spill] sm:$0xff] }
 0x287   : > { %v5114_v30 = vpop.xlane.xlu1 %1966 }
 0x288   : > { %2040 = vadd.xlane.f32.xlu1 %v5820_v21  ;;  %1996 = vadd.xlane.f32.xlu0 %v1995_v58  ;;  %v5117_v32 = vpop.xlane.xlu0 %1957  ;;  %v5824_v21 = vld [vmem:[#allocation36_spill] sm:$0xff] }
 0x289   : > { %2833 = vrcp.f32 %v5117_v32  ;;  %v5840_v32 = vld [vmem:[#allocation49_spill] sm:$0xff] }
 0x28b   : > { %v5121_v12 = vpop.xlane.xlu1 %1972 }
 0x28c   : > { %1575 = vadd.xlane.f32.xlu0 %v5821_v57  ;;  %1999 = vadd.xlane.f32.xlu1 %v1998_v15  ;;  %v5124_v45 = vpop.xlane.xlu0 %1963  ;;  %v5825_v15 = vld [vmem:[#allocation37_spill] sm:$0xff] }
 0x28f   : > { %v5126_v4 = vpop.xlane.xlu1 %1510 }
 0x290   : > { %2043 = vadd.xlane.f32.xlu0 %v5822_v56  ;;  %1578 = vadd.xlane.f32.xlu1 %v5823_v48  ;;  %v5132_v33 = vpop.xlane.xlu0 %1969  ;;  %v5826_v56 = vld [vmem:[#allocation38_spill] sm:$0xff]  ;;  %v5827_v48 = vld [vmem:[#allocation40_spill] sm:$0xff] }
 0x293   : > { %v5134_v58 = vpop.xlane.xlu1 %1513 }
 0x294   : > { %2046 = vadd.xlane.f32.xlu0 %v5824_v21  ;;  %1581 = vadd.xlane.f32.xlu1 %v5825_v15  ;;  %v5138_v57 = vpop.xlane.xlu0 %1975  ;;  %v5829_v15 = vld [vmem:[#allocation41_spill] sm:$0xff] }
 0x297   : > { %v5141_v54 = vpop.xlane.xlu1 %1516 }
 0x298   : > { %2049 = vadd.xlane.f32.xlu0 %v5826_v56  ;;  %1584 = vadd.xlane.f32.xlu1 %v5827_v48  ;;  %v5148_v55 = vpop.xlane.xlu0 %1978  ;;  %v2806_v56 = vpop.eup %2805  ;;  %v5157_v48 = vstv %s2412_s30 }
 0x299   : > { %v1153_v43 = vmul.f32 %v2806_v56, %v1135_v9  ;;  %v2808_v27 = vpop.eup %2807  ;;  %v660_v9 = vmul.f32 %v4968_v25, %v4936_v39 }
 0x29a   : > { %v679_v28 = vmul.f32 %v2808_v27, %v661_v5  ;;  %v2810_v36 = vpop.eup %2809  ;;  %v5834_v5 = vld [vmem:[#allocation46_spill] sm:$0xff] }
 0x29b   : > { %v5151_v21 = vpop.xlane.xlu1 %1519  ;;  %v2812_v56 = vpop.eup %2811 }
 0x29c   : > { %5828 = vst [vmem:[#allocation66_spill] sm:$0xff] %v5151_v21  ;;  %2052 = vadd.xlane.f32.xlu0 %v5829_v15  ;;  %1587 = vadd.xlane.f32.xlu1 %v5830_v40  ;;  %v5159_v47 = vpop.xlane.xlu0 %1981  ;;  %v1134_v15 = vmul.f32 %v4974_v34, %v4960_v46  ;;  %v1183_v40 = vadd.f32 %v1153_v43, %v679_v28 }
 0x29d   : > { %5831 = vst [vmem:[#allocation67_spill] sm:$0xff] %v5159_v47 }
 0x29e   : > { %v1151_v27 = vmul.f32 %v2812_v56, %v1134_v15  ;;  %v2030_v15 = vmul.f32 %v5100_v18, %v3128_v7 }
 0x29f   : > { %v1564_v61 = vpop.xlane.xlu1 %1563 }
 0x2a0   : > { %2055 = vadd.xlane.f32.xlu0 %v5832_v60  ;;  %1590 = vadd.xlane.f32.xlu1 %v5833_v26  ;;  %v1609_v50 = vmul.f32 %v5157_v48, %v1564_v61  ;;  %v5166_v0 = vpop.xlane.xlu0 %1984  ;;  %v5835_v60 = vld [vmem:[#allocation47_spill] sm:$0xff]  ;;  %v2814_v61 = vpop.eup %2813 }
 0x2a1   : > { %v677_v47 = vmul.f32 %v2814_v61, %v660_v9  ;;  %v2816_v28 = vpop.eup %2815  ;;  %v5839_v9 = vld [vmem:[#allocation50_spill] sm:$0xff] }
 0x2a2   : > { %v1627_v21 = vmul.f32 %v2810_v36, %v1609_v50  ;;  %v5836_v50 = vld [vmem:[#allocation48_spill] sm:$0xff]  ;;  %v2818_v41 = vpop.eup %2817  ;;  %2835 = vrcp.f32 %v5839_v9 }
 0x2a3   : > { %v1182_v43 = vadd.f32 %v1151_v27, %v677_v47  ;;  %v2820_v14 = vpop.eup %2819  ;;  %2837 = vrcp.f32 %v5102_v16 }
 0x2a4   : > { %v5170_v10 = vadd.f32 %v1627_v21, %v1183_v40  ;;  %2058 = vadd.xlane.f32.xlu0 %v5834_v5  ;;  %1593 = vadd.xlane.f32.xlu1 %v5835_v60  ;;  %v1561_v26 = vpop.xlane.xlu0 %1560  ;;  %v2029_v21 = vmul.f32 %v5096_v2, %v3126_v6  ;;  %2839 = vrcp.f32 %v5840_v32 }
 0x2a5   : > { %v1608_v46 = vmul.f32 %v5157_v48, %v1561_v26  ;;  %v5224_v26 = vstv %s2417_s3  ;;  %2841 = vrcp.f32 %v5091_v52 }
 0x2a6   : > { %2843 = vrcp.f32 %v5077_v44  ;;  %v5842_v44 = vld [vmem:[#allocation53_spill] sm:$0xff] }
 0x2a7   : > { %v1625_v39 = vmul.f32 %v2816_v28, %v1608_v46  ;;  %2845 = vrcp.f32 %v5124_v45  ;;  %v5843_v45 = vld [vmem:[#allocation8_spill] sm:$0xff] }
 0x2a8   : > { %2061 = vadd.xlane.f32.xlu0 %v5836_v50  ;;  %1596 = vadd.xlane.f32.xlu1 %v4821_v42  ;;  %v2075_v42 = vadd.f32 %v2030_v15, %v2029_v21  ;;  %v5841_v15 = vlaneseq  ;;  %2847 = vrcp.f32 %v5098_v24 }
 0x2a9   : > { %v5177_v36 = vadd.f32 %v1625_v39, %v1182_v43  ;;  %2849 = vrcp.f32 %v5114_v30 }
 0x2aa   : > { %2851 = vrcp.f32 %v5086_v8 }
 0x2ac   : > { %2064 = vadd.xlane.f32.xlu0 %v4823_v11  ;;  %1599 = vadd.xlane.f32.xlu1 %v4825_v19  ;;  %v2031_v11 = vmul.f32 %v5106_v49, %v3126_v6  ;;  %v2032_v19 = vmul.f32 %v5112_v37, %v3128_v7  ;;  %v1136_v6 = vmul.f32 %v4974_v34, %v4965_v35 }
 0x2ae   : > { %v2078_v47 = vadd.f32 %v2032_v19, %v2031_v11  ;;  %v1155_v23 = vmul.f32 %v2818_v41, %v1136_v6 }
 0x2b0   : > { %2067 = vadd.xlane.f32.xlu0 %v5071_v62  ;;  %1602 = vadd.xlane.f32.xlu1 %v5051_v51 }
 0x2b4   : > { %2070 = vadd.xlane.f32.xlu0 %v5080_v17  ;;  %1605 = vadd.xlane.f32.xlu1 %v5062_v3  ;;  %v5837_v3 = vld [vmem:[#allocation51_spill] sm:$0xff]  ;;  %v2822_v17 = vpop.eup %2821  ;;  %2853 = vrcp.f32 %v5132_v33 }
 0x2b5   : > { %v662_v63 = vmul.f32 %v4968_v25, %v5837_v3  ;;  %v2824_v18 = vpop.eup %2823  ;;  %v1157_v37 = vmul.f32 %v2822_v17, %v1137_v31  ;;  %v1139_v31 = vmul.f32 %v4974_v34, %v4986_v22  ;;  %2855 = vrcp.f32 %v5108_v20 }
 0x2b6   : > { %v2826_v53 = vpop.eup %2825  ;;  %2857 = vrcp.f32 %v5121_v12 }
 0x2b7   : > { %v681_v13 = vmul.f32 %v2820_v14, %v662_v63  ;;  %v2828_v61 = vpop.eup %2827  ;;  %v5243_v14 = vstv %s2418_s5  ;;  %2859 = vrcp.f32 %v5126_v4 }
 0x2b8   : > { %2073 = vadd.xlane.f32.xlu0 %v5089_v38  ;;  %2076 = vadd.xlane.f32.xlu1 %v2075_v42  ;;  %v5838_v38 = vld [vmem:[#allocation52_spill] sm:$0xff]  ;;  %v2830_v21 = vpop.eup %2829  ;;  %v5233_v42 = vand.u32 127, %v5841_v15  ;;  %2861 = vrcp.f32 %v5138_v57 }
 0x2b9   : > { %v663_v2 = vmul.f32 %v4968_v25, %v5838_v38  ;;  %v1184_v49 = vadd.f32 %v1155_v23, %v681_v13  ;;  %v2832_v3 = vpop.eup %2831  ;;  %2863 = vrcp.f32 %v5134_v58 }
 0x2ba   : > { %v2834_v23 = vpop.eup %2833  ;;  %2865 = vrcp.f32 %v5148_v55 }
 0x2bb   : > { %v683_v5 = vmul.f32 %v2826_v53, %v663_v2  ;;  %v2193_v2 = vadd.s32 4294967280, %v5233_v42  ;;  %v2836_v22 = vpop.eup %2835  ;;  %2867 = vrcp.f32 %v5141_v54 }
 0x2bc   : > { %2079 = vadd.xlane.f32.xlu0 %v2078_v47  ;;  %v2186_v47 = vadd.s32 4294967288, %v5233_v42  ;;  %v2838_v30 = vpop.eup %2837 }
 0x2bd   : > { %v1185_v46 = vadd.f32 %v1157_v37, %v683_v5  ;;  %v2840_v53 = vpop.eup %2839 }
 0x2be   : > { %v2189_v38 = vsub.s32 %v2186_v47, %v5843_v45  ;;  %v2200_v47 = vadd.s32 4294967272, %v5233_v42 }
 0x2c0   : > { %v2203_v12 = vsub.s32 %v2200_v47, %v5843_v45 }
 0x2f6   : > { %v5202_v7 = vpop.xlane.xlu1 %1522 }
 0x2fd   : > { %v5204_v51 = vpop.xlane.xlu0 %1987 }
 0x301   : > { %v5212_v62 = vpop.xlane.xlu1 %1990  ;;  %v1567_v35 = vpop.xlane.xlu0 %1566 }
 0x302   : > { %v1610_v59 = vmul.f32 %v5157_v48, %v1567_v35  ;;  %v665_v35 = vmul.f32 %v4968_v25, %v5842_v44  ;;  %v5844_v25 = vld [vmem:[#allocation54_spill] sm:$0xff] }
 0x304   : > { %v1629_v40 = vmul.f32 %v2824_v18, %v1610_v59  ;;  %v687_v5 = vmul.f32 %v2840_v53, %v665_v35 }
 0x305   : > { %v1570_v1 = vpop.xlane.xlu1 %1569  ;;  %v5219_v56 = vpop.xlane.xlu0 %1525 }
 0x306   : > { %v1658_v60 = vadd.f32 %v1629_v40, %v1184_v49  ;;  %v1611_v27 = vmul.f32 %v5157_v48, %v1570_v1  ;;  %v1161_v40 = vmul.f32 %v2836_v22, %v1139_v31 }
 0x308   : > { %v1631_v28 = vmul.f32 %v2828_v61, %v1611_v27  ;;  %v2196_v27 = vsub.s32 %v2193_v2, %v5843_v45 }
 0x309   : > { %v2035_v50 = vpop.xlane.xlu1 %2034  ;;  %v5226_v43 = vpop.xlane.xlu0 %1993 }
 0x30a   : > { %v5229_v39 = vadd.f32 %v1631_v28, %v1185_v46  ;;  %v2082_v16 = vmul.f32 %v5224_v26, %v2035_v50 }
 0x30c   : > { %v2099_v11 = vmul.f32 %v2830_v21, %v2082_v16  ;;  %v2842_v16 = vpop.eup %2841  ;;  %v1187_v21 = vadd.f32 %v1161_v40, %v687_v5  ;;  %v2214_v5 = vadd.s32 4294967256, %v5233_v42 }
 0x30d   : > { %v1573_v19 = vpop.xlane.xlu1 %1572  ;;  %v2038_v6 = vpop.xlane.xlu0 %2037 }
 0x30e   : > { %v2130_v52 = vadd.f32 %v2099_v11, %v5177_v36  ;;  %v1612_v63 = vmul.f32 %v5157_v48, %v1573_v19  ;;  %v2083_v41 = vmul.f32 %v5224_v26, %v2038_v6  ;;  %v2184_v36 = vsub.s32 %v5233_v42, %v5843_v45 }
 0x30f   : > { %v2217_v47 = vsub.s32 %v2214_v5, %v5843_v45 }
 0x310   : > { %v1633_v17 = vmul.f32 %v2832_v3, %v1612_v63  ;;  %v2101_v13 = vmul.f32 %v2834_v23, %v2083_v41  ;;  %v2148_v18 = vadd.f32 %v5243_v14, %v2130_v52 }
 0x311   : > { %v2041_v59 = vpop.xlane.xlu1 %2040  ;;  %v5253_v34 = vpop.xlane.xlu0 %1996 }
 0x312   : > { %v1660_v49 = vadd.f32 %v1633_v17, %v5844_v25  ;;  %v2131_v24 = vadd.f32 %v2101_v13, %v5170_v10  ;;  %v2084_v37 = vmul.f32 %v5224_v26, %v2041_v59  ;;  %v2185_v46 = vrot.slane %v2148_v18, %v2184_v36 }
 0x313   : > { %v2207_v17 = vadd.s32 4294967264, %v5233_v42 }
 0x314   : > { %v2149_v9 = vadd.f32 %v5243_v14, %v2131_v24  ;;  %v2103_v1 = vmul.f32 %v2838_v30, %v2084_v37 }
 0x315   : > { %v5262_v61 = vpop.xlane.xlu1 %1999  ;;  %v1576_v32 = vpop.xlane.xlu0 %1575  ;;  %v2210_v57 = vsub.s32 %v2207_v17, %v5843_v45 }
 0x316   : > { %v2190_v28 = vrot.slane %v2149_v9, %v2189_v38  ;;  %v2132_v10 = vadd.f32 %v2103_v1, %v1658_v60  ;;  %v1613_v50 = vmul.f32 %v5157_v48, %v1576_v32  ;;  %v2844_v60 = vpop.eup %2843  ;;  %v5845_v38 = vld [vmem:[#allocation55_spill] sm:$0xff] }
 0x317   : > { %v2846_v41 = vpop.eup %2845 }
 0x318   : > { %v2192_v15 = vsel %vm2191_vm0, %v2190_v28, %v2185_v46  ;;  %v2150_v8 = vadd.f32 %v5243_v14, %v2132_v10  ;;  %v1635_v11 = vmul.f32 %v2842_v16, %v1613_v50  ;;  %v2848_v44 = vpop.eup %2847  ;;  %v5846_v50 = vld [vmem:[#allocation67_spill] sm:$0xff]  ;;  %v2221_v16 = vadd.s32 4294967248, %v5233_v42 }
 0x319   : > { %v1579_v19 = vpop.xlane.xlu1 %1578  ;;  %v2044_v6 = vpop.xlane.xlu0 %2043  ;;  %2869 = vrcp.f32 %v5846_v50  ;;  %v2242_v50 = vadd.s32 4294967224, %v5233_v42 }
 0x31a   : > { %v2197_v3 = vrot.slane %v2150_v8, %v2196_v27  ;;  %v1661_v52 = vadd.f32 %v1635_v11, %v1187_v21  ;;  %v1614_v63 = vmul.f32 %v5157_v48, %v1579_v19  ;;  %v2085_v33 = vmul.f32 %v5224_v26, %v2044_v6  ;;  %v2850_v36 = vpop.eup %2849  ;;  %v5847_v8 = vld [vmem:[#allocation58_spill] sm:$0xff] }
 0x31b   : > { %v2852_v40 = vpop.eup %2851  ;;  %2871 = vrcp.f32 %v5166_v0 }
 0x31c   : > { %v2199_v20 = vsel %vm2198_vm1, %v2197_v3, %v2192_v15  ;;  %v1637_v23 = vmul.f32 %v2844_v60, %v1614_v63  ;;  %v2105_v31 = vmul.f32 %v2846_v41, %v2085_v33  ;;  %v2854_v32 = vpop.eup %2853 }
 0x31d   : > { %v1582_v35 = vpop.xlane.xlu1 %1581  ;;  %v2047_v13 = vpop.xlane.xlu0 %2046 }
 0x31e   : > { %v1662_v2 = vadd.f32 %v1637_v23, %v5845_v38  ;;  %v2133_v59 = vadd.f32 %v2105_v31, %v5229_v39  ;;  %v1615_v22 = vmul.f32 %v5157_v48, %v1582_v35  ;;  %v2086_v4 = vmul.f32 %v5224_v26, %v2047_v13  ;;  %v2856_v10 = vpop.eup %2855  ;;  %v5848_v35 = vld [vmem:[#allocation60_spill] sm:$0xff] }
 0x31f   : > { %v2858_v21 = vpop.eup %2857  ;;  %v2228_v31 = vadd.s32 4294967240, %v5233_v42 }
 0x320   : > { %v2151_v18 = vadd.f32 %v5243_v14, %v2133_v59  ;;  %v1639_v25 = vmul.f32 %v2848_v44, %v1615_v22  ;;  %v2107_v24 = vmul.f32 %v2850_v36, %v2086_v4  ;;  %v2860_v33 = vpop.eup %2859  ;;  %v5849_v4 = vld [vmem:[#allocation66_spill] sm:$0xff] }
 0x321   : > { %v1585_v37 = vpop.xlane.xlu1 %1584  ;;  %v2050_v30 = vpop.xlane.xlu0 %2049  ;;  %2873 = vrcp.f32 %v5849_v4 }
 0x322   : > { %v2204_v53 = vrot.slane %v2151_v18, %v2203_v12  ;;  %v1663_v9 = vadd.f32 %v1639_v25, %v5000_v29  ;;  %v2134_v39 = vadd.f32 %v2107_v24, %v1660_v49  ;;  %v1616_v1 = vmul.f32 %v5157_v48, %v1585_v37  ;;  %v2862_v12 = vpop.eup %2861 }
 0x323   : > { %v2087_v27 = vmul.f32 %v5224_v26, %v2050_v30  ;;  %v2231_v25 = vsub.s32 %v2228_v31, %v5843_v45  ;;  %v2864_v37 = vpop.eup %2863  ;;  %v5850_v30 = vld [vmem:[#allocation59_spill] sm:$0xff]  ;;  %2875 = vrcp.f32 %v5204_v51 }
 0x324   : > { %v2206_v58 = vsel %vm2205_vm2, %v2204_v53, %v2199_v20  ;;  %v2152_v46 = vadd.f32 %v5243_v14, %v2134_v39  ;;  %v1641_v28 = vmul.f32 %v2852_v40, %v1616_v1  ;;  %v2224_v20 = vsub.s32 %v2221_v16, %v5843_v45  ;;  %v5851_v16 = vld [vmem:[#allocation61_spill] sm:$0xff] }
 0x325   : > { %v2109_v29 = vmul.f32 %v2854_v32, %v2087_v27  ;;  %v1588_v49 = vpop.xlane.xlu1 %1587  ;;  %v2053_v55 = vpop.xlane.xlu0 %2052  ;;  %v2235_v1 = vadd.s32 4294967232, %v5233_v42  ;;  %2877 = vrcp.f32 %v5202_v7 }
 0x326   : > { %v2211_v15 = vrot.slane %v2152_v46, %v2210_v57  ;;  %v1664_v11 = vadd.f32 %v1641_v28, %v5847_v8  ;;  %v1617_v19 = vmul.f32 %v5157_v48, %v1588_v49  ;;  %v2088_v54 = vmul.f32 %v5224_v26, %v2053_v55  ;;  %v2866_v27 = vpop.eup %2865 }
 0x327   : > { %v2135_v6 = vadd.f32 %v2109_v29, %v1661_v52  ;;  %v2868_v28 = vpop.eup %2867  ;;  %2879 = vrcp.f32 %v5212_v62 }
 0x328   : > { %v2213_v60 = vsel %vm2212_vm3, %v2211_v15, %v2206_v58  ;;  %v1643_v3 = vmul.f32 %v2856_v10, %v1617_v19  ;;  %v2111_v63 = vmul.f32 %v2858_v21, %v2088_v54  ;;  %v2870_v29 = vpop.eup %2869  ;;  %v2238_v15 = vsub.s32 %v2235_v1, %v5843_v45 }
 0x329   : > { %v2153_v41 = vadd.f32 %v5243_v14, %v2135_v6  ;;  %v1591_v23 = vpop.xlane.xlu1 %1590  ;;  %v2056_v44 = vpop.xlane.xlu0 %2055  ;;  %2881 = vrcp.f32 %v5219_v56 }
 0x32a   : > { %v1665_v17 = vadd.f32 %v1643_v3, %v5848_v35  ;;  %v2136_v13 = vadd.f32 %v2111_v63, %v1662_v2  ;;  %v1618_v52 = vmul.f32 %v5157_v48, %v1591_v23  ;;  %v2089_v0 = vmul.f32 %v5224_v26, %v2056_v44 }
 0x32b   : > { %v2218_v36 = vrot.slane %v2153_v41, %v2217_v47  ;;  %v2872_v47 = vpop.eup %2871  ;;  %2883 = vrcp.f32 %v5226_v43  ;;  %v2249_v63 = vadd.s32 4294967216, %v5233_v42  ;;  %v5852_v41 = vld [vmem:[#allocation62_spill] sm:$0xff] }
 0x32c   : > { %v2154_v38 = vadd.f32 %v5243_v14, %v2136_v13  ;;  %v1645_v59 = vmul.f32 %v2860_v33, %v1618_v52  ;;  %v2113_v22 = vmul.f32 %v2862_v12, %v2089_v0  ;;  %2885 = vrcp.f32 %v5253_v34 }
 0x32d   : > { %v2220_v18 = vsel %vm2219_vm4, %v2218_v36, %v2213_v60  ;;  %v1594_v24 = vpop.xlane.xlu1 %1593  ;;  %v2059_v57 = vpop.xlane.xlu0 %2058  ;;  %v2245_v60 = vsub.s32 %v2242_v50, %v5843_v45  ;;  %v2252_v12 = vsub.s32 %v2249_v63, %v5843_v45  ;;  %2887 = vrcp.f32 %v5262_v61 }
 0x32e   : > { %v2225_v2 = vrot.slane %v2154_v38, %v2224_v20  ;;  %v1666_v40 = vadd.f32 %v1645_v59, %v5850_v30  ;;  %v2137_v53 = vadd.f32 %v2113_v22, %v1663_v9  ;;  %v1619_v39 = vmul.f32 %v5157_v48, %v1594_v24  ;;  %v2874_v52 = vpop.eup %2873 }
 0x32f   : > { %v2090_v5 = vmul.f32 %v5224_v26, %v2059_v57  ;;  %v2270_v50 = vadd.s32 4294967192, %v5233_v42 }
 0x330   : > { %v2227_v32 = vsel %vm2226_vm5, %v2225_v2, %v2220_v18  ;;  %v2155_v58 = vadd.f32 %v5243_v14, %v2137_v53  ;;  %v1647_v46 = vmul.f32 %v2864_v37, %v1619_v39  ;;  %v2876_v59 = vpop.eup %2875 }
 0x331   : > { %v2115_v9 = vmul.f32 %v2866_v27, %v2090_v5  ;;  %v1597_v10 = vpop.xlane.xlu1 %1596  ;;  %v2062_v51 = vpop.xlane.xlu0 %2061  ;;  %v2277_v27 = vadd.s32 4294967184, %v5233_v42 }
 0x332   : > { %v2232_v49 = vrot.slane %v2155_v58, %v2231_v25  ;;  %v1667_v55 = vadd.f32 %v1647_v46, %v5851_v16  ;;  %v1620_v21 = vmul.f32 %v5157_v48, %v1597_v10  ;;  %v2091_v7 = vmul.f32 %v5224_v26, %v2062_v51  ;;  %v2878_v25 = vpop.eup %2877 }
 0x333   : > { %v2138_v8 = vadd.f32 %v2115_v9, %v1664_v11 }
 0x334   : > { %v2234_v62 = vsel %vm2233_vm6, %v2232_v49, %v2227_v32  ;;  %v1649_v19 = vmul.f32 %v2868_v28, %v1620_v21  ;;  %v2117_v54 = vmul.f32 %v2870_v29, %v2091_v7  ;;  %v2880_v61 = vpop.eup %2879  ;;  %v5853_v7 = vld [vmem:[#allocation64_spill] sm:$0xff] }
 0x335   : > { %v2156_v6 = vadd.f32 %v5243_v14, %v2138_v8  ;;  %v1600_v3 = vpop.xlane.xlu1 %1599  ;;  %v2065_v33 = vpop.xlane.xlu0 %2064 }
 0x336   : > { %v1668_v11 = vadd.f32 %v1649_v19, %v5852_v41  ;;  %v2139_v20 = vadd.f32 %v2117_v54, %v1665_v17  ;;  %v2092_v56 = vmul.f32 %v5224_v26, %v2065_v33  ;;  %v2256_v17 = vadd.s32 4294967208, %v5233_v42  ;;  %v2882_v28 = vpop.eup %2881  ;;  %v5854_v54 = vld [vmem:[#allocation63_spill] sm:$0xff] }
 0x337   : > { %v2239_v23 = vrot.slane %v2156_v6, %v2238_v15  ;;  %v1621_v36 = vmul.f32 %v5157_v48, %v1600_v3  ;;  %v2280_v19 = vsub.s32 %v2277_v27, %v5843_v45  ;;  %v2273_v33 = vsub.s32 %v2270_v50, %v5843_v45 }
 0x338   : > { %v2157_v31 = vadd.f32 %v5243_v14, %v2139_v20  ;;  %v2119_v44 = vmul.f32 %v2872_v47, %v2092_v56  ;;  %v2259_v30 = vsub.s32 %v2256_v17, %v5843_v45  ;;  %v2884_v29 = vpop.eup %2883  ;;  %v2284_v41 = vadd.s32 4294967176, %v5233_v42 }
 0x339   : > { %v2241_v43 = vsel %vm2240_vm7, %v2239_v23, %v2234_v62  ;;  %v1603_v35 = vpop.xlane.xlu1 %1602  ;;  %v2068_v13 = vpop.xlane.xlu0 %2067  ;;  %v1651_v39 = vmul.f32 %v2874_v52, %v1621_v36 }
 0x33a   : > { %v2246_v34 = vrot.slane %v2157_v31, %v2245_v60  ;;  %v2140_v0 = vadd.f32 %v2119_v44, %v1666_v40  ;;  %v2093_v38 = vmul.f32 %v5224_v26, %v2068_v13  ;;  %v1622_v18 = vmul.f32 %v5157_v48, %v1603_v35  ;;  %v2886_v21 = vpop.eup %2885 }
 0x33b   : > { %v2263_v40 = vadd.s32 4294967200, %v5233_v42  ;;  %v1669_v15 = vadd.f32 %v1651_v39, %v5853_v7  ;;  %v2888_v44 = vpop.eup %2887  ;;  %v2287_v42 = vsub.s32 %v2284_v41, %v5843_v45 }
 0x33c   : > { %v2248_v22 = vsel %vm2247_vm8, %v2246_v34, %v2241_v43  ;;  %v2158_v4 = vadd.f32 %v5243_v14, %v2140_v0  ;;  %v2121_v24 = vmul.f32 %v2876_v59, %v2093_v38  ;;  %v1653_v58 = vmul.f32 %v2878_v25, %v1622_v18  ;;  %v5855_v43 = vld [vmem:[#allocation65_spill] sm:$0xff] }
 0x33d   : > { %v1606_v57 = vpop.xlane.xlu1 %1605  ;;  %v2071_v37 = vpop.xlane.xlu0 %2070  ;;  %v2266_v49 = vsub.s32 %v2263_v40, %v5843_v45 }
 0x33e   : > { %v2253_v2 = vrot.slane %v2158_v4, %v2252_v12  ;;  %v2094_v53 = vmul.f32 %v5224_v26, %v2071_v37  ;;  %v2141_v1 = vadd.f32 %v2121_v24, %v1667_v55  ;;  %v1623_v5 = vmul.f32 %v5157_v48, %v1606_v57 }
 0x33f   : > { %v1670_v47 = vadd.f32 %v1653_v58, %v5854_v54 }
 0x340   : > { %v2255_v32 = vsel %vm2254_vm9, %v2253_v2, %v2248_v22  ;;  %v2123_v46 = vmul.f32 %v2880_v61, %v2094_v53  ;;  %v2159_v9 = vadd.f32 %v5243_v14, %v2141_v1  ;;  %v1655_v62 = vmul.f32 %v2882_v28, %v1623_v5 }
 0x341   : > { %v2077_v10 = vpop.xlane.xlu1 %2076  ;;  %v2074_v51 = vpop.xlane.xlu0 %2073 }
 0x342   : > { %v2142_v16 = vadd.f32 %v2123_v46, %v1668_v11  ;;  %v2096_v55 = vmul.f32 %v5224_v26, %v2077_v10  ;;  %v2095_v48 = vmul.f32 %v5224_v26, %v2074_v51  ;;  %v2260_v8 = vrot.slane %v2159_v9, %v2259_v30 }
 0x343   : > { %v1671_v12 = vadd.f32 %v1655_v62, %v5855_v43 }
 0x344   : > { %v2160_v6 = vadd.f32 %v5243_v14, %v2142_v16  ;;  %v2127_v60 = vmul.f32 %v2886_v21, %v2096_v55  ;;  %v2125_v3 = vmul.f32 %v2884_v29, %v2095_v48  ;;  %v2262_v63 = vsel %vm2261_vm10, %v2260_v8, %v2255_v32 }
 0x345   : > { %v2080_v11 = vpop.xlane.xlu0 %2079 }
 0x346   : > { %v2267_v20 = vrot.slane %v2160_v6, %v2266_v49  ;;  %v2144_v56 = vadd.f32 %v2127_v60, %v1670_v47  ;;  %v2143_v23 = vadd.f32 %v2125_v3, %v1669_v15  ;;  %v2097_v31 = vmul.f32 %v5224_v26, %v2080_v11 }
 0x348   : > { %v2162_v35 = vadd.f32 %v5243_v14, %v2144_v56  ;;  %v2161_v13 = vadd.f32 %v5243_v14, %v2143_v23  ;;  %v2129_v52 = vmul.f32 %v2888_v44, %v2097_v31  ;;  %v2269_v34 = vsel %vm2268_vm11, %v2267_v20, %v2262_v63 }
 0x34a   : > { %v2281_v0 = vrot.slane %v2162_v35, %v2280_v19  ;;  %v2274_v17 = vrot.slane %v2161_v13, %v2273_v33  ;;  %v2145_v36 = vadd.f32 %v2129_v52, %v1671_v12 }
 0x34c   : > { %v2163_v26 = vadd.f32 %v5243_v14, %v2145_v36  ;;  %v2276_v38 = vsel %vm2275_vm12, %v2274_v17, %v2269_v34 }
 0x34d   : > { %v2283_v59 = vsel %vm2282_vm13, %v2281_v0, %v2276_v38 }
 0x34e   : > { %v2288_v22 = vrot.slane %v2163_v26, %v2287_v42 }
 0x350   : > { %v2290_v45 = vsel %vm2289_vm14, %v2288_v22, %v2283_v59 }
 0x351   : > { %2292 = vst [vmem:[%s161_s17] sm:$0x1] %v2290_v45 }
 0x352   : > { %2917 = shalt.err (!%p2914_p2)
}
 0x353   : > { %s2918_s30 = scalar_lea.hbm %s5366_s25, 16  ;;  %s2922_s6 = scalar_lea.hbm %s5414_s2, 64 }
 0x354   : > { %p2919_p4 = scmp.ne.s32.totalorder %s5366_s25, %s2918_s30  ;;  %p2923_p7 = scmp.lt.s32.totalorder %s5366_s25, %s5414_s2 }
 0x355   : > { %p2924_p9 = scmp.lt.s32.totalorder %s2922_s6, %s2918_s30 }
 0x356   : > { %p2920_p5 = pnand %p2919_p4, %p3071_p3 }
 0x357   : > { %p2925_p11 = por %p2924_p9, %p2923_p7 }
 0x358   : > { %p2921_p6 = pneg %p2920_p5 }
 0x35a   : > { %p2926_p8 = pnand %p2925_p11, %p2921_p6 }
 0x35c   : > { %2929 = shalt.err (!%p2926_p8)
}
 0x35d   : > { %2427 = dma.vmem_to_hbm [thread:$0]  (%p3071_p3), %s2309_s18, 16, %s5366_s25, %s2294_s12  }
 0x35e PF: > { %p2439_p10 = scmp.ge.s32.totalorder %s3000_s16, 2  ;;  %s2320_s13 = sand.u32 1, %s2972_s9  }
 0x35f   : > { %p5856_p12 = scmp.ne.s32.totalorder %s5529_s24, 0  ;;  %s2321_s17 = scalar_lea.sflag [#allocation3], %s2320_s13 }
 0x361   : > { %p2434_p13 = pnand %p2439_p10, %p5856_p12 }
 0x363   : > { %p2435_p0 = pneg %p2434_p13 }
 0x365   : > { %2967 = dma.done.wait (%p2435_p0), %s2321_s17, 16  }
 0x366   : > { %2969 = vsyncadd (%p2435_p0), %s2321_s17, 4294967280  ;;  %s16_s16 = sadd.s32 1, %s3000_s16   ;;  %s5857_s9 = smov %s2976_s10 }
 0x367   : > { %p13_p1 = scmp.ge.s32.totalorder %s16_s16, 6   ;;  %s5858_s10 = smov %s2980_s11 }
 0x368   : > { %s5859_s11 = smov %s3101_s4  ;;  %s5860_s12 = smov %s2992_s14 }
 0x369   : > { %s5861_s13 = smov %s2996_s15  ;;  %s5862_s14 = smov %s5865_s19 }
 0x36a   : > { %s5863_s15 = smov %s5869_s20  ;;  %15 = sbr.rel (!%p13_p1) target bundleno = 6 (0x6), region = 69 }
 0x36f   :  { %2325 = vsyncpa [#allocation3], 1 }
 0x370   :  { %2327 = vsyncpa [#allocation3 + $0x1], 1 }
 0x371   :  { %2328 = vsyncpa [#allocation4], 1 }
 0x372   :  { %2330 = vsyncpa [#allocation4 + $0x1], 1 }

</bundles_post_ra>
